<compile_context>
chip_gen: v7x
topology: tpu7x:2x2x1
jax: 0.10.0
libtpu: 0.0.40
codegen_flags: <defaults>
</compile_context>

<pallas_src>
import jax
import jax.numpy as jnp
from jax.experimental import pallas as pl
from jax.experimental.pallas import tpu as pltpu

EPS = 1e-5
LANE = 128                     # lane width: pad MXU operand channels to this
ROW_TILE = 512                 # rows per grid step for the 2-D elementwise kernels
MM_DTYPE = jnp.bfloat16        # MXU input dtype (f32 accumulation)


def _round_up(x, m):
    return (x + m - 1) // m * m


def _vmem_limit_bytes():
    """Per-generation scoped-VMEM cap: ~3/4 of physical, never above 100 MiB."""
    cap = 64 * 1024 * 1024                       # conservative fallback (v7x)
    try:
        cap = int(getattr(pltpu.get_tpu_info(), "vmem_capacity_bytes", cap))
    except Exception:
        pass
    return int(min(cap * 3 // 4, 100 * 1024 * 1024))


def _pad_vec(v, cp, fill=0.0):
    out = jnp.full((1, cp), fill, jnp.float32)
    return out.at[0, : v.shape[0]].set(v.astype(jnp.float32))


def _pad_taps(w_hwio, ci_p, co_p):
    """3x3 HWIO conv weight -> [9, ci_p, co_p] zero-padded per-tap matmul weights."""
    kh, kw, ci, co = w_hwio.shape
    t = jnp.zeros((kh * kw, ci_p, co_p), jnp.float32)
    t = t.at[:, :ci, :co].set(w_hwio.reshape(kh * kw, ci, co).astype(jnp.float32))
    return t.astype(MM_DTYPE)


def _pad_and_phase_split(a, stride):
    """Zero-pad H/W by 1 (conv padding) and regroup rows/cols into stride phases so
    every 3x3 tap of the strided conv is a *contiguous* slice inside the kernel:
        padded[n, s*bh+ph, s*bw+pw, :] == out[n*s*s + ph*s + pw, bh, bw, :]
    Pure XLA layout work (no 9x im2col duplication)."""
    n, h, w, c = a.shape
    hp = _round_up(h + 2, stride)
    wp = _round_up(w + 2, stride)
    a = jnp.pad(a, ((0, 0), (1, hp - h - 1), (1, wp - w - 1), (0, 0)))
    hb, wb = hp // stride, wp // stride
    a = a.reshape(n, hb, stride, wb, stride, c)
    a = jnp.transpose(a, (0, 2, 4, 1, 3, 5))
    return a.reshape(n * stride * stride, hb, wb, c), hb, wb


# --------------------------------------------------------------------------
# Kernel 1: tiled per-channel sum / sum-of-squares reduction (BN statistics).
# Operates on the native channel count (no lane padding -> no extra HBM bytes).
# --------------------------------------------------------------------------
def _col_stats_kernel(x_ref, sum_ref, ssq_ref):
    @pl.when(pl.program_id(0) == 0)
    def _init():
        sum_ref[...] = jnp.zeros_like(sum_ref)
        ssq_ref[...] = jnp.zeros_like(ssq_ref)

    x = x_ref[...].astype(jnp.float32)
    sum_ref[...] += jnp.sum(x, axis=0, keepdims=True)
    ssq_ref[...] += jnp.sum(x * x, axis=0, keepdims=True)


def _column_stats(x2d, n_valid_rows):
    """Per-channel mean / biased variance of x2d[:n_valid_rows] (padded rows are 0)."""
    m, c = x2d.shape
    tm = min(ROW_TILE, _round_up(m, 8))
    mp = _round_up(m, tm)
    if mp != m:
        x2d = jnp.pad(x2d, ((0, mp - m), (0, 0)))
    s, ss = pl.pallas_call(
        _col_stats_kernel,
        grid=(mp // tm,),
        in_specs=[pl.BlockSpec((tm, c), lambda i: (i, 0))],
        out_specs=(pl.BlockSpec((1, c), lambda i: (0, 0)),
                   pl.BlockSpec((1, c), lambda i: (0, 0))),
        out_shape=(jax.ShapeDtypeStruct((1, c), jnp.float32),
                   jax.ShapeDtypeStruct((1, c), jnp.float32)),
        compiler_params=pltpu.CompilerParams(dimension_semantics=("arbitrary",)),
    )(x2d)
    inv_n = 1.0 / float(n_valid_rows)
    mean = s * inv_n
    var = ss * inv_n - mean * mean      # f32 sum/sumsq accumulation
    return mean, var


# --------------------------------------------------------------------------
# Kernel 2: fused (folded-BN scale/shift) + ReLU over row tiles (native channels).
# --------------------------------------------------------------------------
def _bn_relu_kernel(x_ref, scale_ref, shift_ref, o_ref):
    y = jnp.maximum(x_ref[...] * scale_ref[...] + shift_ref[...], 0.0)
    o_ref[...] = y.astype(o_ref.dtype)


def _bn_relu(x2d, scale, shift, out_dtype):
    m, c = x2d.shape
    tm = min(ROW_TILE, _round_up(m, 8))
    mp = _round_up(m, tm)
    if mp != m:
        x2d = jnp.pad(x2d, ((0, mp - m), (0, 0)))
    out = pl.pallas_call(
        _bn_relu_kernel,
        grid=(mp // tm,),
        in_specs=[pl.BlockSpec((tm, c), lambda i: (i, 0)),
                  pl.BlockSpec((1, c), lambda i: (0, 0)),
                  pl.BlockSpec((1, c), lambda i: (0, 0))],
        out_specs=pl.BlockSpec((tm, c), lambda i: (i, 0)),
        out_shape=jax.ShapeDtypeStruct((mp, c), out_dtype),
        compiler_params=pltpu.CompilerParams(dimension_semantics=("parallel",)),
    )(x2d, scale, shift)
    return out[:m]


# --------------------------------------------------------------------------
# 3x3 conv core: 9 accumulated MXU matmuls over contiguous tap slices of a
# phase-split, zero-padded source ref ([stride*stride, Hb, Wb, ci], bf16).
# Kept as repeated acc += jnp.dot so Mosaic can use the MRB accumulate path (v7x).
# --------------------------------------------------------------------------
def _accum_3x3(src_ref, w_ref, stride, ho, wo, ci, co):
    acc = jnp.zeros((ho * wo, co), jnp.float32)
    for kh in range(3):
        for kw in range(3):
            tap = src_ref[(kh % stride) * stride + (kw % stride),
                          kh // stride: kh // stride + ho,
                          kw // stride: kw // stride + wo, :]
            acc += jnp.dot(tap.reshape(ho * wo, ci), w_ref[kh * 3 + kw],
                           preferred_element_type=jnp.float32)
    return acc


def _make_conv1_kernel(stride, ho, wo, ci, co, has_proj):
    """conv1 (3x3, stride s, no bias) fused with the 1x1 projection shortcut and the
    partial BN statistics (sum / sum^2) of both outputs.  y1 / shortcut stored bf16;
    stats accumulated from the f32 MXU accumulators.  Stats block is (8,128)-dense."""
    if has_proj:
        def kernel(a_ref, w_ref, xs_ref, ws_ref, y_ref, s_ref, st_ref):
            acc = _accum_3x3(a_ref, w_ref, stride, ho, wo, ci, co)
            y_ref[...] = acc.reshape(1, ho, wo, co).astype(y_ref.dtype)
            st_ref[0, 0:1, :] = jnp.sum(acc, axis=0, keepdims=True)
            st_ref[0, 1:2, :] = jnp.sum(acc * acc, axis=0, keepdims=True)
            sval = jnp.dot(xs_ref[...].reshape(ho * wo, ci), ws_ref[...],
                           preferred_element_type=jnp.float32)
            s_ref[...] = sval.reshape(1, ho, wo, co).astype(s_ref.dtype)
            st_ref[0, 2:3, :] = jnp.sum(sval, axis=0, keepdims=True)
            st_ref[0, 3:4, :] = jnp.sum(sval * sval, axis=0, keepdims=True)
            st_ref[0, 4:8, :] = jnp.zeros((4, co), jnp.float32)
    else:
        def kernel(a_ref, w_ref, y_ref, st_ref):
            acc = _accum_3x3(a_ref, w_ref, stride, ho, wo, ci, co)
            y_ref[...] = acc.reshape(1, ho, wo, co).astype(y_ref.dtype)
            st_ref[0, 0:1, :] = jnp.sum(acc, axis=0, keepdims=True)
            st_ref[0, 1:2, :] = jnp.sum(acc * acc, axis=0, keepdims=True)
            st_ref[0, 2:8, :] = jnp.zeros((6, co), jnp.float32)
    return kernel


def _make_conv2_kernel(ho, wo, cp):
    """conv2 (3x3, stride 1, bias) with fused BN2+ReLU prologue (padded VMEM scratch)
    and fused bias + shortcut-BN + residual add + final ReLU epilogue."""
    def kernel(y_ref, s_ref, w_ref, scale2_ref, shift2_ref,
               bias_ref, scale_s_ref, shift_s_ref, o_ref, a2p_buf):
        # prologue: zero ONLY the 1-pixel halo strips of the padded scratch.
        # (The interior is fully rewritten below; per-step strip zeroing stays
        #  correct even if the batch grid is sharded across TensorCores.)
        zrow = jnp.zeros((1, 1, wo + 2, cp), a2p_buf.dtype)
        zcol = jnp.zeros((1, ho + 2, 1, cp), a2p_buf.dtype)
        a2p_buf[:, 0:1, :, :] = zrow
        a2p_buf[:, ho + 1:ho + 2, :, :] = zrow
        a2p_buf[:, :, 0:1, :] = zcol
        a2p_buf[:, :, wo + 1:wo + 2, :] = zcol
        # a2 = relu(scale2 * y1 + shift2)  (y1 read as bf16, math in f32)
        sc = scale2_ref[...].reshape(1, 1, cp)
        sh = shift2_ref[...].reshape(1, 1, cp)
        a2 = jnp.maximum(y_ref[0].astype(jnp.float32) * sc + sh, 0.0)
        a2p_buf[0, 1:ho + 1, 1:wo + 1, :] = a2.astype(a2p_buf.dtype)
        # 3x3 conv, stride 1
        acc = _accum_3x3(a2p_buf, w_ref, 1, ho, wo, cp, cp)
        # epilogue: bias + shortcut BN + residual add + final ReLU (single store)
        shortcut = (s_ref[0].astype(jnp.float32).reshape(ho * wo, cp)
                    * scale_s_ref[...] + shift_s_ref[...])
        out = jnp.maximum(acc + bias_ref[...] + shortcut, 0.0)
        o_ref[...] = out.reshape(1, ho, wo, cp)
    return kernel


# ----------------------------- BasicBlock fwd -------------------------------
def basic_block_forward(x_nchw, params, stride):
    n, cin, h, w = x_nchw.shape
    cout = params["w1"].shape[-1]
    cpi = _round_up(cin, LANE)          # lane-padded channel counts for MXU operands
    cpo = _round_up(cout, LANE)
    has_proj = (stride != 1) or (cin != cout)
    vmem_limit = _vmem_limit_bytes()

    # NCHW -> NHWC at the native channel count (no padded-f32 copy of x).
    x = jnp.transpose(x_nchw, (0, 2, 3, 1)).astype(jnp.float32)    # [n,h,w,cin]
    m0 = n * h * w
    x2d = x.reshape(m0, cin)

    # ---- BN1 statistics (tiled Pallas reduction), folded into scale/shift ----
    mean1, var1 = _column_stats(x2d, m0)
    scale1 = params["gamma1"].astype(jnp.float32)[None, :] * jax.lax.rsqrt(var1 + EPS)
    shift1 = params["beta1"].astype(jnp.float32)[None, :] - mean1 * scale1

    # ---- a1 = ReLU(BN1(x)) at native channels, bf16; lane-pad only for the MXU ----
    a1 = _bn_relu(x2d, scale1, shift1, MM_DTYPE).reshape(n, h, w, cin)
    a1 = jnp.pad(a1, ((0, 0), (0, 0), (0, 0), (0, cpi - cin)))      # bf16 pad

    # layout glue (XLA): spatial zero-pad + stride-phase split (no im2col)
    ho = (h - 1) // stride + 1
    wo = (w - 1) // stride + 1
    a1ps, hb, wb = _pad_and_phase_split(a1, stride)                 # [n*s*s,hb,wb,cpi]
    m1 = n * ho * wo

    w1t = _pad_taps(params["w1"], cpi, cpo)                         # [9,cpi,cpo] bf16
    w2t = _pad_taps(params["w2"], cpo, cpo)
    mask_o = (jnp.arange(cpo) < cout).astype(jnp.float32)[None, :]  # zero padded lanes

    # ---- conv1 (3x3, stride) fused with shortcut conv + BN partial stats ----
    if has_proj:
        ws = (jnp.zeros((cpi, cpo), jnp.float32)
              .at[:cin, :cout].set(params["ws"].astype(jnp.float32))
              .astype(MM_DTYPE))
        xs = x[:, ::stride, ::stride, :].astype(MM_DTYPE)           # [n,ho,wo,cin]
        xs = jnp.pad(xs, ((0, 0), (0, 0), (0, 0), (0, cpi - cin)))
        conv1 = _make_conv1_kernel(stride, ho, wo, cpi, cpo, True)
        y1, s_in, st = pl.pallas_call(
            conv1,
            grid=(n,),
            in_specs=[
                pl.BlockSpec((stride * stride, hb, wb, cpi), lambda i: (i, 0, 0, 0)),
                pl.BlockSpec((9, cpi, cpo), lambda i: (0, 0, 0)),
                pl.BlockSpec((1, ho, wo, cpi), lambda i: (i, 0, 0, 0)),
                pl.BlockSpec((cpi, cpo), lambda i: (0, 0)),
            ],
            out_specs=(pl.BlockSpec((1, ho, wo, cpo), lambda i: (i, 0, 0, 0)),
                       pl.BlockSpec((1, ho, wo, cpo), lambda i: (i, 0, 0, 0)),
                       pl.BlockSpec((1, 8, cpo), lambda i: (i, 0, 0))),
            out_shape=(jax.ShapeDtypeStruct((n, ho, wo, cpo), MM_DTYPE),
                       jax.ShapeDtypeStruct((n, ho, wo, cpo), MM_DTYPE),
                       jax.ShapeDtypeStruct((n, 8, cpo), jnp.float32)),
            compiler_params=pltpu.CompilerParams(
                dimension_semantics=("parallel",),
                vmem_limit_bytes=vmem_limit),
        )(a1ps, w1t, xs, ws)
        st = jnp.sum(st, axis=0)                                    # [8, cpo]
        sum2, ssq2 = st[0:1], st[1:2]
        mean_s = st[2:3] / m1
        var_s = st[3:4] / m1 - mean_s * mean_s
        scale_s = _pad_vec(params["gammas"], cpo, 1.0) * jax.lax.rsqrt(var_s + EPS)
        shift_s = _pad_vec(params["betas"], cpo, 0.0) - mean_s * scale_s
        scale_s = scale_s * mask_o
        shift_s = shift_s * mask_o
    else:
        conv1 = _make_conv1_kernel(stride, ho, wo, cpi, cpo, False)
        y1, st = pl.pallas_call(
            conv1,
            grid=(n,),
            in_specs=[
                pl.BlockSpec((stride * stride, hb, wb, cpi), lambda i: (i, 0, 0, 0)),
                pl.BlockSpec((9, cpi, cpo), lambda i: (0, 0, 0)),
            ],
            out_specs=(pl.BlockSpec((1, ho, wo, cpo), lambda i: (i, 0, 0, 0)),
                       pl.BlockSpec((1, 8, cpo), lambda i: (i, 0, 0))),
            out_shape=(jax.ShapeDtypeStruct((n, ho, wo, cpo), MM_DTYPE),
                       jax.ShapeDtypeStruct((n, 8, cpo), jnp.float32)),
            compiler_params=pltpu.CompilerParams(
                dimension_semantics=("parallel",),
                vmem_limit_bytes=vmem_limit),
        )(a1ps, w1t)
        st = jnp.sum(st, axis=0)
        sum2, ssq2 = st[0:1], st[1:2]
        scale_s = mask_o                                            # identity shortcut
        shift_s = jnp.zeros((1, cpo), jnp.float32)
        s_in = jnp.pad(x.astype(MM_DTYPE),                          # bf16 skip
                       ((0, 0), (0, 0), (0, 0), (0, cpo - cin)))

    # BN2 scale/shift from the stats accumulated inside conv1 (padded lanes masked)
    mean2 = sum2 / m1
    var2 = ssq2 / m1 - mean2 * mean2
    scale2 = _pad_vec(params["gamma2"], cpo, 1.0) * jax.lax.rsqrt(var2 + EPS)
    shift2 = _pad_vec(params["beta2"], cpo, 0.0) - mean2 * scale2
    scale2 = scale2 * mask_o
    shift2 = shift2 * mask_o
    bias2 = _pad_vec(params["b2"], cpo, 0.0)

    # ---- conv2 (3x3, stride 1) with fused BN2+ReLU prologue and
    #      bias + shortcut-BN + residual add + final ReLU epilogue ----
    conv2 = _make_conv2_kernel(ho, wo, cpo)
    out = pl.pallas_call(
        conv2,
        grid=(n,),
        in_specs=[
            pl.BlockSpec((1, ho, wo, cpo), lambda i: (i, 0, 0, 0)),   # y1 (bf16)
            pl.BlockSpec((1, ho, wo, cpo), lambda i: (i, 0, 0, 0)),   # shortcut (bf16)
            pl.BlockSpec((9, cpo, cpo), lambda i: (0, 0, 0)),         # w2 taps
            pl.BlockSpec((1, cpo), lambda i: (0, 0)),                 # scale2
            pl.BlockSpec((1, cpo), lambda i: (0, 0)),                 # shift2
            pl.BlockSpec((1, cpo), lambda i: (0, 0)),                 # bias
            pl.BlockSpec((1, cpo), lambda i: (0, 0)),                 # scale_s
            pl.BlockSpec((1, cpo), lambda i: (0, 0)),                 # shift_s
        ],
        out_specs=pl.BlockSpec((1, ho, wo, cpo), lambda i: (i, 0, 0, 0)),
        out_shape=jax.ShapeDtypeStruct((n, ho, wo, cpo), jnp.float32),
        scratch_shapes=[pltpu.VMEM((1, ho + 2, wo + 2, cpo), MM_DTYPE)],
        compiler_params=pltpu.CompilerParams(
            dimension_semantics=("parallel",),
            vmem_limit_bytes=vmem_limit),
    )(y1, s_in, w2t, scale2, shift2, bias2, scale_s, shift_s)

    out = out[..., :cout]                                # drop channel padding
    return jnp.transpose(out, (0, 3, 1, 2))              # NHWC -> NCHW


# ------------------------------ pure-JAX ref --------------------------------
def _bn_ref(x, gamma, beta):
    mean = jnp.mean(x, axis=(0, 1, 2))
    var = jnp.mean((x - mean) ** 2, axis=(0, 1, 2))
    return (x - mean) / jnp.sqrt(var + EPS) * gamma + beta


def _conv_ref(x, w, stride, pad):
    return jax.lax.conv_general_dilated(
        x, w, (stride, stride), [(pad, pad), (pad, pad)],
        dimension_numbers=("NHWC", "HWIO", "NHWC"))


def basic_block_reference(x_nchw, params, stride):
    x = jnp.transpose(x_nchw, (0, 2, 3, 1)).astype(jnp.float32)
    cin = x.shape[-1]
    cout = params["w1"].shape[-1]
    a = jnp.maximum(_bn_ref(x, params["gamma1"], params["beta1"]), 0.0)
    y = _conv_ref(a, params["w1"], stride, 1)
    a2 = jnp.maximum(_bn_ref(y, params["gamma2"], params["beta2"]), 0.0)
    r = _conv_ref(a2, params["w2"], 1, 1) + params["b2"]
    if stride != 1 or cin != cout:
        s = _conv_ref(x, params["ws"].reshape(1, 1, cin, cout), stride, 0)
        s = _bn_ref(s, params["gammas"], params["betas"])
    else:
        s = x
    out = jnp.maximum(r + s, 0.0)
    return jnp.transpose(out, (0, 3, 1, 2))


# ---------------------------------- main ------------------------------------
if __name__ == "__main__":
    in_channels, out_channels, stride = 4, 8, 2
    n, h, w = 2, 16, 16

    key = jax.random.PRNGKey(0)
    ks = jax.random.split(key, 12)
    f32 = jnp.float32
    x = jax.random.normal(ks[0], (n, in_channels, h, w), f32)

    params = {
        "gamma1": 1.0 + 0.1 * jax.random.normal(ks[1], (in_channels,), f32),
        "beta1": 0.1 * jax.random.normal(ks[2], (in_channels,), f32),
        "w1": 0.1 * jax.random.normal(ks[3], (3, 3, in_channels, out_channels), f32),
        "gamma2": 1.0 + 0.1 * jax.random.normal(ks[4], (out_channels,), f32),
        "beta2": 0.1 * jax.random.normal(ks[5], (out_channels,), f32),
        "w2": 0.1 * jax.random.normal(ks[6], (3, 3, out_channels, out_channels), f32),
        "b2": 0.1 * jax.random.normal(ks[7], (out_channels,), f32),
        "ws": 0.1 * jax.random.normal(ks[8], (in_channels, out_channels), f32),
        "gammas": 1.0 + 0.1 * jax.random.normal(ks[9], (out_channels,), f32),
        "betas": 0.1 * jax.random.normal(ks[10], (out_channels,), f32),
    }

    fwd = jax.jit(basic_block_forward, static_argnums=(2,))
    out = jax.block_until_ready(fwd(x, params, stride))

    ref = basic_block_reference(x, params, stride)
    max_err = float(jnp.max(jnp.abs(out - ref)))
    assert out.shape == (n, out_channels, h // stride, w // stride), out.shape
    # bf16 MXU inputs / bf16 intermediates with f32 accumulation -> max dev ~1e-2
    assert max_err < 5e-2, f"max abs error too large: {max_err}"

    print("KERNEL_OK")
</pallas_src>

<mosaic_0001>
module attributes {stable_mosaic.version = 11 : i64} {
  func.func @_bn_relu_kernel(%arg0: i32, %arg1: memref<512x4xf32, #tpu.memory_space<vmem>>, %arg2: memref<1x4xf32, #tpu.memory_space<vmem>>, %arg3: memref<1x4xf32, #tpu.memory_space<vmem>>, %arg4: memref<512x4xbf16, #tpu.memory_space<vmem>>) attributes {dimension_semantics = [#tpu.dimension_semantics<parallel>], iteration_bounds = array<i64: 1>, scalar_prefetch = 0 : i64, scratch_operands = 0 : i64, tpu.core_type = #tpu.core_type<tc>, window_params = [{transform_indices = @transform_0, window_bounds = array<i64: 512, 4>}, {pipeline_mode = #tpu.pipeline_mode<synchronous>, transform_indices = @transform_1, window_bounds = array<i64: 1, 4>}, {pipeline_mode = #tpu.pipeline_mode<synchronous>, transform_indices = @transform_2, window_bounds = array<i64: 1, 4>}, {transform_indices = @transform_3, window_bounds = array<i64: 512, 4>}]} {
    %c0 = arith.constant 0 : index
    %c0_0 = arith.constant 0 : index
    %0 = vector.load %arg1[%c0, %c0_0] : memref<512x4xf32, #tpu.memory_space<vmem>>, vector<512x4xf32>
    %c0_1 = arith.constant 0 : index
    %c0_2 = arith.constant 0 : index
    %1 = vector.load %arg2[%c0_1, %c0_2] : memref<1x4xf32, #tpu.memory_space<vmem>>, vector<1x4xf32>
    %2 = vector.broadcast %1 : vector<1x4xf32> to vector<512x4xf32>
    %3 = arith.mulf %0, %2 : vector<512x4xf32>
    %c0_3 = arith.constant 0 : index
    %c0_4 = arith.constant 0 : index
    %4 = vector.load %arg3[%c0_3, %c0_4] : memref<1x4xf32, #tpu.memory_space<vmem>>, vector<1x4xf32>
    %5 = vector.broadcast %4 : vector<1x4xf32> to vector<512x4xf32>
    %6 = arith.addf %3, %5 : vector<512x4xf32>
    %cst = arith.constant 0.000000e+00 : f32
    %7 = vector.broadcast %cst : f32 to vector<512x4xf32>
    %8 = arith.maximumf %6, %7 : vector<512x4xf32>
    %9 = arith.truncf %8 : vector<512x4xf32> to vector<512x4xbf16>
    %c0_5 = arith.constant 0 : index
    %c0_6 = arith.constant 0 : index
    %10 = vector.load %arg4[%c0_5, %c0_6] : memref<512x4xbf16, #tpu.memory_space<vmem>>, vector<512x4xbf16>
    tpu.vector_store %arg4[%c0_5, %c0_6], %9 {strides = array<i32>} : memref<512x4xbf16, #tpu.memory_space<vmem>>, vector<512x4xbf16>,
    return
  }
  func.func @transform_0(%arg0: i32) -> (i32, i32) {
    %c0_i32 = arith.constant 0 : i32
    %c0_i32_0 = arith.constant 0 : i32
    return %arg0, %c0_i32 : i32, i32
  }
  func.func @transform_1(%arg0: i32) -> (i32, i32) {
    %c0_i32 = arith.constant 0 : i32
    %c0_i32_0 = arith.constant 0 : i32
    %c0_i32_1 = arith.constant 0 : i32
    return %c0_i32, %c0_i32_0 : i32, i32
  }
  func.func @transform_2(%arg0: i32) -> (i32, i32) {
    %c0_i32 = arith.constant 0 : i32
    %c0_i32_0 = arith.constant 0 : i32
    %c0_i32_1 = arith.constant 0 : i32
    return %c0_i32, %c0_i32_0 : i32, i32
  }
  func.func @transform_3(%arg0: i32) -> (i32, i32) {
    %c0_i32 = arith.constant 0 : i32
    %c0_i32_0 = arith.constant 0 : i32
    return %arg0, %c0_i32 : i32, i32
  }
}

module attributes {stable_mosaic.version = 11 : i64} {
  func.func @_col_stats_kernel(%arg0: i32, %arg1: memref<512x4xf32, #tpu.memory_space<vmem>>, %arg2: memref<1x4xf32, #tpu.memory_space<vmem>>, %arg3: memref<1x4xf32, #tpu.memory_space<vmem>>) attributes {dimension_semantics = [#tpu.dimension_semantics<arbitrary>], iteration_bounds = array<i64: 1>, scalar_prefetch = 0 : i64, scratch_operands = 0 : i64, tpu.core_type = #tpu.core_type<tc>, window_params = [{transform_indices = @transform_0, window_bounds = array<i64: 512, 4>}, {pipeline_mode = #tpu.pipeline_mode<synchronous>, transform_indices = @transform_1, window_bounds = array<i64: 1, 4>}, {pipeline_mode = #tpu.pipeline_mode<synchronous>, transform_indices = @transform_2, window_bounds = array<i64: 1, 4>}]} {
    %c0_i32 = arith.constant 0 : i32
    %0 = arith.cmpi eq, %arg0, %c0_i32 : i32
    %1 = arith.extui %0 : i1 to i32
    %c0_i32_0 = arith.constant 0 : i32
    %2 = arith.cmpi ne, %1, %c0_i32_0 : i32
    scf.if %2 {
      %cst_11 = arith.constant 0.000000e+00 : f32
      %15 = vector.broadcast %cst_11 : f32 to vector<1x4xf32>
      %c0_12 = arith.constant 0 : index
      %c0_13 = arith.constant 0 : index
      %16 = vector.load %arg2[%c0_12, %c0_13] : memref<1x4xf32, #tpu.memory_space<vmem>>, vector<1x4xf32>
      tpu.vector_store %arg2[%c0_12, %c0_13], %15 {strides = array<i32>} : memref<1x4xf32, #tpu.memory_space<vmem>>, vector<1x4xf32>,
      %cst_14 = arith.constant 0.000000e+00 : f32
      %17 = vector.broadcast %cst_14 : f32 to vector<1x4xf32>
      %c0_15 = arith.constant 0 : index
      %c0_16 = arith.constant 0 : index
      %18 = vector.load %arg3[%c0_15, %c0_16] : memref<1x4xf32, #tpu.memory_space<vmem>>, vector<1x4xf32>
      tpu.vector_store %arg3[%c0_15, %c0_16], %17 {strides = array<i32>} : memref<1x4xf32, #tpu.memory_space<vmem>>, vector<1x4xf32>,
    } else {
    }
    %c0 = arith.constant 0 : index
    %c0_1 = arith.constant 0 : index
    %3 = vector.load %arg1[%c0, %c0_1] : memref<512x4xf32, #tpu.memory_space<vmem>>, vector<512x4xf32>
    %c0_2 = arith.constant 0 : index
    %c0_3 = arith.constant 0 : index
    %4 = vector.load %arg2[%c0_2, %c0_3] : memref<1x4xf32, #tpu.memory_space<vmem>>, vector<1x4xf32>
    %cst = arith.constant dense<0.000000e+00> : vector<4xf32>
    %5 = vector.multi_reduction <add>, %3, %cst [0] : vector<512x4xf32> to vector<4xf32>
    %6 = vector.shape_cast %5 : vector<4xf32> to vector<1x4xf32>
    %7 = arith.addf %4, %6 : vector<1x4xf32>
    %c0_4 = arith.constant 0 : index
    %c0_5 = arith.constant 0 : index
    %8 = vector.load %arg2[%c0_4, %c0_5] : memref<1x4xf32, #tpu.memory_space<vmem>>, vector<1x4xf32>
    tpu.vector_store %arg2[%c0_4, %c0_5], %7 {strides = array<i32>} : memref<1x4xf32, #tpu.memory_space<vmem>>, vector<1x4xf32>,
    %c0_6 = arith.constant 0 : index
    %c0_7 = arith.constant 0 : index
    %9 = vector.load %arg3[%c0_6, %c0_7] : memref<1x4xf32, #tpu.memory_space<vmem>>, vector<1x4xf32>
    %10 = arith.mulf %3, %3 : vector<512x4xf32>
    %cst_8 = arith.constant dense<0.000000e+00> : vector<4xf32>
    %11 = vector.multi_reduction <add>, %10, %cst_8 [0] : vector<512x4xf32> to vector<4xf32>
    %12 = vector.shape_cast %11 : vector<4xf32> to vector<1x4xf32>
    %13 = arith.addf %9, %12 : vector<1x4xf32>
    %c0_9 = arith.constant 0 : index
    %c0_10 = arith.constant 0 : index
    %14 = vector.load %arg3[%c0_9, %c0_10] : memref<1x4xf32, #tpu.memory_space<vmem>>, vector<1x4xf32>
    tpu.vector_store %arg3[%c0_9, %c0_10], %13 {strides = array<i32>} : memref<1x4xf32, #tpu.memory_space<vmem>>, vector<1x4xf32>,
    return
  }
  func.func @transform_0(%arg0: i32) -> (i32, i32) {
    %c0_i32 = arith.constant 0 : i32
    %c0_i32_0 = arith.constant 0 : i32
    return %arg0, %c0_i32 : i32, i32
  }
  func.func @transform_1(%arg0: i32) -> (i32, i32) {
    %c0_i32 = arith.constant 0 : i32
    %c0_i32_0 = arith.constant 0 : i32
    %c0_i32_1 = arith.constant 0 : i32
    return %c0_i32, %c0_i32_0 : i32, i32
  }
  func.func @transform_2(%arg0: i32) -> (i32, i32) {
    %c0_i32 = arith.constant 0 : i32
    %c0_i32_0 = arith.constant 0 : i32
    %c0_i32_1 = arith.constant 0 : i32
    return %c0_i32, %c0_i32_0 : i32, i32
  }
}

module attributes {stable_mosaic.version = 11 : i64} {
  func.func @kernel(%arg0: i32, %arg1: memref<4x9x9x128xbf16, #tpu.memory_space<vmem>>, %arg2: memref<9x128x128xbf16, #tpu.memory_space<vmem>>, %arg3: memref<1x8x8x128xbf16, #tpu.memory_space<vmem>>, %arg4: memref<128x128xbf16, #tpu.memory_space<vmem>>, %arg5: memref<1x8x8x128xbf16, #tpu.memory_space<vmem>>, %arg6: memref<1x8x8x128xbf16, #tpu.memory_space<vmem>>, %arg7: memref<1x8x128xf32, #tpu.memory_space<vmem>>) attributes {dimension_semantics = [#tpu.dimension_semantics<parallel>], iteration_bounds = array<i64: 2>, scalar_prefetch = 0 : i64, scratch_operands = 0 : i64, tpu.core_type = #tpu.core_type<tc>, window_params = [{transform_indices = @transform_0, window_bounds = array<i64: 4, 9, 9, 128>}, {pipeline_mode = #tpu.pipeline_mode<synchronous>, transform_indices = @transform_1, window_bounds = array<i64: 9, 128, 128>}, {transform_indices = @transform_2, window_bounds = array<i64: 1, 8, 8, 128>}, {pipeline_mode = #tpu.pipeline_mode<synchronous>, transform_indices = @transform_3, window_bounds = array<i64: 128, 128>}, {transform_indices = @transform_4, window_bounds = array<i64: 1, 8, 8, 128>}, {transform_indices = @transform_5, window_bounds = array<i64: 1, 8, 8, 128>}, {transform_indices = @transform_6, window_bounds = array<i64: 1, 8, 128>}]} {
    %cst = arith.constant 0.000000e+00 : f32
    %0 = vector.broadcast %cst : f32 to vector<64x128xf32>
    %c0 = arith.constant 0 : index
    %c0_0 = arith.constant 0 : index
    %c0_1 = arith.constant 0 : index
    %c0_2 = arith.constant 0 : index
    %1 = vector.load %arg1[%c0, %c0_0, %c0_1, %c0_2] : memref<4x9x9x128xbf16, #tpu.memory_space<vmem>>, vector<1x8x8x128xbf16>
    %2 = vector.shape_cast %1 : vector<1x8x8x128xbf16> to vector<8x8x128xbf16>
    %3 = vector.shape_cast %2 : vector<8x8x128xbf16> to vector<64x128xbf16>
    %c0_3 = arith.constant 0 : index
    %c0_4 = arith.constant 0 : index
    %c0_5 = arith.constant 0 : index
    %4 = vector.load %arg2[%c0_3, %c0_4, %c0_5] : memref<9x128x128xbf16, #tpu.memory_space<vmem>>, vector<1x128x128xbf16>
    %5 = vector.shape_cast %4 : vector<1x128x128xbf16> to vector<128x128xbf16>
    %cst_6 = arith.constant dense<0.000000e+00> : vector<64x128xf32>
    %6 = tpu.matmul %3, %5, %cst_6 {dimension_numbers = #tpu.dot_dimension_numbers<[1], [0], [0], [1], [0, 0, 1, 1], [], []>} : vector<64x128xbf16>, vector<128x128xbf16>, vector<64x128xf32> -> vector<64x128xf32>
    %7 = arith.addf %0, %6 : vector<64x128xf32>
    %c1 = arith.constant 1 : index
    %c0_7 = arith.constant 0 : index
    %c0_8 = arith.constant 0 : index
    %c0_9 = arith.constant 0 : index
    %8 = vector.load %arg1[%c1, %c0_7, %c0_8, %c0_9] : memref<4x9x9x128xbf16, #tpu.memory_space<vmem>>, vector<1x8x8x128xbf16>
    %9 = vector.shape_cast %8 : vector<1x8x8x128xbf16> to vector<8x8x128xbf16>
    %10 = vector.shape_cast %9 : vector<8x8x128xbf16> to vector<64x128xbf16>
    %c1_10 = arith.constant 1 : index
    %c0_11 = arith.constant 0 : index
    %c0_12 = arith.constant 0 : index
    %11 = vector.load %arg2[%c1_10, %c0_11, %c0_12] : memref<9x128x128xbf16, #tpu.memory_space<vmem>>, vector<1x128x128xbf16>
    %12 = vector.shape_cast %11 : vector<1x128x128xbf16> to vector<128x128xbf16>
    %cst_13 = arith.constant dense<0.000000e+00> : vector<64x128xf32>
    %13 = tpu.matmul %10, %12, %cst_13 {dimension_numbers = #tpu.dot_dimension_numbers<[1], [0], [0], [1], [0, 0, 1, 1], [], []>} : vector<64x128xbf16>, vector<128x128xbf16>, vector<64x128xf32> -> vector<64x128xf32>
    %14 = arith.addf %7, %13 : vector<64x128xf32>
    %c0_14 = arith.constant 0 : index
    %c0_15 = arith.constant 0 : index
    %c1_16 = arith.constant 1 : index
    %c0_17 = arith.constant 0 : index
    %15 = vector.load %arg1[%c0_14, %c0_15, %c1_16, %c0_17] : memref<4x9x9x128xbf16, #tpu.memory_space<vmem>>, vector<1x8x8x128xbf16>
    %16 = vector.shape_cast %15 : vector<1x8x8x128xbf16> to vector<8x8x128xbf16>
    %17 = vector.shape_cast %16 : vector<8x8x128xbf16> to vector<64x128xbf16>
    %c2 = arith.constant 2 : index
    %c0_18 = arith.constant 0 : index
    %c0_19 = arith.constant 0 : index
    %18 = vector.load %arg2[%c2, %c0_18, %c0_19] : memref<9x128x128xbf16, #tpu.memory_space<vmem>>, vector<1x128x128xbf16>
    %19 = vector.shape_cast %18 : vector<1x128x128xbf16> to vector<128x128xbf16>
    %cst_20 = arith.constant dense<0.000000e+00> : vector<64x128xf32>
    %20 = tpu.matmul %17, %19, %cst_20 {dimension_numbers = #tpu.dot_dimension_numbers<[1], [0], [0], [1], [0, 0, 1, 1], [], []>} : vector<64x128xbf16>, vector<128x128xbf16>, vector<64x128xf32> -> vector<64x128xf32>
    %21 = arith.addf %14, %20 : vector<64x128xf32>
    %c2_21 = arith.constant 2 : index
    %c0_22 = arith.constant 0 : index
    %c0_23 = arith.constant 0 : index
    %c0_24 = arith.constant 0 : index
    %22 = vector.load %arg1[%c2_21, %c0_22, %c0_23, %c0_24] : memref<4x9x9x128xbf16, #tpu.memory_space<vmem>>, vector<1x8x8x128xbf16>
    %23 = vector.shape_cast %22 : vector<1x8x8x128xbf16> to vector<8x8x128xbf16>
    %24 = vector.shape_cast %23 : vector<8x8x128xbf16> to vector<64x128xbf16>
    %c3 = arith.constant 3 : index
    %c0_25 = arith.constant 0 : index
    %c0_26 = arith.constant 0 : index
    %25 = vector.load %arg2[%c3, %c0_25, %c0_26] : memref<9x128x128xbf16, #tpu.memory_space<vmem>>, vector<1x128x128xbf16>
    %26 = vector.shape_cast %25 : vector<1x128x128xbf16> to vector<128x128xbf16>
    %cst_27 = arith.constant dense<0.000000e+00> : vector<64x128xf32>
    %27 = tpu.matmul %24, %26, %cst_27 {dimension_numbers = #tpu.dot_dimension_numbers<[1], [0], [0], [1], [0, 0, 1, 1], [], []>} : vector<64x128xbf16>, vector<128x128xbf16>, vector<64x128xf32> -> vector<64x128xf32>
    %28 = arith.addf %21, %27 : vector<64x128xf32>
    %c3_28 = arith.constant 3 : index
    %c0_29 = arith.constant 0 : index
    %c0_30 = arith.constant 0 : index
    %c0_31 = arith.constant 0 : index
    %29 = vector.load %arg1[%c3_28, %c0_29, %c0_30, %c0_31] : memref<4x9x9x128xbf16, #tpu.memory_space<vmem>>, vector<1x8x8x128xbf16>
    %30 = vector.shape_cast %29 : vector<1x8x8x128xbf16> to vector<8x8x128xbf16>
    %31 = vector.shape_cast %30 : vector<8x8x128xbf16> to vector<64x128xbf16>
    %c4 = arith.constant 4 : index
    %c0_32 = arith.constant 0 : index
    %c0_33 = arith.constant 0 : index
    %32 = vector.load %arg2[%c4, %c0_32, %c0_33] : memref<9x128x128xbf16, #tpu.memory_space<vmem>>, vector<1x128x128xbf16>
    %33 = vector.shape_cast %32 : vector<1x128x128xbf16> to vector<128x128xbf16>
    %cst_34 = arith.constant dense<0.000000e+00> : vector<64x128xf32>
    %34 = tpu.matmul %31, %33, %cst_34 {dimension_numbers = #tpu.dot_dimension_numbers<[1], [0], [0], [1], [0, 0, 1, 1], [], []>} : vector<64x128xbf16>, vector<128x128xbf16>, vector<64x128xf32> -> vector<64x128xf32>
    %35 = arith.addf %28, %34 : vector<64x128xf32>
    %c2_35 = arith.constant 2 : index
    %c0_36 = arith.constant 0 : index
    %c1_37 = arith.constant 1 : index
    %c0_38 = arith.constant 0 : index
    %36 = vector.load %arg1[%c2_35, %c0_36, %c1_37, %c0_38] : memref<4x9x9x128xbf16, #tpu.memory_space<vmem>>, vector<1x8x8x128xbf16>
    %37 = vector.shape_cast %36 : vector<1x8x8x128xbf16> to vector<8x8x128xbf16>
    %38 = vector.shape_cast %37 : vector<8x8x128xbf16> to vector<64x128xbf16>
    %c5 = arith.constant 5 : index
    %c0_39 = arith.constant 0 : index
    %c0_40 = arith.constant 0 : index
    %39 = vector.load %arg2[%c5, %c0_39, %c0_40] : memref<9x128x128xbf16, #tpu.memory_space<vmem>>, vector<1x128x128xbf16>
    %40 = vector.shape_cast %39 : vector<1x128x128xbf16> to vector<128x128xbf16>
    %cst_41 = arith.constant dense<0.000000e+00> : vector<64x128xf32>
    %41 = tpu.matmul %38, %40, %cst_41 {dimension_numbers = #tpu.dot_dimension_numbers<[1], [0], [0], [1], [0, 0, 1, 1], [], []>} : vector<64x128xbf16>, vector<128x128xbf16>, vector<64x128xf32> -> vector<64x128xf32>
    %42 = arith.addf %35, %41 : vector<64x128xf32>
    %c0_42 = arith.constant 0 : index
    %c1_43 = arith.constant 1 : index
    %c0_44 = arith.constant 0 : index
    %c0_45 = arith.constant 0 : index
    %43 = vector.load %arg1[%c0_42, %c1_43, %c0_44, %c0_45] : memref<4x9x9x128xbf16, #tpu.memory_space<vmem>>, vector<1x8x8x128xbf16>
    %44 = vector.shape_cast %43 : vector<1x8x8x128xbf16> to vector<8x8x128xbf16>
    %45 = vector.shape_cast %44 : vector<8x8x128xbf16> to vector<64x128xbf16>
    %c6 = arith.constant 6 : index
    %c0_46 = arith.constant 0 : index
    %c0_47 = arith.constant 0 : index
    %46 = vector.load %arg2[%c6, %c0_46, %c0_47] : memref<9x128x128xbf16, #tpu.memory_space<vmem>>, vector<1x128x128xbf16>
    %47 = vector.shape_cast %46 : vector<1x128x128xbf16> to vector<128x128xbf16>
    %cst_48 = arith.constant dense<0.000000e+00> : vector<64x128xf32>
    %48 = tpu.matmul %45, %47, %cst_48 {dimension_numbers = #tpu.dot_dimension_numbers<[1], [0], [0], [1], [0, 0, 1, 1], [], []>} : vector<64x128xbf16>, vector<128x128xbf16>, vector<64x128xf32> -> vector<64x128xf32>
    %49 = arith.addf %42, %48 : vector<64x128xf32>
    %c1_49 = arith.constant 1 : index
    %c1_50 = arith.constant 1 : index
    %c0_51 = arith.constant 0 : index
    %c0_52 = arith.constant 0 : index
    %50 = vector.load %arg1[%c1_49, %c1_50, %c0_51, %c0_52] : memref<4x9x9x128xbf16, #tpu.memory_space<vmem>>, vector<1x8x8x128xbf16>
    %51 = vector.shape_cast %50 : vector<1x8x8x128xbf16> to vector<8x8x128xbf16>
    %52 = vector.shape_cast %51 : vector<8x8x128xbf16> to vector<64x128xbf16>
    %c7 = arith.constant 7 : index
    %c0_53 = arith.constant 0 : index
    %c0_54 = arith.constant 0 : index
    %53 = vector.load %arg2[%c7, %c0_53, %c0_54] : memref<9x128x128xbf16, #tpu.memory_space<vmem>>, vector<1x128x128xbf16>
    %54 = vector.shape_cast %53 : vector<1x128x128xbf16> to vector<128x128xbf16>
    %cst_55 = arith.constant dense<0.000000e+00> : vector<64x128xf32>
    %55 = tpu.matmul %52, %54, %cst_55 {dimension_numbers = #tpu.dot_dimension_numbers<[1], [0], [0], [1], [0, 0, 1, 1], [], []>} : vector<64x128xbf16>, vector<128x128xbf16>, vector<64x128xf32> -> vector<64x128xf32>
    %56 = arith.addf %49, %55 : vector<64x128xf32>
    %c0_56 = arith.constant 0 : index
    %c1_57 = arith.constant 1 : index
    %c1_58 = arith.constant 1 : index
    %c0_59 = arith.constant 0 : index
    %57 = vector.load %arg1[%c0_56, %c1_57, %c1_58, %c0_59] : memref<4x9x9x128xbf16, #tpu.memory_space<vmem>>, vector<1x8x8x128xbf16>
    %58 = vector.shape_cast %57 : vector<1x8x8x128xbf16> to vector<8x8x128xbf16>
    %59 = vector.shape_cast %58 : vector<8x8x128xbf16> to vector<64x128xbf16>
    %c8 = arith.constant 8 : index
    %c0_60 = arith.constant 0 : index
    %c0_61 = arith.constant 0 : index
    %60 = vector.load %arg2[%c8, %c0_60, %c0_61] : memref<9x128x128xbf16, #tpu.memory_space<vmem>>, vector<1x128x128xbf16>
    %61 = vector.shape_cast %60 : vector<1x128x128xbf16> to vector<128x128xbf16>
    %cst_62 = arith.constant dense<0.000000e+00> : vector<64x128xf32>
    %62 = tpu.matmul %59, %61, %cst_62 {dimension_numbers = #tpu.dot_dimension_numbers<[1], [0], [0], [1], [0, 0, 1, 1], [], []>} : vector<64x128xbf16>, vector<128x128xbf16>, vector<64x128xf32> -> vector<64x128xf32>
    %63 = arith.addf %56, %62 : vector<64x128xf32>
    %64 = vector.shape_cast %63 : vector<64x128xf32> to vector<1x8x8x128xf32>
    %65 = arith.truncf %64 : vector<1x8x8x128xf32> to vector<1x8x8x128xbf16>
    %c0_63 = arith.constant 0 : index
    %c0_64 = arith.constant 0 : index
    %c0_65 = arith.constant 0 : index
    %c0_66 = arith.constant 0 : index
    %66 = vector.load %arg5[%c0_63, %c0_64, %c0_65, %c0_66] : memref<1x8x8x128xbf16, #tpu.memory_space<vmem>>, vector<1x8x8x128xbf16>
    tpu.vector_store %arg5[%c0_63, %c0_64, %c0_65, %c0_66], %65 {strides = array<i32>} : memref<1x8x8x128xbf16, #tpu.memory_space<vmem>>, vector<1x8x8x128xbf16>,
    %cst_67 = arith.constant dense<0.000000e+00> : vector<128xf32>
    %67 = vector.multi_reduction <add>, %63, %cst_67 [0] : vector<64x128xf32> to vector<128xf32>
    %68 = vector.shape_cast %67 : vector<128xf32> to vector<1x128xf32>
    %c0_68 = arith.constant 0 : index
    %c0_69 = arith.constant 0 : index
    %c0_70 = arith.constant 0 : index
    %69 = vector.load %arg7[%c0_68, %c0_69, %c0_70] : memref<1x8x128xf32, #tpu.memory_space<vmem>>, vector<1x1x128xf32>
    %70 = vector.shape_cast %69 : vector<1x1x128xf32> to vector<1x128xf32>
    %71 = vector.shape_cast %68 : vector<1x128xf32> to vector<1x1x128xf32>
    tpu.vector_store %arg7[%c0_68, %c0_69, %c0_70], %71 {strides = array<i32>} : memref<1x8x128xf32, #tpu.memory_space<vmem>>, vector<1x1x128xf32>,
    %72 = arith.mulf %63, %63 : vector<64x128xf32>
    %cst_71 = arith.constant dense<0.000000e+00> : vector<128xf32>
    %73 = vector.multi_reduction <add>, %72, %cst_71 [0] : vector<64x128xf32> to vector<128xf32>
    %74 = vector.shape_cast %73 : vector<128xf32> to vector<1x128xf32>
    %c0_72 = arith.constant 0 : index
    %c1_73 = arith.constant 1 : index
    %c0_74 = arith.constant 0 : index
    %75 = vector.load %arg7[%c0_72, %c1_73, %c0_74] : memref<1x8x128xf32, #tpu.memory_space<vmem>>, vector<1x1x128xf32>
    %76 = vector.shape_cast %75 : vector<1x1x128xf32> to vector<1x128xf32>
    %77 = vector.shape_cast %74 : vector<1x128xf32> to vector<1x1x128xf32>
    tpu.vector_store %arg7[%c0_72, %c1_73, %c0_74], %77 {strides = array<i32>} : memref<1x8x128xf32, #tpu.memory_space<vmem>>, vector<1x1x128xf32>,
    %c0_75 = arith.constant 0 : index
    %c0_76 = arith.constant 0 : index
    %c0_77 = arith.constant 0 : index
    %c0_78 = arith.constant 0 : index
    %78 = vector.load %arg3[%c0_75, %c0_76, %c0_77, %c0_78] : memref<1x8x8x128xbf16, #tpu.memory_space<vmem>>, vector<1x8x8x128xbf16>
    %79 = vector.shape_cast %78 : vector<1x8x8x128xbf16> to vector<64x128xbf16>
    %c0_79 = arith.constant 0 : index
    %c0_80 = arith.constant 0 : index
    %80 = vector.load %arg4[%c0_79, %c0_80] : memref<128x128xbf16, #tpu.memory_space<vmem>>, vector<128x128xbf16>
    %cst_81 = arith.constant dense<0.000000e+00> : vector<64x128xf32>
    %81 = tpu.matmul %79, %80, %cst_81 {dimension_numbers = #tpu.dot_dimension_numbers<[1], [0], [0], [1], [0, 0, 1, 1], [], []>} : vector<64x128xbf16>, vector<128x128xbf16>, vector<64x128xf32> -> vector<64x128xf32>
    %82 = vector.shape_cast %81 : vector<64x128xf32> to vector<1x8x8x128xf32>
    %83 = arith.truncf %82 : vector<1x8x8x128xf32> to vector<1x8x8x128xbf16>
    %c0_82 = arith.constant 0 : index
    %c0_83 = arith.constant 0 : index
    %c0_84 = arith.constant 0 : index
    %c0_85 = arith.constant 0 : index
    %84 = vector.load %arg6[%c0_82, %c0_83, %c0_84, %c0_85] : memref<1x8x8x128xbf16, #tpu.memory_space<vmem>>, vector<1x8x8x128xbf16>
    tpu.vector_store %arg6[%c0_82, %c0_83, %c0_84, %c0_85], %83 {strides = array<i32>} : memref<1x8x8x128xbf16, #tpu.memory_space<vmem>>, vector<1x8x8x128xbf16>,
    %cst_86 = arith.constant dense<0.000000e+00> : vector<128xf32>
    %85 = vector.multi_reduction <add>, %81, %cst_86 [0] : vector<64x128xf32> to vector<128xf32>
    %86 = vector.shape_cast %85 : vector<128xf32> to vector<1x128xf32>
    %c0_87 = arith.constant 0 : index
    %c2_88 = arith.constant 2 : index
    %c0_89 = arith.constant 0 : index
    %87 = vector.load %arg7[%c0_87, %c2_88, %c0_89] : memref<1x8x128xf32, #tpu.memory_space<vmem>>, vector<1x1x128xf32>
    %88 = vector.shape_cast %87 : vector<1x1x128xf32> to vector<1x128xf32>
    %89 = vector.shape_cast %86 : vector<1x128xf32> to vector<1x1x128xf32>
    tpu.vector_store %arg7[%c0_87, %c2_88, %c0_89], %89 {strides = array<i32>} : memref<1x8x128xf32, #tpu.memory_space<vmem>>, vector<1x1x128xf32>,
    %90 = arith.mulf %81, %81 : vector<64x128xf32>
    %cst_90 = arith.constant dense<0.000000e+00> : vector<128xf32>
    %91 = vector.multi_reduction <add>, %90, %cst_90 [0] : vector<64x128xf32> to vector<128xf32>
    %92 = vector.shape_cast %91 : vector<128xf32> to vector<1x128xf32>
    %c0_91 = arith.constant 0 : index
    %c3_92 = arith.constant 3 : index
    %c0_93 = arith.constant 0 : index
    %93 = vector.load %arg7[%c0_91, %c3_92, %c0_93] : memref<1x8x128xf32, #tpu.memory_space<vmem>>, vector<1x1x128xf32>
    %94 = vector.shape_cast %93 : vector<1x1x128xf32> to vector<1x128xf32>
    %95 = vector.shape_cast %92 : vector<1x128xf32> to vector<1x1x128xf32>
    tpu.vector_store %arg7[%c0_91, %c3_92, %c0_93], %95 {strides = array<i32>} : memref<1x8x128xf32, #tpu.memory_space<vmem>>, vector<1x1x128xf32>,
    %cst_94 = arith.constant 0.000000e+00 : f32
    %96 = vector.broadcast %cst_94 : f32 to vector<4x128xf32>
    %c0_95 = arith.constant 0 : index
    %c4_96 = arith.constant 4 : index
    %c0_97 = arith.constant 0 : index
    %97 = vector.load %arg7[%c0_95, %c4_96, %c0_97] : memref<1x8x128xf32, #tpu.memory_space<vmem>>, vector<1x4x128xf32>
    %98 = vector.shape_cast %97 : vector<1x4x128xf32> to vector<4x128xf32>
    %99 = vector.shape_cast %96 : vector<4x128xf32> to vector<1x4x128xf32>
    tpu.vector_store %arg7[%c0_95, %c4_96, %c0_97], %99 {strides = array<i32>} : memref<1x8x128xf32, #tpu.memory_space<vmem>>, vector<1x4x128xf32>,
    return
  }
  func.func @transform_0(%arg0: i32) -> (i32, i32, i32, i32) {
    %c0_i32 = arith.constant 0 : i32
    %c0_i32_0 = arith.constant 0 : i32
    %c0_i32_1 = arith.constant 0 : i32
    %c0_i32_2 = arith.constant 0 : i32
    return %arg0, %c0_i32, %c0_i32_0, %c0_i32_1 : i32, i32, i32, i32
  }
  func.func @transform_1(%arg0: i32) -> (i32, i32, i32) {
    %c0_i32 = arith.constant 0 : i32
    %c0_i32_0 = arith.constant 0 : i32
    %c0_i32_1 = arith.constant 0 : i32
    %c0_i32_2 = arith.constant 0 : i32
    return %c0_i32, %c0_i32_0, %c0_i32_1 : i32, i32, i32
  }
  func.func @transform_2(%arg0: i32) -> (i32, i32, i32, i32) {
    %c0_i32 = arith.constant 0 : i32
    %c0_i32_0 = arith.constant 0 : i32
    %c0_i32_1 = arith.constant 0 : i32
    %c0_i32_2 = arith.constant 0 : i32
    return %arg0, %c0_i32, %c0_i32_0, %c0_i32_1 : i32, i32, i32, i32
  }
  func.func @transform_3(%arg0: i32) -> (i32, i32) {
    %c0_i32 = arith.constant 0 : i32
    %c0_i32_0 = arith.constant 0 : i32
    %c0_i32_1 = arith.constant 0 : i32
    return %c0_i32, %c0_i32_0 : i32, i32
  }
  func.func @transform_4(%arg0: i32) -> (i32, i32, i32, i32) {
    %c0_i32 = arith.constant 0 : i32
    %c0_i32_0 = arith.constant 0 : i32
    %c0_i32_1 = arith.constant 0 : i32
    %c0_i32_2 = arith.constant 0 : i32
    return %arg0, %c0_i32, %c0_i32_0, %c0_i32_1 : i32, i32, i32, i32
  }
  func.func @transform_5(%arg0: i32) -> (i32, i32, i32, i32) {
    %c0_i32 = arith.constant 0 : i32
    %c0_i32_0 = arith.constant 0 : i32
    %c0_i32_1 = arith.constant 0 : i32
    %c0_i32_2 = arith.constant 0 : i32
    return %arg0, %c0_i32, %c0_i32_0, %c0_i32_1 : i32, i32, i32, i32
  }
  func.func @transform_6(%arg0: i32) -> (i32, i32, i32) {
    %c0_i32 = arith.constant 0 : i32
    %c0_i32_0 = arith.constant 0 : i32
    %c0_i32_1 = arith.constant 0 : i32
    return %arg0, %c0_i32, %c0_i32_0 : i32, i32, i32
  }
}

module attributes {stable_mosaic.version = 11 : i64} {
  func.func @kernel(%arg0: i32, %arg1: memref<1x8x8x128xbf16, #tpu.memory_space<vmem>>, %arg2: memref<1x8x8x128xbf16, #tpu.memory_space<vmem>>, %arg3: memref<9x128x128xbf16, #tpu.memory_space<vmem>>, %arg4: memref<1x128xf32, #tpu.memory_space<vmem>>, %arg5: memref<1x128xf32, #tpu.memory_space<vmem>>, %arg6: memref<1x128xf32, #tpu.memory_space<vmem>>, %arg7: memref<1x128xf32, #tpu.memory_space<vmem>>, %arg8: memref<1x128xf32, #tpu.memory_space<vmem>>, %arg9: memref<1x8x8x128xf32, #tpu.memory_space<vmem>>, %arg10: memref<1x10x10x128xbf16, #tpu.memory_space<vmem>>) attributes {dimension_semantics = [#tpu.dimension_semantics<parallel>], iteration_bounds = array<i64: 2>, scalar_prefetch = 0 : i64, scratch_operands = 1 : i64, tpu.core_type = #tpu.core_type<tc>, window_params = [{transform_indices = @transform_0, window_bounds = array<i64: 1, 8, 8, 128>}, {transform_indices = @transform_1, window_bounds = array<i64: 1, 8, 8, 128>}, {pipeline_mode = #tpu.pipeline_mode<synchronous>, transform_indices = @transform_2, window_bounds = array<i64: 9, 128, 128>}, {pipeline_mode = #tpu.pipeline_mode<synchronous>, transform_indices = @transform_3, window_bounds = array<i64: 1, 128>}, {pipeline_mode = #tpu.pipeline_mode<synchronous>, transform_indices = @transform_4, window_bounds = array<i64: 1, 128>}, {pipeline_mode = #tpu.pipeline_mode<synchronous>, transform_indices = @transform_5, window_bounds = array<i64: 1, 128>}, {pipeline_mode = #tpu.pipeline_mode<synchronous>, transform_indices = @transform_6, window_bounds = array<i64: 1, 128>}, {pipeline_mode = #tpu.pipeline_mode<synchronous>, transform_indices = @transform_7, window_bounds = array<i64: 1, 128>}, {transform_indices = @transform_8, window_bounds = array<i64: 1, 8, 8, 128>}]} {
    %cst = arith.constant 0.000000e+00 : bf16
    %0 = vector.broadcast %cst : bf16 to vector<1x1x10x128xbf16>
    %cst_0 = arith.constant 0.000000e+00 : bf16
    %1 = vector.broadcast %cst_0 : bf16 to vector<1x10x1x128xbf16>
    %c0 = arith.constant 0 : index
    %c0_1 = arith.constant 0 : index
    %c0_2 = arith.constant 0 : index
    %c0_3 = arith.constant 0 : index
    %2 = vector.load %arg10[%c0, %c0_1, %c0_2, %c0_3] : memref<1x10x10x128xbf16, #tpu.memory_space<vmem>>, vector<1x1x10x128xbf16>
    tpu.vector_store %arg10[%c0, %c0_1, %c0_2, %c0_3], %0 {strides = array<i32>} : memref<1x10x10x128xbf16, #tpu.memory_space<vmem>>, vector<1x1x10x128xbf16>,
    %c0_4 = arith.constant 0 : index
    %c9 = arith.constant 9 : index
    %c0_5 = arith.constant 0 : index
    %c0_6 = arith.constant 0 : index
    %3 = vector.load %arg10[%c0_4, %c9, %c0_5, %c0_6] : memref<1x10x10x128xbf16, #tpu.memory_space<vmem>>, vector<1x1x10x128xbf16>
    tpu.vector_store %arg10[%c0_4, %c9, %c0_5, %c0_6], %0 {strides = array<i32>} : memref<1x10x10x128xbf16, #tpu.memory_space<vmem>>, vector<1x1x10x128xbf16>,
    %c0_7 = arith.constant 0 : index
    %c0_8 = arith.constant 0 : index
    %c0_9 = arith.constant 0 : index
    %c0_10 = arith.constant 0 : index
    %4 = vector.load %arg10[%c0_7, %c0_8, %c0_9, %c0_10] : memref<1x10x10x128xbf16, #tpu.memory_space<vmem>>, vector<1x10x1x128xbf16>
    tpu.vector_store %arg10[%c0_7, %c0_8, %c0_9, %c0_10], %1 {strides = array<i32>} : memref<1x10x10x128xbf16, #tpu.memory_space<vmem>>, vector<1x10x1x128xbf16>,
    %c0_11 = arith.constant 0 : index
    %c0_12 = arith.constant 0 : index
    %c9_13 = arith.constant 9 : index
    %c0_14 = arith.constant 0 : index
    %5 = vector.load %arg10[%c0_11, %c0_12, %c9_13, %c0_14] : memref<1x10x10x128xbf16, #tpu.memory_space<vmem>>, vector<1x10x1x128xbf16>
    tpu.vector_store %arg10[%c0_11, %c0_12, %c9_13, %c0_14], %1 {strides = array<i32>} : memref<1x10x10x128xbf16, #tpu.memory_space<vmem>>, vector<1x10x1x128xbf16>,
    %c0_15 = arith.constant 0 : index
    %c0_16 = arith.constant 0 : index
    %6 = vector.load %arg4[%c0_15, %c0_16] : memref<1x128xf32, #tpu.memory_space<vmem>>, vector<1x128xf32>
    %7 = vector.shape_cast %6 : vector<1x128xf32> to vector<1x1x128xf32>
    %c0_17 = arith.constant 0 : index
    %c0_18 = arith.constant 0 : index
    %8 = vector.load %arg5[%c0_17, %c0_18] : memref<1x128xf32, #tpu.memory_space<vmem>>, vector<1x128xf32>
    %9 = vector.shape_cast %8 : vector<1x128xf32> to vector<1x1x128xf32>
    %c0_19 = arith.constant 0 : index
    %c0_20 = arith.constant 0 : index
    %c0_21 = arith.constant 0 : index
    %c0_22 = arith.constant 0 : index
    %10 = vector.load %arg1[%c0_19, %c0_20, %c0_21, %c0_22] : memref<1x8x8x128xbf16, #tpu.memory_space<vmem>>, vector<1x8x8x128xbf16>
    %11 = vector.shape_cast %10 : vector<1x8x8x128xbf16> to vector<8x8x128xbf16>
    %12 = arith.extf %11 : vector<8x8x128xbf16> to vector<8x8x128xf32>
    %13 = vector.broadcast %7 : vector<1x1x128xf32> to vector<8x8x128xf32>
    %14 = arith.mulf %12, %13 : vector<8x8x128xf32>
    %15 = vector.broadcast %9 : vector<1x1x128xf32> to vector<8x8x128xf32>
    %16 = arith.addf %14, %15 : vector<8x8x128xf32>
    %cst_23 = arith.constant 0.000000e+00 : f32
    %17 = vector.broadcast %cst_23 : f32 to vector<8x8x128xf32>
    %18 = arith.maximumf %16, %17 : vector<8x8x128xf32>
    %19 = arith.truncf %18 : vector<8x8x128xf32> to vector<8x8x128xbf16>
    %c0_24 = arith.constant 0 : index
    %c1 = arith.constant 1 : index
    %c1_25 = arith.constant 1 : index
    %c0_26 = arith.constant 0 : index
    %20 = vector.load %arg10[%c0_24, %c1, %c1_25, %c0_26] : memref<1x10x10x128xbf16, #tpu.memory_space<vmem>>, vector<1x8x8x128xbf16>
    %21 = vector.shape_cast %20 : vector<1x8x8x128xbf16> to vector<8x8x128xbf16>
    %22 = vector.shape_cast %19 : vector<8x8x128xbf16> to vector<1x8x8x128xbf16>
    tpu.vector_store %arg10[%c0_24, %c1, %c1_25, %c0_26], %22 {strides = array<i32>} : memref<1x10x10x128xbf16, #tpu.memory_space<vmem>>, vector<1x8x8x128xbf16>,
    %cst_27 = arith.constant 0.000000e+00 : f32
    %23 = vector.broadcast %cst_27 : f32 to vector<64x128xf32>
    %c0_28 = arith.constant 0 : index
    %c0_29 = arith.constant 0 : index
    %c0_30 = arith.constant 0 : index
    %c0_31 = arith.constant 0 : index
    %24 = vector.load %arg10[%c0_28, %c0_29, %c0_30, %c0_31] : memref<1x10x10x128xbf16, #tpu.memory_space<vmem>>, vector<1x8x8x128xbf16>
    %25 = vector.shape_cast %24 : vector<1x8x8x128xbf16> to vector<8x8x128xbf16>
    %26 = vector.shape_cast %25 : vector<8x8x128xbf16> to vector<64x128xbf16>
    %c0_32 = arith.constant 0 : index
    %c0_33 = arith.constant 0 : index
    %c0_34 = arith.constant 0 : index
    %27 = vector.load %arg3[%c0_32, %c0_33, %c0_34] : memref<9x128x128xbf16, #tpu.memory_space<vmem>>, vector<1x128x128xbf16>
    %28 = vector.shape_cast %27 : vector<1x128x128xbf16> to vector<128x128xbf16>
    %cst_35 = arith.constant dense<0.000000e+00> : vector<64x128xf32>
    %29 = tpu.matmul %26, %28, %cst_35 {dimension_numbers = #tpu.dot_dimension_numbers<[1], [0], [0], [1], [0, 0, 1, 1], [], []>} : vector<64x128xbf16>, vector<128x128xbf16>, vector<64x128xf32> -> vector<64x128xf32>
    %30 = arith.addf %23, %29 : vector<64x128xf32>
    %c0_36 = arith.constant 0 : index
    %c0_37 = arith.constant 0 : index
    %c1_38 = arith.constant 1 : index
    %c0_39 = arith.constant 0 : index
    %31 = vector.load %arg10[%c0_36, %c0_37, %c1_38, %c0_39] : memref<1x10x10x128xbf16, #tpu.memory_space<vmem>>, vector<1x8x8x128xbf16>
    %32 = vector.shape_cast %31 : vector<1x8x8x128xbf16> to vector<8x8x128xbf16>
    %33 = vector.shape_cast %32 : vector<8x8x128xbf16> to vector<64x128xbf16>
    %c1_40 = arith.constant 1 : index
    %c0_41 = arith.constant 0 : index
    %c0_42 = arith.constant 0 : index
    %34 = vector.load %arg3[%c1_40, %c0_41, %c0_42] : memref<9x128x128xbf16, #tpu.memory_space<vmem>>, vector<1x128x128xbf16>
    %35 = vector.shape_cast %34 : vector<1x128x128xbf16> to vector<128x128xbf16>
    %cst_43 = arith.constant dense<0.000000e+00> : vector<64x128xf32>
    %36 = tpu.matmul %33, %35, %cst_43 {dimension_numbers = #tpu.dot_dimension_numbers<[1], [0], [0], [1], [0, 0, 1, 1], [], []>} : vector<64x128xbf16>, vector<128x128xbf16>, vector<64x128xf32> -> vector<64x128xf32>
    %37 = arith.addf %30, %36 : vector<64x128xf32>
    %c0_44 = arith.constant 0 : index
    %c0_45 = arith.constant 0 : index
    %c2 = arith.constant 2 : index
    %c0_46 = arith.constant 0 : index
    %38 = vector.load %arg10[%c0_44, %c0_45, %c2, %c0_46] : memref<1x10x10x128xbf16, #tpu.memory_space<vmem>>, vector<1x8x8x128xbf16>
    %39 = vector.shape_cast %38 : vector<1x8x8x128xbf16> to vector<8x8x128xbf16>
    %40 = vector.shape_cast %39 : vector<8x8x128xbf16> to vector<64x128xbf16>
    %c2_47 = arith.constant 2 : index
    %c0_48 = arith.constant 0 : index
    %c0_49 = arith.constant 0 : index
    %41 = vector.load %arg3[%c2_47, %c0_48, %c0_49] : memref<9x128x128xbf16, #tpu.memory_space<vmem>>, vector<1x128x128xbf16>
    %42 = vector.shape_cast %41 : vector<1x128x128xbf16> to vector<128x128xbf16>
    %cst_50 = arith.constant dense<0.000000e+00> : vector<64x128xf32>
    %43 = tpu.matmul %40, %42, %cst_50 {dimension_numbers = #tpu.dot_dimension_numbers<[1], [0], [0], [1], [0, 0, 1, 1], [], []>} : vector<64x128xbf16>, vector<128x128xbf16>, vector<64x128xf32> -> vector<64x128xf32>
    %44 = arith.addf %37, %43 : vector<64x128xf32>
    %c0_51 = arith.constant 0 : index
    %c1_52 = arith.constant 1 : index
    %c0_53 = arith.constant 0 : index
    %c0_54 = arith.constant 0 : index
    %45 = vector.load %arg10[%c0_51, %c1_52, %c0_53, %c0_54] : memref<1x10x10x128xbf16, #tpu.memory_space<vmem>>, vector<1x8x8x128xbf16>
    %46 = vector.shape_cast %45 : vector<1x8x8x128xbf16> to vector<8x8x128xbf16>
    %47 = vector.shape_cast %46 : vector<8x8x128xbf16> to vector<64x128xbf16>
    %c3 = arith.constant 3 : index
    %c0_55 = arith.constant 0 : index
    %c0_56 = arith.constant 0 : index
    %48 = vector.load %arg3[%c3, %c0_55, %c0_56] : memref<9x128x128xbf16, #tpu.memory_space<vmem>>, vector<1x128x128xbf16>
    %49 = vector.shape_cast %48 : vector<1x128x128xbf16> to vector<128x128xbf16>
    %cst_57 = arith.constant dense<0.000000e+00> : vector<64x128xf32>
    %50 = tpu.matmul %47, %49, %cst_57 {dimension_numbers = #tpu.dot_dimension_numbers<[1], [0], [0], [1], [0, 0, 1, 1], [], []>} : vector<64x128xbf16>, vector<128x128xbf16>, vector<64x128xf32> -> vector<64x128xf32>
    %51 = arith.addf %44, %50 : vector<64x128xf32>
    %c0_58 = arith.constant 0 : index
    %c1_59 = arith.constant 1 : index
    %c1_60 = arith.constant 1 : index
    %c0_61 = arith.constant 0 : index
    %52 = vector.load %arg10[%c0_58, %c1_59, %c1_60, %c0_61] : memref<1x10x10x128xbf16, #tpu.memory_space<vmem>>, vector<1x8x8x128xbf16>
    %53 = vector.shape_cast %52 : vector<1x8x8x128xbf16> to vector<8x8x128xbf16>
    %54 = vector.shape_cast %53 : vector<8x8x128xbf16> to vector<64x128xbf16>
    %c4 = arith.constant 4 : index
    %c0_62 = arith.constant 0 : index
    %c0_63 = arith.constant 0 : index
    %55 = vector.load %arg3[%c4, %c0_62, %c0_63] : memref<9x128x128xbf16, #tpu.memory_space<vmem>>, vector<1x128x128xbf16>
    %56 = vector.shape_cast %55 : vector<1x128x128xbf16> to vector<128x128xbf16>
    %cst_64 = arith.constant dense<0.000000e+00> : vector<64x128xf32>
    %57 = tpu.matmul %54, %56, %cst_64 {dimension_numbers = #tpu.dot_dimension_numbers<[1], [0], [0], [1], [0, 0, 1, 1], [], []>} : vector<64x128xbf16>, vector<128x128xbf16>, vector<64x128xf32> -> vector<64x128xf32>
    %58 = arith.addf %51, %57 : vector<64x128xf32>
    %c0_65 = arith.constant 0 : index
    %c1_66 = arith.constant 1 : index
    %c2_67 = arith.constant 2 : index
    %c0_68 = arith.constant 0 : index
    %59 = vector.load %arg10[%c0_65, %c1_66, %c2_67, %c0_68] : memref<1x10x10x128xbf16, #tpu.memory_space<vmem>>, vector<1x8x8x128xbf16>
    %60 = vector.shape_cast %59 : vector<1x8x8x128xbf16> to vector<8x8x128xbf16>
    %61 = vector.shape_cast %60 : vector<8x8x128xbf16> to vector<64x128xbf16>
    %c5 = arith.constant 5 : index
    %c0_69 = arith.constant 0 : index
    %c0_70 = arith.constant 0 : index
    %62 = vector.load %arg3[%c5, %c0_69, %c0_70] : memref<9x128x128xbf16, #tpu.memory_space<vmem>>, vector<1x128x128xbf16>
    %63 = vector.shape_cast %62 : vector<1x128x128xbf16> to vector<128x128xbf16>
    %cst_71 = arith.constant dense<0.000000e+00> : vector<64x128xf32>
    %64 = tpu.matmul %61, %63, %cst_71 {dimension_numbers = #tpu.dot_dimension_numbers<[1], [0], [0], [1], [0, 0, 1, 1], [], []>} : vector<64x128xbf16>, vector<128x128xbf16>, vector<64x128xf32> -> vector<64x128xf32>
    %65 = arith.addf %58, %64 : vector<64x128xf32>
    %c0_72 = arith.constant 0 : index
    %c2_73 = arith.constant 2 : index
    %c0_74 = arith.constant 0 : index
    %c0_75 = arith.constant 0 : index
    %66 = vector.load %arg10[%c0_72, %c2_73, %c0_74, %c0_75] : memref<1x10x10x128xbf16, #tpu.memory_space<vmem>>, vector<1x8x8x128xbf16>
    %67 = vector.shape_cast %66 : vector<1x8x8x128xbf16> to vector<8x8x128xbf16>
    %68 = vector.shape_cast %67 : vector<8x8x128xbf16> to vector<64x128xbf16>
    %c6 = arith.constant 6 : index
    %c0_76 = arith.constant 0 : index
    %c0_77 = arith.constant 0 : index
    %69 = vector.load %arg3[%c6, %c0_76, %c0_77] : memref<9x128x128xbf16, #tpu.memory_space<vmem>>, vector<1x128x128xbf16>
    %70 = vector.shape_cast %69 : vector<1x128x128xbf16> to vector<128x128xbf16>
    %cst_78 = arith.constant dense<0.000000e+00> : vector<64x128xf32>
    %71 = tpu.matmul %68, %70, %cst_78 {dimension_numbers = #tpu.dot_dimension_numbers<[1], [0], [0], [1], [0, 0, 1, 1], [], []>} : vector<64x128xbf16>, vector<128x128xbf16>, vector<64x128xf32> -> vector<64x128xf32>
    %72 = arith.addf %65, %71 : vector<64x128xf32>
    %c0_79 = arith.constant 0 : index
    %c2_80 = arith.constant 2 : index
    %c1_81 = arith.constant 1 : index
    %c0_82 = arith.constant 0 : index
    %73 = vector.load %arg10[%c0_79, %c2_80, %c1_81, %c0_82] : memref<1x10x10x128xbf16, #tpu.memory_space<vmem>>, vector<1x8x8x128xbf16>
    %74 = vector.shape_cast %73 : vector<1x8x8x128xbf16> to vector<8x8x128xbf16>
    %75 = vector.shape_cast %74 : vector<8x8x128xbf16> to vector<64x128xbf16>
    %c7 = arith.constant 7 : index
    %c0_83 = arith.constant 0 : index
    %c0_84 = arith.constant 0 : index
    %76 = vector.load %arg3[%c7, %c0_83, %c0_84] : memref<9x128x128xbf16, #tpu.memory_space<vmem>>, vector<1x128x128xbf16>
    %77 = vector.shape_cast %76 : vector<1x128x128xbf16> to vector<128x128xbf16>
    %cst_85 = arith.constant dense<0.000000e+00> : vector<64x128xf32>
    %78 = tpu.matmul %75, %77, %cst_85 {dimension_numbers = #tpu.dot_dimension_numbers<[1], [0], [0], [1], [0, 0, 1, 1], [], []>} : vector<64x128xbf16>, vector<128x128xbf16>, vector<64x128xf32> -> vector<64x128xf32>
    %79 = arith.addf %72, %78 : vector<64x128xf32>
    %c0_86 = arith.constant 0 : index
    %c2_87 = arith.constant 2 : index
    %c2_88 = arith.constant 2 : index
    %c0_89 = arith.constant 0 : index
    %80 = vector.load %arg10[%c0_86, %c2_87, %c2_88, %c0_89] : memref<1x10x10x128xbf16, #tpu.memory_space<vmem>>, vector<1x8x8x128xbf16>
    %81 = vector.shape_cast %80 : vector<1x8x8x128xbf16> to vector<8x8x128xbf16>
    %82 = vector.shape_cast %81 : vector<8x8x128xbf16> to vector<64x128xbf16>
    %c8 = arith.constant 8 : index
    %c0_90 = arith.constant 0 : index
    %c0_91 = arith.constant 0 : index
    %83 = vector.load %arg3[%c8, %c0_90, %c0_91] : memref<9x128x128xbf16, #tpu.memory_space<vmem>>, vector<1x128x128xbf16>
    %84 = vector.shape_cast %83 : vector<1x128x128xbf16> to vector<128x128xbf16>
    %cst_92 = arith.constant dense<0.000000e+00> : vector<64x128xf32>
    %85 = tpu.matmul %82, %84, %cst_92 {dimension_numbers = #tpu.dot_dimension_numbers<[1], [0], [0], [1], [0, 0, 1, 1], [], []>} : vector<64x128xbf16>, vector<128x128xbf16>, vector<64x128xf32> -> vector<64x128xf32>
    %86 = arith.addf %79, %85 : vector<64x128xf32>
    %c0_93 = arith.constant 0 : index
    %c0_94 = arith.constant 0 : index
    %c0_95 = arith.constant 0 : index
    %c0_96 = arith.constant 0 : index
    %87 = vector.load %arg2[%c0_93, %c0_94, %c0_95, %c0_96] : memref<1x8x8x128xbf16, #tpu.memory_space<vmem>>, vector<1x8x8x128xbf16>
    %88 = vector.shape_cast %87 : vector<1x8x8x128xbf16> to vector<8x8x128xbf16>
    %89 = arith.extf %88 : vector<8x8x128xbf16> to vector<8x8x128xf32>
    %90 = vector.shape_cast %89 : vector<8x8x128xf32> to vector<64x128xf32>
    %c0_97 = arith.constant 0 : index
    %c0_98 = arith.constant 0 : index
    %91 = vector.load %arg7[%c0_97, %c0_98] : memref<1x128xf32, #tpu.memory_space<vmem>>, vector<1x128xf32>
    %92 = vector.broadcast %91 : vector<1x128xf32> to vector<64x128xf32>
    %93 = arith.mulf %90, %92 : vector<64x128xf32>
    %c0_99 = arith.constant 0 : index
    %c0_100 = arith.constant 0 : index
    %94 = vector.load %arg8[%c0_99, %c0_100] : memref<1x128xf32, #tpu.memory_space<vmem>>, vector<1x128xf32>
    %95 = vector.broadcast %94 : vector<1x128xf32> to vector<64x128xf32>
    %96 = arith.addf %93, %95 : vector<64x128xf32>
    %c0_101 = arith.constant 0 : index
    %c0_102 = arith.constant 0 : index
    %97 = vector.load %arg6[%c0_101, %c0_102] : memref<1x128xf32, #tpu.memory_space<vmem>>, vector<1x128xf32>
    %98 = vector.broadcast %97 : vector<1x128xf32> to vector<64x128xf32>
    %99 = arith.addf %86, %98 : vector<64x128xf32>
    %100 = arith.addf %99, %96 : vector<64x128xf32>
    %cst_103 = arith.constant 0.000000e+00 : f32
    %101 = vector.broadcast %cst_103 : f32 to vector<64x128xf32>
    %102 = arith.maximumf %100, %101 : vector<64x128xf32>
    %103 = vector.shape_cast %102 : vector<64x128xf32> to vector<1x8x8x128xf32>
    %c0_104 = arith.constant 0 : index
    %c0_105 = arith.constant 0 : index
    %c0_106 = arith.constant 0 : index
    %c0_107 = arith.constant 0 : index
    %104 = vector.load %arg9[%c0_104, %c0_105, %c0_106, %c0_107] : memref<1x8x8x128xf32, #tpu.memory_space<vmem>>, vector<1x8x8x128xf32>
    tpu.vector_store %arg9[%c0_104, %c0_105, %c0_106, %c0_107], %103 {strides = array<i32>} : memref<1x8x8x128xf32, #tpu.memory_space<vmem>>, vector<1x8x8x128xf32>,
    return
  }
  func.func @transform_0(%arg0: i32) -> (i32, i32, i32, i32) {
    %c0_i32 = arith.constant 0 : i32
    %c0_i32_0 = arith.constant 0 : i32
    %c0_i32_1 = arith.constant 0 : i32
    %c0_i32_2 = arith.constant 0 : i32
    return %arg0, %c0_i32, %c0_i32_0, %c0_i32_1 : i32, i32, i32, i32
  }
  func.func @transform_1(%arg0: i32) -> (i32, i32, i32, i32) {
    %c0_i32 = arith.constant 0 : i32
    %c0_i32_0 = arith.constant 0 : i32
    %c0_i32_1 = arith.constant 0 : i32
    %c0_i32_2 = arith.constant 0 : i32
    return %arg0, %c0_i32, %c0_i32_0, %c0_i32_1 : i32, i32, i32, i32
  }
  func.func @transform_2(%arg0: i32) -> (i32, i32, i32) {
    %c0_i32 = arith.constant 0 : i32
    %c0_i32_0 = arith.constant 0 : i32
    %c0_i32_1 = arith.constant 0 : i32
    %c0_i32_2 = arith.constant 0 : i32
    return %c0_i32, %c0_i32_0, %c0_i32_1 : i32, i32, i32
  }
  func.func @transform_3(%arg0: i32) -> (i32, i32) {
    %c0_i32 = arith.constant 0 : i32
    %c0_i32_0 = arith.constant 0 : i32
    %c0_i32_1 = arith.constant 0 : i32
    return %c0_i32, %c0_i32_0 : i32, i32
  }
  func.func @transform_4(%arg0: i32) -> (i32, i32) {
    %c0_i32 = arith.constant 0 : i32
    %c0_i32_0 = arith.constant 0 : i32
    %c0_i32_1 = arith.constant 0 : i32
    return %c0_i32, %c0_i32_0 : i32, i32
  }
  func.func @transform_5(%arg0: i32) -> (i32, i32) {
    %c0_i32 = arith.constant 0 : i32
    %c0_i32_0 = arith.constant 0 : i32
    %c0_i32_1 = arith.constant 0 : i32
    return %c0_i32, %c0_i32_0 : i32, i32
  }
  func.func @transform_6(%arg0: i32) -> (i32, i32) {
    %c0_i32 = arith.constant 0 : i32
    %c0_i32_0 = arith.constant 0 : i32
    %c0_i32_1 = arith.constant 0 : i32
    return %c0_i32, %c0_i32_0 : i32, i32
  }
  func.func @transform_7(%arg0: i32) -> (i32, i32) {
    %c0_i32 = arith.constant 0 : i32
    %c0_i32_0 = arith.constant 0 : i32
    %c0_i32_1 = arith.constant 0 : i32
    return %c0_i32, %c0_i32_0 : i32, i32
  }
  func.func @transform_8(%arg0: i32) -> (i32, i32, i32, i32) {
    %c0_i32 = arith.constant 0 : i32
    %c0_i32_0 = arith.constant 0 : i32
    %c0_i32_1 = arith.constant 0 : i32
    %c0_i32_2 = arith.constant 0 : i32
    return %arg0, %c0_i32, %c0_i32_0, %c0_i32_1 : i32, i32, i32, i32
  }
}

</mosaic_0001>

<bundles_post_ra>
// kernel: basic_block_forward.4
= control target key start
LH: loop header
LB: loop body
LE: loop exit
PB: predicated region body
PF: predicated region fallthrough
CT: control target
= control target key end

     0   :  { %vm14_vm0 = vcmask 24576   ;;  %vm82_vm1 = vcmask 31744   ;;  %v428_v0 = vmov 0.0   ;;  %s1318_s0 = inlined_call_operand.vmem [shape: f32[512,4], index: 0, kind: input, shape index: {}]   ;;  %s1319_s1 = inlined_call_operand.vmem [shape: f32[1,4], index: 1, kind: output, shape index: {0}]   ;;  %s1320_s2 = inlined_call_operand.vmem [shape: f32[1,4], index: 2, kind: output, shape index: {1}]  }
   0x1   :  { %15 = vst.msk [vmem:[%s1319_s1] sm:$0x1] %vm14_vm0, %v428_v0  ;;  %16 = vst.msk [vmem:[%s1320_s2] sm:$0x1] %vm14_vm0, %v428_v0  ;;  %v455_v1 = vld [vmem:[%s1318_s0] sm:$0xff]  ;;  %v460_v2 = vld [vmem:[%s1318_s0 + $0x8] sm:$0xff] }
   0x2   :  { %v465_v3 = vld [vmem:[%s1318_s0 + $0x10] sm:$0xff]  ;;  %v83_v4 = vsel %vm82_vm1, %v455_v1, 0.0  ;;  %v84_v5 = vsel %vm82_vm1, %v460_v2, 0.0  ;;  %v476_v7 = vld [vmem:[%s1318_s0 + $0x18] sm:$0xff]  ;;  %v483_v10 = vld [vmem:[%s1318_s0 + $0x20] sm:$0xff] }
   0x3   :  { %v86_v6 = vsel %vm82_vm1, %v465_v3, 0.0  ;;  %v85_v8 = vadd.f32 %v84_v5, %v83_v4  ;;  %v88_v9 = vsel %vm82_vm1, %v476_v7, 0.0  ;;  %v90_v12 = vsel %vm82_vm1, %v483_v10, 0.0  ;;  %v490_v13 = vld [vmem:[%s1318_s0 + $0x28] sm:$0xff]  ;;  %v497_v16 = vld [vmem:[%s1318_s0 + $0x30] sm:$0xff]  ;;  %v502_v18 = vld [vmem:[%s1318_s0 + $0x38] sm:$0xff] }
   0x4   :  { %v92_v15 = vsel %vm82_vm1, %v490_v13, 0.0  ;;  %v507_v19 = vld [vmem:[%s1318_s0 + $0x40] sm:$0xff]  ;;  %v94_v20 = vsel %vm82_vm1, %v497_v16, 0.0  ;;  %v514_v21 = vld [vmem:[%s1318_s0 + $0x48] sm:$0xff]  ;;  %v519_v22 = vld [vmem:[%s1318_s0 + $0x50] sm:$0xff]  ;;  %v96_v25 = vsel %vm82_vm1, %v502_v18, 0.0 }
   0x5   :  { %v87_v11 = vadd.f32 %v86_v6, %v85_v8  ;;  %v524_v23 = vld [vmem:[%s1318_s0 + $0x58] sm:$0xff]  ;;  %v98_v26 = vsel %vm82_vm1, %v507_v19, 0.0  ;;  %v533_v27 = vld [vmem:[%s1318_s0 + $0x108] sm:$0xff]  ;;  %v538_v28 = vld [vmem:[%s1318_s0 + $0x110] sm:$0xff]  ;;  %v100_v30 = vsel %vm82_vm1, %v514_v21, 0.0  ;;  %v102_v31 = vsel %vm82_vm1, %v519_v22, 0.0 }
   0x6   :  { %v543_v29 = vld [vmem:[%s1318_s0 + $0x118] sm:$0xff]  ;;  %v551_v32 = vsel %vm82_vm1, %v524_v23, 0.0  ;;  %v556_v33 = vld [vmem:[%s1318_s0 + $0x120] sm:$0xff]  ;;  %v561_v34 = vld [vmem:[%s1318_s0 + $0x128] sm:$0xff]  ;;  %v570_v37 = vsel %vm82_vm1, %v533_v27, 0.0  ;;  %v574_v38 = vsel %vm82_vm1, %v538_v28, 0.0 }
   0x7   :  { %v89_v14 = vadd.f32 %v88_v9, %v87_v11  ;;  %v566_v35 = vld [vmem:[%s1318_s0 + $0x130] sm:$0xff]  ;;  %1339 = vst [vmem:[#allocation2_spill] sm:$0xff] %v570_v37  ;;  %1340 = vst [vmem:[#allocation3_spill] sm:$0xff] %v574_v38  ;;  %v578_v39 = vsel %vm82_vm1, %v543_v29, 0.0  ;;  %v583_v40 = vld [vmem:[%s1318_s0 + $0x138] sm:$0xff]  ;;  %v597_v43 = vsel %vm82_vm1, %v556_v33, 0.0  ;;  %v222_v37 = vmul.f32 %v465_v3, %v465_v3 }
   0x8   :  { %1341 = vst [vmem:[#allocation4_spill] sm:$0xff] %v578_v39  ;;  %v588_v41 = vld [vmem:[%s1318_s0 + $0x140] sm:$0xff]  ;;  %v593_v42 = vld [vmem:[%s1318_s0 + $0x148] sm:$0xff]  ;;  %1342 = vst [vmem:[#allocation5_spill] sm:$0xff] %v597_v43  ;;  %v601_v44 = vsel %vm82_vm1, %v561_v34, 0.0  ;;  %v605_v45 = vsel %vm82_vm1, %v566_v35, 0.0 }
   0x9   :  { %v91_v17 = vadd.f32 %v90_v12, %v89_v14  ;;  %1343 = vst [vmem:[#allocation6_spill] sm:$0xff] %v601_v44  ;;  %1344 = vst [vmem:[#allocation7_spill] sm:$0xff] %v605_v45  ;;  %v610_v46 = vld [vmem:[%s1318_s0 + $0x150] sm:$0xff]  ;;  %v615_v47 = vld [vmem:[%s1318_s0 + $0x158] sm:$0xff]  ;;  %v624_v50 = vsel %vm82_vm1, %v583_v40, 0.0  ;;  %v628_v51 = vsel %vm82_vm1, %v588_v41, 0.0 }
   0xa   :  { %v620_v48 = vld [vmem:[%s1318_s0 + $0x160] sm:$0xff]  ;;  %1345 = vst [vmem:[#allocation8_spill] sm:$0xff] %v624_v50  ;;  %1346 = vst [vmem:[#allocation9_spill] sm:$0xff] %v628_v51  ;;  %v632_v52 = vsel %vm82_vm1, %v593_v42, 0.0  ;;  %v637_v53 = vld [vmem:[%s1318_s0 + $0x168] sm:$0xff]  ;;  %v651_v56 = vsel %vm82_vm1, %v610_v46, 0.0 }
   0xb   :  { %v93_v24 = vadd.f32 %v92_v15, %v91_v17  ;;  %1347 = vst [vmem:[#allocation10_spill] sm:$0xff] %v632_v52  ;;  %v642_v54 = vld [vmem:[%s1318_s0 + $0x170] sm:$0xff]  ;;  %v647_v55 = vld [vmem:[%s1318_s0 + $0x178] sm:$0xff]  ;;  %1348 = vst [vmem:[#allocation11_spill] sm:$0xff] %v651_v56  ;;  %v655_v57 = vsel %vm82_vm1, %v615_v47, 0.0  ;;  %v659_v58 = vsel %vm82_vm1, %v620_v48, 0.0 }
   0xc   :  { %1349 = vst [vmem:[#allocation12_spill] sm:$0xff] %v655_v57  ;;  %1350 = vst [vmem:[#allocation13_spill] sm:$0xff] %v659_v58  ;;  %v664_v59 = vld [vmem:[%s1318_s0 + $0x180] sm:$0xff]  ;;  %v669_v60 = vld [vmem:[%s1318_s0 + $0x188] sm:$0xff]  ;;  %v678_v63 = vsel %vm82_vm1, %v637_v53, 0.0  ;;  %v682_v0 = vsel %vm82_vm1, %v642_v54, 0.0 }
   0xd   :  { %v95_v36 = vadd.f32 %v94_v20, %v93_v24  ;;  %v674_v61 = vld [vmem:[%s1318_s0 + $0x190] sm:$0xff]  ;;  %1351 = vst [vmem:[#allocation14_spill] sm:$0xff] %v678_v63  ;;  %1352 = vst [vmem:[#allocation15_spill] sm:$0xff] %v682_v0  ;;  %v686_v4 = vsel %vm82_vm1, %v647_v55, 0.0  ;;  %v691_v5 = vld [vmem:[%s1318_s0 + $0x198] sm:$0xff]  ;;  %v705_v9 = vsel %vm82_vm1, %v664_v59, 0.0 }
   0xe   :  { %1353 = vst [vmem:[#allocation16_spill] sm:$0xff] %v686_v4  ;;  %v696_v6 = vld [vmem:[%s1318_s0 + $0x1a0] sm:$0xff]  ;;  %v701_v8 = vld [vmem:[%s1318_s0 + $0x1a8] sm:$0xff]  ;;  %1354 = vst [vmem:[#allocation17_spill] sm:$0xff] %v705_v9  ;;  %v709_v11 = vsel %vm82_vm1, %v669_v60, 0.0  ;;  %v713_v12 = vsel %vm82_vm1, %v674_v61, 0.0 }
   0xf   :  { %v97_v49 = vadd.f32 %v96_v25, %v95_v36  ;;  %1355 = vst [vmem:[#allocation18_spill] sm:$0xff] %v709_v11  ;;  %1356 = vst [vmem:[#allocation19_spill] sm:$0xff] %v713_v12  ;;  %v718_v14 = vld [vmem:[%s1318_s0 + $0x60] sm:$0xff]  ;;  %v723_v15 = vld [vmem:[%s1318_s0 + $0x1b0] sm:$0xff]  ;;  %v737_v25 = vsel %vm82_vm1, %v691_v5, 0.0  ;;  %v745_v36 = vsel %vm82_vm1, %v701_v8, 0.0 }
  0x10   :  { %v728_v17 = vld [vmem:[%s1318_s0 + $0x1b8] sm:$0xff]  ;;  %v733_v20 = vld [vmem:[%s1318_s0 + $0x1c0] sm:$0xff]  ;;  %1357 = vst [vmem:[#allocation20_spill] sm:$0xff] %v737_v25  ;;  %1359 = vst [vmem:[#allocation22_spill] sm:$0xff] %v745_v36 }
  0x11   :  { %v99_v62 = vadd.f32 %v98_v26, %v97_v49  ;;  %v741_v26 = vsel %vm82_vm1, %v696_v6, 0.0  ;;  %v750_v49 = vld [vmem:[%s1318_s0 + $0x1c8] sm:$0xff]  ;;  %v768_v36 = vsel %vm82_vm1, %v728_v17, 0.0  ;;  %v772_v25 = vsel %vm82_vm1, %v733_v20, 0.0  ;;  %v777_v12 = vld [vmem:[%s1318_s0 + $0x1e0] sm:$0xff]  ;;  %v804_v0 = vld [vmem:[%s1318_s0 + $0x1f8] sm:$0xff] }
  0x12   :  { %1358 = vst [vmem:[#allocation21_spill] sm:$0xff] %v741_v26  ;;  %v764_v26 = vsel %vm82_vm1, %v723_v15, 0.0  ;;  %1361 = vst [vmem:[#allocation24_spill] sm:$0xff] %v768_v36  ;;  %v782_v11 = vld [vmem:[%s1318_s0 + $0x1e8] sm:$0xff]  ;;  %v791_v9 = vsel %vm82_vm1, %v750_v49, 0.0  ;;  %v826_v58 = vsel %vm82_vm1, %v804_v0, 0.0 }
  0x13   :  { %v101_v24 = vadd.f32 %v100_v30, %v99_v62  ;;  %v755_v30 = vld [vmem:[%s1318_s0 + $0x1d0] sm:$0xff]  ;;  %v760_v62 = vld [vmem:[%s1318_s0 + $0x1d8] sm:$0xff]  ;;  %1360 = vst [vmem:[#allocation23_spill] sm:$0xff] %v764_v26  ;;  %1362 = vst [vmem:[#allocation25_spill] sm:$0xff] %v772_v25 }
  0x14   :  { %v787_v26 = vld [vmem:[%s1318_s0 + $0x1f0] sm:$0xff]  ;;  %1364 = vst [vmem:[#allocation27_spill] sm:$0xff] %v791_v9  ;;  %v795_v25 = vsel %vm82_vm1, %v755_v30, 0.0  ;;  %v799_v4 = vsel %vm82_vm1, %v760_v62, 0.0  ;;  %1367 = vst [vmem:[#allocation30_spill] sm:$0xff] %v804_v0  ;;  %v814_v9 = vsel %vm82_vm1, %v782_v11, 0.0 }
  0x15   :  { %1363 = vst [vmem:[#allocation26_spill] sm:$0xff] %v787_v26  ;;  %v103_v36 = vadd.f32 %v102_v31, %v101_v24  ;;  %1365 = vst [vmem:[#allocation28_spill] sm:$0xff] %v795_v25  ;;  %v106_v31 = vsel %vm82_vm1, %v718_v14, 0.0  ;;  %v810_v24 = vsel %vm82_vm1, %v777_v12, 0.0  ;;  %v818_v25 = vsel %vm82_vm1, %v787_v26, 0.0  ;;  %v855_v56 = vld [vmem:[%s1318_s0 + $0x90] sm:$0xff] }
  0x16   :  { %1366 = vst [vmem:[#allocation29_spill] sm:$0xff] %v799_v4  ;;  %1368 = vst [vmem:[#allocation31_spill] sm:$0xff] %v810_v24  ;;  %v30_v4 = vld [vmem:[%s1318_s0 + $0x68] sm:$0xff]  ;;  %v860_v52 = vld [vmem:[%s1318_s0 + $0x98] sm:$0xff] }
  0x17   :  { %1369 = vst [vmem:[#allocation32_spill] sm:$0xff] %v814_v9  ;;  %1370 = vst [vmem:[#allocation33_spill] sm:$0xff] %v818_v25  ;;  %v105_v63 = vadd.f32 %v551_v32, %v103_v36  ;;  %v108_v24 = vsel %vm82_vm1, %v30_v4, 0.0  ;;  %v31_v9 = vld [vmem:[%s1318_s0 + $0x70] sm:$0xff]  ;;  %v835_v25 = vld [vmem:[%s1318_s0 + $0x78] sm:$0xff]  ;;  %v120_v39 = vsel %vm82_vm1, %v860_v52, 0.0 }
  0x18   :  { %1371 = vst [vmem:[#allocation34_spill] sm:$0xff] %v826_v58  ;;  %1372 = vst [vmem:[#allocation35_spill] sm:$0xff] %v835_v25  ;;  %v840_v32 = vld [vmem:[%s1318_s0 + $0x80] sm:$0xff]  ;;  %v845_v36 = vld [vmem:[%s1318_s0 + $0x88] sm:$0xff]  ;;  %v110_v58 = vsel %vm82_vm1, %v31_v9, 0.0 }
  0x19   :  { %v107_v57 = vadd.f32 %v106_v31, %v105_v63  ;;  %1373 = vst [vmem:[#allocation36_spill] sm:$0xff] %v840_v32  ;;  %1374 = vst [vmem:[#allocation37_spill] sm:$0xff] %v845_v36  ;;  %v220_v63 = vmul.f32 %v455_v1, %v455_v1  ;;  %v221_v31 = vmul.f32 %v460_v2, %v460_v2  ;;  %v865_v51 = vld [vmem:[%s1318_s0 + $0xa0] sm:$0xff]  ;;  %v112_v1 = vsel %vm82_vm1, %v835_v25, 0.0  ;;  %v876_v44 = vld [vmem:[%s1318_s0 + $0xa8] sm:$0xff] }
  0x1a   :  { %1375 = vst [vmem:[#allocation38_spill] sm:$0xff] %v855_v56  ;;  %1376 = vst [vmem:[#allocation39_spill] sm:$0xff] %v860_v52  ;;  %v114_v2 = vsel %vm82_vm1, %v840_v32, 0.0  ;;  %v116_v45 = vsel %vm82_vm1, %v845_v36, 0.0  ;;  %v881_v43 = vld [vmem:[%s1318_s0 + $0xb0] sm:$0xff]  ;;  %v122_v38 = vsel %vm82_vm1, %v865_v51, 0.0  ;;  %v223_v25 = vmul.f32 %v476_v7, %v476_v7 }
  0x1b   :  { %1377 = vst [vmem:[#allocation40_spill] sm:$0xff] %v865_v51  ;;  %v109_v50 = vadd.f32 %v108_v24, %v107_v57  ;;  %1378 = vst [vmem:[#allocation41_spill] sm:$0xff] %v876_v44  ;;  %v886_v57 = vld [vmem:[%s1318_s0 + $0xb8] sm:$0xff]  ;;  %v118_v24 = vsel %vm82_vm1, %v855_v56, 0.0  ;;  %v899_v36 = vld [vmem:[%s1318_s0 + $0xc0] sm:$0xff]  ;;  %v124_v51 = vsel %vm82_vm1, %v876_v44, 0.0 }
  0x1c   :  { %1379 = vst [vmem:[#allocation42_spill] sm:$0xff] %v881_v43  ;;  %1380 = vst [vmem:[#allocation43_spill] sm:$0xff] %v886_v57  ;;  %v904_v32 = vld [vmem:[%s1318_s0 + $0xc8] sm:$0xff]  ;;  %v909_v52 = vld [vmem:[%s1318_s0 + $0xd0] sm:$0xff]  ;;  %v915_v3 = vsel %vm82_vm1, %v881_v43, 0.0 }
  0x1d   :  { %1381 = vst [vmem:[#allocation44_spill] sm:$0xff] %v899_v36  ;;  %1382 = vst [vmem:[#allocation45_spill] sm:$0xff] %v904_v32  ;;  %v111_v56 = vadd.f32 %v110_v58, %v109_v50  ;;  %v922_v0 = vld [vmem:[%s1318_s0 + $0xd8] sm:$0xff]  ;;  %v927_v26 = vld [vmem:[%s1318_s0 + $0xe0] sm:$0xff]  ;;  %v931_v50 = vsel %vm82_vm1, %v886_v57, 0.0  ;;  %v935_v58 = vsel %vm82_vm1, %v899_v36, 0.0 }
  0x1e   :  { %1383 = vst [vmem:[#allocation46_spill] sm:$0xff] %v909_v52  ;;  %1384 = vst [vmem:[#allocation47_spill] sm:$0xff] %v922_v0  ;;  %v939_v7 = vsel %vm82_vm1, %v904_v32, 0.0  ;;  %v943_v43 = vsel %vm82_vm1, %v909_v52, 0.0  ;;  %v948_v44 = vld [vmem:[%s1318_s0 + $0xe8] sm:$0xff]  ;;  %v953_v57 = vld [vmem:[%s1318_s0 + $0xf0] sm:$0xff]  ;;  %v224_v52 = vmul.f32 %v483_v10, %v483_v10  ;;  %v228_v10 = vmul.f32 %v507_v19, %v507_v19 }
  0x1f   :  { %1385 = vst [vmem:[#allocation48_spill] sm:$0xff] %v927_v26  ;;  %1386 = vst [vmem:[#allocation49_spill] sm:$0xff] %v935_v58  ;;  %v113_v36 = vadd.f32 %v112_v1, %v111_v56  ;;  %v957_v58 = vsel %vm82_vm1, %v922_v0, 0.0  ;;  %v961_v32 = vsel %vm82_vm1, %v927_v26, 0.0  ;;  %v225_v56 = vmul.f32 %v490_v13, %v490_v13 }
  0x20   :  { %1387 = vst [vmem:[#allocation50_spill] sm:$0xff] %v939_v7  ;;  %1388 = vst [vmem:[#allocation51_spill] sm:$0xff] %v943_v43  ;;  %v967_v43 = vsel %vm82_vm1, %v948_v44, 0.0  ;;  %v971_v7 = vsel %vm82_vm1, %v953_v57, 0.0  ;;  %v226_v1 = vmul.f32 %v497_v16, %v497_v16  ;;  %v227_v26 = vmul.f32 %v502_v18, %v502_v18 }
  0x21   :  { %1389 = vst [vmem:[#allocation52_spill] sm:$0xff] %v948_v44  ;;  %1390 = vst [vmem:[#allocation53_spill] sm:$0xff] %v953_v57  ;;  %v115_v0 = vadd.f32 %v114_v2, %v113_v36  ;;  %v229_v44 = vmul.f32 %v514_v21, %v514_v21  ;;  %v230_v57 = vmul.f32 %v519_v22, %v519_v22 }
  0x22   :  { %1391 = vst [vmem:[#allocation54_spill] sm:$0xff] %v971_v7  ;;  %v231_v7 = vmul.f32 %v524_v23, %v524_v23  ;;  %v232_v13 = vmul.f32 %v718_v14, %v718_v14  ;;  %v989_v16 = vmul.f32 %v30_v4, %v30_v4  ;;  %v991_v2 = vmul.f32 %v31_v9, %v31_v9 }
  0x23   :  { %v117_v36 = vadd.f32 %v116_v45, %v115_v0  ;;  %v253_v18 = vmul.f32 %v533_v27, %v533_v27  ;;  %v254_v19 = vmul.f32 %v538_v28, %v538_v28  ;;  %v255_v21 = vmul.f32 %v543_v29, %v543_v29 }
  0x24   :  { %v256_v22 = vmul.f32 %v556_v33, %v556_v33  ;;  %v257_v23 = vmul.f32 %v561_v34, %v561_v34  ;;  %v258_v45 = vmul.f32 %v566_v35, %v566_v35  ;;  %v259_v4 = vmul.f32 %v583_v40, %v583_v40 }
  0x25   :  { %v119_v0 = vadd.f32 %v118_v24, %v117_v36  ;;  %v260_v27 = vmul.f32 %v588_v41, %v588_v41  ;;  %v261_v28 = vmul.f32 %v593_v42, %v593_v42  ;;  %v262_v29 = vmul.f32 %v610_v46, %v610_v46 }
  0x26   :  { %v263_v33 = vmul.f32 %v615_v47, %v615_v47  ;;  %v284_v34 = vsel %vm82_vm1, %v220_v63, 0.0  ;;  %v285_v35 = vsel %vm82_vm1, %v221_v31, 0.0  ;;  %v264_v40 = vmul.f32 %v620_v48, %v620_v48 }
  0x27   :  { %v121_v9 = vadd.f32 %v120_v39, %v119_v0  ;;  %v286_v14 = vadd.f32 %v285_v35, %v284_v34  ;;  %v287_v41 = vsel %vm82_vm1, %v222_v37, 0.0  ;;  %v265_v42 = vmul.f32 %v637_v53, %v637_v53  ;;  %v1392_v0 = vld [vmem:[#allocation26_spill] sm:$0xff] }
  0x28   :  { %v266_v46 = vmul.f32 %v642_v54, %v642_v54  ;;  %v267_v47 = vmul.f32 %v647_v55, %v647_v55  ;;  %v289_v63 = vsel %vm82_vm1, %v223_v25, 0.0  ;;  %v268_v39 = vmul.f32 %v664_v59, %v664_v59  ;;  %v1393_v34 = vld [vmem:[#allocation30_spill] sm:$0xff] }
  0x29   :  { %v123_v24 = vadd.f32 %v122_v38, %v121_v9  ;;  %v269_v48 = vmul.f32 %v669_v60, %v669_v60  ;;  %v288_v31 = vadd.f32 %v287_v41, %v286_v14  ;;  %v270_v37 = vmul.f32 %v674_v61, %v674_v61  ;;  %v1394_v41 = vld [vmem:[#allocation49_spill] sm:$0xff] }
  0x2a   :  { %v271_v53 = vmul.f32 %v691_v5, %v691_v5  ;;  %v272_v54 = vmul.f32 %v696_v6, %v696_v6  ;;  %v291_v55 = vsel %vm82_vm1, %v224_v52, 0.0  ;;  %v273_v38 = vmul.f32 %v701_v8, %v701_v8 }
  0x2b   :  { %v125_v25 = vadd.f32 %v124_v51, %v123_v24  ;;  %v274_v59 = vmul.f32 %v723_v15, %v723_v15  ;;  %v290_v60 = vadd.f32 %v289_v63, %v288_v31  ;;  %v275_v36 = vmul.f32 %v728_v17, %v728_v17 }
  0x2c   :  { %v276_v61 = vmul.f32 %v733_v20, %v733_v20  ;;  %v277_v5 = vmul.f32 %v750_v49, %v750_v49  ;;  %v293_v6 = vsel %vm82_vm1, %v225_v56, 0.0  ;;  %v278_v52 = vmul.f32 %v755_v30, %v755_v30 }
  0x2d   :  { %v127_v51 = vadd.f32 %v915_v3, %v125_v25  ;;  %v279_v8 = vmul.f32 %v760_v62, %v760_v62  ;;  %v292_v15 = vadd.f32 %v291_v55, %v290_v60  ;;  %v280_v17 = vmul.f32 %v777_v12, %v777_v12  ;;  %v1396_v25 = vld [vmem:[#allocation51_spill] sm:$0xff] }
  0x2e   :  { %v281_v20 = vmul.f32 %v782_v11, %v782_v11  ;;  %v282_v49 = vmul.f32 %v1392_v0, %v1392_v0  ;;  %v295_v56 = vsel %vm82_vm1, %v226_v1, 0.0  ;;  %v283_v30 = vmul.f32 %v1393_v34, %v1393_v34  ;;  %v1398_v34 = vld [vmem:[#allocation54_spill] sm:$0xff] }
  0x2f   :  { %v129_v3 = vadd.f32 %v931_v50, %v127_v51  ;;  %v294_v35 = vadd.f32 %v293_v6, %v292_v15  ;;  %v297_v62 = vsel %vm82_vm1, %v227_v26, 0.0  ;;  %v299_v9 = vsel %vm82_vm1, %v228_v10, 0.0 }
  0x30   :  { %v301_v12 = vsel %vm82_vm1, %v229_v44, 0.0  ;;  %v303_v14 = vsel %vm82_vm1, %v230_v57, 0.0  ;;  %v305_v11 = vsel %vm82_vm1, %v231_v7, 0.0  ;;  %v307_v1 = vsel %vm82_vm1, %v232_v13, 0.0  ;;  %v1395_v7 = vld [vmem:[#allocation50_spill] sm:$0xff] }
  0x31   :  { %v131_v63 = vadd.f32 %v1394_v41, %v129_v3  ;;  %v296_v24 = vadd.f32 %v295_v56, %v294_v35  ;;  %v1072_v50 = vsel %vm82_vm1, %v253_v18, 0.0  ;;  %v1075_v31 = vsel %vm82_vm1, %v254_v19, 0.0  ;;  %v1397_v56 = vld [vmem:[#allocation35_spill] sm:$0xff] }
  0x32   :  { %v1078_v26 = vsel %vm82_vm1, %v255_v21, 0.0  ;;  %v1081_v44 = vsel %vm82_vm1, %v256_v22, 0.0  ;;  %v1084_v57 = vsel %vm82_vm1, %v257_v23, 0.0  ;;  %v1088_v13 = vsel %vm82_vm1, %v258_v45, 0.0 }
  0x33   :  { %v133_v10 = vadd.f32 %v1395_v7, %v131_v63  ;;  %v298_v55 = vadd.f32 %v297_v62, %v296_v24  ;;  %v1091_v18 = vsel %vm82_vm1, %v259_v4, 0.0  ;;  %v1094_v19 = vsel %vm82_vm1, %v260_v27, 0.0  ;;  %v1399_v62 = vld [vmem:[#allocation36_spill] sm:$0xff] }
  0x34   :  { %v1097_v21 = vsel %vm82_vm1, %v261_v28, 0.0  ;;  %v1100_v22 = vsel %vm82_vm1, %v262_v29, 0.0  ;;  %v1103_v23 = vsel %vm82_vm1, %v263_v33, 0.0  ;;  %v1107_v45 = vsel %vm82_vm1, %v264_v40, 0.0 }
  0x35   :  { %v135_v60 = vadd.f32 %v1396_v25, %v133_v10  ;;  %v300_v6 = vadd.f32 %v299_v9, %v298_v55  ;;  %v1110_v4 = vsel %vm82_vm1, %v265_v42, 0.0  ;;  %v1113_v27 = vsel %vm82_vm1, %v266_v46, 0.0  ;;  %v1401_v10 = vld [vmem:[#allocation38_spill] sm:$0xff] }
  0x36   :  { %v1116_v28 = vsel %vm82_vm1, %v267_v47, 0.0  ;;  %v1119_v29 = vsel %vm82_vm1, %v268_v39, 0.0  ;;  %v1122_v33 = vsel %vm82_vm1, %v269_v48, 0.0  ;;  %v1126_v40 = vsel %vm82_vm1, %v270_v37, 0.0  ;;  %v1402_v25 = vld [vmem:[#allocation2_spill] sm:$0xff] }
  0x37   :  { %v137_v51 = vadd.f32 %v957_v58, %v135_v60  ;;  %v302_v15 = vadd.f32 %v301_v12, %v300_v6  ;;  %v1129_v42 = vsel %vm82_vm1, %v271_v53, 0.0  ;;  %v1132_v46 = vsel %vm82_vm1, %v272_v54, 0.0 }
  0x38   :  { %v1135_v47 = vsel %vm82_vm1, %v273_v38, 0.0  ;;  %v1138_v39 = vsel %vm82_vm1, %v274_v59, 0.0  ;;  %v1141_v48 = vsel %vm82_vm1, %v275_v36, 0.0  ;;  %v1145_v37 = vsel %vm82_vm1, %v276_v61, 0.0 }
  0x39   :  { %v139_v58 = vadd.f32 %v961_v32, %v137_v51  ;;  %v304_v0 = vadd.f32 %v303_v14, %v302_v15  ;;  %v1148_v53 = vsel %vm82_vm1, %v277_v5, 0.0  ;;  %v1151_v54 = vsel %vm82_vm1, %v278_v52, 0.0  ;;  %v1165_v32 = vld [vmem:[%s1318_s0 + $0xf8] sm:$0xff]  ;;  %v1403_v51 = vld [vmem:[#allocation39_spill] sm:$0xff] }
  0x3a   :  { %v1154_v38 = vsel %vm82_vm1, %v279_v8, 0.0  ;;  %v1157_v59 = vsel %vm82_vm1, %v280_v17, 0.0  ;;  %v1160_v36 = vsel %vm82_vm1, %v281_v20, 0.0  ;;  %v1169_v52 = vsel %vm82_vm1, %v282_v49, 0.0 }
  0x3b   :  { %v141_v61 = vadd.f32 %v967_v43, %v139_v58  ;;  %v306_v5 = vadd.f32 %v305_v11, %v304_v0  ;;  %v1172_v8 = vsel %vm82_vm1, %v283_v30, 0.0  ;;  %v144_v17 = vsel %vm82_vm1, %v1165_v32, 0.0  ;;  %v1183_v43 = vld [vmem:[%s1318_s0 + $0x100] sm:$0xff]  ;;  %v1404_v58 = vld [vmem:[#allocation3_spill] sm:$0xff] }
  0x3c   :  { %v235_v20 = vmul.f32 %v1397_v56, %v1397_v56  ;;  %v309_v3 = vsel %vm82_vm1, %v989_v16, 0.0  ;;  %v146_v30 = vsel %vm82_vm1, %v1183_v43, 0.0  ;;  %v236_v9 = vmul.f32 %v1399_v62, %v1399_v62  ;;  %v1400_v16 = vld [vmem:[#allocation37_spill] sm:$0xff] }
  0x3d   :  { %v143_v49 = vadd.f32 %v1398_v34, %v141_v61  ;;  %v308_v35 = vadd.f32 %v307_v1, %v306_v5  ;;  %v311_v12 = vsel %vm82_vm1, %v991_v2, 0.0  ;;  %v237_v41 = vmul.f32 %v1400_v16, %v1400_v16  ;;  %v1405_v5 = vld [vmem:[#allocation40_spill] sm:$0xff]  ;;  %v1408_v62 = vld [vmem:[#allocation5_spill] sm:$0xff] }
  0x3e   :  { %v313_v63 = vsel %vm82_vm1, %v235_v20, 0.0  ;;  %v238_v1 = vmul.f32 %v1401_v10, %v1401_v10  ;;  %v315_v55 = vsel %vm82_vm1, %v236_v9, 0.0  ;;  %v239_v2 = vmul.f32 %v1403_v51, %v1403_v51  ;;  %v1406_v20 = vld [vmem:[#allocation4_spill] sm:$0xff] }
  0x3f   :  { %v145_v14 = vadd.f32 %v144_v17, %v143_v49  ;;  %v310_v11 = vadd.f32 %v309_v3, %v308_v35  ;;  %v317_v15 = vsel %vm82_vm1, %v237_v41, 0.0  ;;  %v240_v17 = vmul.f32 %v1405_v5, %v1405_v5  ;;  %v1407_v49 = vld [vmem:[#allocation41_spill] sm:$0xff]  ;;  %v1410_v41 = vld [vmem:[#allocation6_spill] sm:$0xff] }
  0x40   :  { %v319_v56 = vsel %vm82_vm1, %v238_v1, 0.0  ;;  %v241_v35 = vmul.f32 %v1407_v49, %v1407_v49 }
  0x41   :  { %v147_v24 = vadd.f32 %v146_v30, %v145_v14  ;;  %v312_v7 = vadd.f32 %v311_v12, %v310_v11  ;;  %v321_v30 = vsel %vm82_vm1, %v239_v2, 0.0  ;;  %v1409_v14 = vld [vmem:[#allocation42_spill] sm:$0xff]  ;;  %v323_v16 = vsel %vm82_vm1, %v240_v17, 0.0 }
  0x42   :  { %v242_v11 = vmul.f32 %v1409_v14, %v1409_v14  ;;  %v325_v1 = vsel %vm82_vm1, %v241_v35, 0.0 }
  0x43   :  { %v149_v60 = vadd.f32 %v1402_v25, %v147_v24  ;;  %v314_v6 = vadd.f32 %v313_v63, %v312_v7  ;;  %v1411_v7 = vld [vmem:[#allocation43_spill] sm:$0xff] }
  0x44   :  { %v243_v10 = vmul.f32 %v1411_v7, %v1411_v7  ;;  %v327_v2 = vsel %vm82_vm1, %v242_v11, 0.0 }
  0x45   :  { %v151_v0 = vadd.f32 %v1404_v58, %v149_v60  ;;  %v316_v61 = vadd.f32 %v315_v55, %v314_v6  ;;  %v1412_v55 = vld [vmem:[#allocation7_spill] sm:$0xff]  ;;  %v1413_v6 = vld [vmem:[#allocation44_spill] sm:$0xff] }
  0x46   :  { %v244_v51 = vmul.f32 %v1413_v6, %v1413_v6  ;;  %v329_v17 = vsel %vm82_vm1, %v243_v10, 0.0 }
  0x47   :  { %v153_v3 = vadd.f32 %v1406_v20, %v151_v0  ;;  %v318_v34 = vadd.f32 %v317_v15, %v316_v61  ;;  %v1414_v15 = vld [vmem:[#allocation8_spill] sm:$0xff]  ;;  %v1415_v61 = vld [vmem:[#allocation45_spill] sm:$0xff] }
  0x48   :  { %v245_v5 = vmul.f32 %v1415_v61, %v1415_v61  ;;  %v331_v35 = vsel %vm82_vm1, %v244_v51, 0.0 }
  0x49   :  { %v155_v9 = vadd.f32 %v1408_v62, %v153_v3  ;;  %v320_v12 = vadd.f32 %v319_v56, %v318_v34  ;;  %v1416_v56 = vld [vmem:[#allocation9_spill] sm:$0xff]  ;;  %v1417_v34 = vld [vmem:[#allocation46_spill] sm:$0xff] }
  0x4a   :  { %v246_v49 = vmul.f32 %v1417_v34, %v1417_v34  ;;  %v333_v11 = vsel %vm82_vm1, %v245_v5, 0.0 }
  0x4b   :  { %v157_v63 = vadd.f32 %v1410_v41, %v155_v9  ;;  %v322_v24 = vadd.f32 %v321_v30, %v320_v12  ;;  %v1418_v30 = vld [vmem:[#allocation10_spill] sm:$0xff]  ;;  %v1419_v12 = vld [vmem:[#allocation47_spill] sm:$0xff] }
  0x4c   :  { %v247_v14 = vmul.f32 %v1419_v12, %v1419_v12  ;;  %v335_v10 = vsel %vm82_vm1, %v246_v49, 0.0  ;;  %v1427_v49 = vld [vmem:[#allocation15_spill] sm:$0xff]  ;;  %v1428_v12 = vld [vmem:[#allocation16_spill] sm:$0xff] }
  0x4d   :  { %v159_v25 = vadd.f32 %v1412_v55, %v157_v63  ;;  %v324_v60 = vadd.f32 %v323_v16, %v322_v24  ;;  %v1420_v16 = vld [vmem:[#allocation11_spill] sm:$0xff]  ;;  %v1421_v24 = vld [vmem:[#allocation48_spill] sm:$0xff] }
  0x4e   :  { %v248_v7 = vmul.f32 %v1421_v24, %v1421_v24  ;;  %v337_v51 = vsel %vm82_vm1, %v247_v14, 0.0 }
  0x4f   :  { %v161_v58 = vadd.f32 %v1414_v15, %v159_v25  ;;  %v326_v0 = vadd.f32 %v325_v1, %v324_v60  ;;  %v1422_v1 = vld [vmem:[#allocation12_spill] sm:$0xff] }
  0x50   :  { %v1423_v60 = vld [vmem:[#allocation52_spill] sm:$0xff]  ;;  %v339_v5 = vsel %vm82_vm1, %v248_v7, 0.0  ;;  %v1430_v7 = vld [vmem:[#allocation18_spill] sm:$0xff] }
  0x51   :  { %v163_v20 = vadd.f32 %v1416_v56, %v161_v58  ;;  %v328_v3 = vadd.f32 %v327_v2, %v326_v0  ;;  %v249_v6 = vmul.f32 %v1423_v60, %v1423_v60  ;;  %v1424_v2 = vld [vmem:[#allocation13_spill] sm:$0xff] }
  0x52   :  { %v1425_v0 = vld [vmem:[#allocation53_spill] sm:$0xff] }
  0x53   :  { %v165_v62 = vadd.f32 %v1418_v30, %v163_v20  ;;  %v330_v9 = vadd.f32 %v329_v17, %v328_v3  ;;  %v250_v61 = vmul.f32 %v1425_v0, %v1425_v0  ;;  %v1426_v17 = vld [vmem:[#allocation14_spill] sm:$0xff]  ;;  %v251_v3 = vmul.f32 %v1165_v32, %v1165_v32 }
  0x54   :  { %v341_v34 = vsel %vm82_vm1, %v249_v6, 0.0  ;;  %v1432_v6 = vld [vmem:[#allocation20_spill] sm:$0xff]  ;;  %v1434_v0 = vld [vmem:[#allocation22_spill] sm:$0xff] }
  0x55   :  { %v167_v41 = vadd.f32 %v1420_v16, %v165_v62  ;;  %v332_v63 = vadd.f32 %v331_v35, %v330_v9  ;;  %v252_v62 = vmul.f32 %v1183_v43, %v1183_v43  ;;  %v343_v9 = vsel %vm82_vm1, %v250_v61, 0.0 }
  0x56   :  { %v345_v16 = vsel %vm82_vm1, %v251_v3, 0.0  ;;  %v1436_v3 = vld [vmem:[#allocation24_spill] sm:$0xff] }
  0x57   :  { %v169_v55 = vadd.f32 %v1422_v1, %v167_v41  ;;  %v334_v25 = vadd.f32 %v333_v11, %v332_v63  ;;  %v1429_v41 = vld [vmem:[#allocation17_spill] sm:$0xff]  ;;  %v347_v32 = vsel %vm82_vm1, %v252_v62, 0.0  ;;  %v1438_v62 = vld [vmem:[#allocation27_spill] sm:$0xff] }
  0x59   :  { %v171_v15 = vadd.f32 %v1424_v2, %v169_v55  ;;  %v336_v58 = vadd.f32 %v335_v10, %v334_v25  ;;  %v1431_v55 = vld [vmem:[#allocation19_spill] sm:$0xff]  ;;  %v1433_v2 = vld [vmem:[#allocation21_spill] sm:$0xff] }
  0x5b   :  { %v173_v56 = vadd.f32 %v1426_v17, %v171_v15  ;;  %v338_v20 = vadd.f32 %v337_v51, %v336_v58  ;;  %v1435_v17 = vld [vmem:[#allocation23_spill] sm:$0xff] }
  0x5d   :  { %v175_v35 = vadd.f32 %v1427_v49, %v173_v56  ;;  %v340_v30 = vadd.f32 %v339_v5, %v338_v20 }
  0x5f   :  { %v177_v14 = vadd.f32 %v1428_v12, %v175_v35  ;;  %v342_v11 = vadd.f32 %v341_v34, %v340_v30  ;;  %v1437_v35 = vld [vmem:[#allocation25_spill] sm:$0xff]  ;;  %v1439_v12 = vld [vmem:[#allocation28_spill] sm:$0xff] }
  0x61   :  { %v179_v63 = vadd.f32 %v1429_v41, %v177_v14  ;;  %v344_v24 = vadd.f32 %v343_v9, %v342_v11  ;;  %v1440_v11 = vld [vmem:[#allocation29_spill] sm:$0xff]  ;;  %v1441_v41 = vld [vmem:[#allocation31_spill] sm:$0xff] }
  0x63   :  { %v181_v10 = vadd.f32 %v1430_v7, %v179_v63  ;;  %v346_v1 = vadd.f32 %v345_v16, %v344_v24  ;;  %v1442_v24 = vld [vmem:[#allocation32_spill] sm:$0xff]  ;;  %v1443_v7 = vld [vmem:[#allocation33_spill] sm:$0xff] }
  0x65   :  { %v183_v25 = vadd.f32 %v1431_v55, %v181_v10  ;;  %v348_v60 = vadd.f32 %v347_v32, %v346_v1  ;;  %v1444_v1 = vld [vmem:[#allocation34_spill] sm:$0xff] }
  0x67   :  { %v185_v43 = vadd.f32 %v1432_v6, %v183_v25  ;;  %v350_v51 = vadd.f32 %v1072_v50, %v348_v60 }
  0x69   :  { %v187_v15 = vadd.f32 %v1433_v2, %v185_v43  ;;  %v352_v58 = vadd.f32 %v1075_v31, %v350_v51 }
  0x6b   :  { %v189_v61 = vadd.f32 %v1434_v0, %v187_v15  ;;  %v354_v5 = vadd.f32 %v1078_v26, %v352_v58 }
  0x6d   :  { %v191_v56 = vadd.f32 %v1435_v17, %v189_v61  ;;  %v356_v20 = vadd.f32 %v1081_v44, %v354_v5 }
  0x6f   :  { %v193_v34 = vadd.f32 %v1436_v3, %v191_v56  ;;  %v358_v49 = vadd.f32 %v1084_v57, %v356_v20 }
  0x71   :  { %v195_v30 = vadd.f32 %v1437_v35, %v193_v34  ;;  %v360_v50 = vadd.f32 %v1088_v13, %v358_v49 }
  0x73   :  { %v197_v9 = vadd.f32 %v1438_v62, %v195_v30  ;;  %v362_v31 = vadd.f32 %v1091_v18, %v360_v50 }
  0x75   :  { %v199_v14 = vadd.f32 %v1439_v12, %v197_v9  ;;  %v364_v26 = vadd.f32 %v1094_v19, %v362_v31 }
  0x77   :  { %v201_v16 = vadd.f32 %v1440_v11, %v199_v14  ;;  %v366_v44 = vadd.f32 %v1097_v21, %v364_v26 }
  0x79   :  { %v203_v63 = vadd.f32 %v1441_v41, %v201_v16  ;;  %v368_v57 = vadd.f32 %v1100_v22, %v366_v44 }
  0x7b   :  { %v205_v32 = vadd.f32 %v1442_v24, %v203_v63  ;;  %v370_v13 = vadd.f32 %v1103_v23, %v368_v57 }
  0x7d   :  { %v207_v10 = vadd.f32 %v1443_v7, %v205_v32  ;;  %v372_v18 = vadd.f32 %v1107_v45, %v370_v13  ;;  %v81_v45 = vld [vmem:[%s1319_s1] sm:$0x1] }
  0x7f   :  { %v209_v55 = vadd.f32 %v1444_v1, %v207_v10  ;;  %v374_v19 = vadd.f32 %v1110_v4, %v372_v18 }
  0x81   :  { %v210_v25 = vrot.slane %v209_v55, 4  ;;  %v376_v60 = vadd.f32 %v1113_v27, %v374_v19 }
  0x83   :  { %v211_v21 = vadd.f32 %v210_v25, %v209_v55  ;;  %v378_v6 = vadd.f32 %v1116_v28, %v376_v60 }
  0x85   :  { %v212_v43 = vrot.slane %v211_v21, 2  ;;  %v380_v22 = vadd.f32 %v1119_v29, %v378_v6 }
  0x87   :  { %v213_v51 = vadd.f32 %v212_v43, %v211_v21  ;;  %v382_v23 = vadd.f32 %v1122_v33, %v380_v22 }
  0x89   :  { %v214_v2 = vrot.slane %v213_v51, 1  ;;  %v384_v15 = vadd.f32 %v1126_v40, %v382_v23 }
  0x8b   :  { %v215_v4 = vadd.f32 %v214_v2, %v213_v51  ;;  %v386_v58 = vadd.f32 %v1129_v42, %v384_v15 }
  0x8d   :  { %v216_v27 = vadd.f32 %v215_v4, %v81_v45  ;;  %v388_v0 = vadd.f32 %v1132_v46, %v386_v58 }
  0x8f   :  { %218 = vst.msk [vmem:[%s1319_s1] sm:$0x1] %vm14_vm0, %v216_v27  ;;  %v390_v28 = vadd.f32 %v1135_v47, %v388_v0 }
  0x91   :  { %v392_v29 = vadd.f32 %v1138_v39, %v390_v28 }
  0x93   :  { %v394_v33 = vadd.f32 %v1141_v48, %v392_v29 }
  0x95   :  { %v396_v40 = vadd.f32 %v1145_v37, %v394_v33  ;;  %v219_v37 = vld [vmem:[%s1320_s2] sm:$0x1] }
  0x97   :  { %v398_v61 = vadd.f32 %v1148_v53, %v396_v40 }
  0x99   :  { %v400_v42 = vadd.f32 %v1151_v54, %v398_v61 }
  0x9b   :  { %v402_v5 = vadd.f32 %v1154_v38, %v400_v42 }
  0x9d   :  { %v404_v46 = vadd.f32 %v1157_v59, %v402_v5 }
  0x9f   :  { %v406_v17 = vadd.f32 %v1160_v36, %v404_v46 }
  0xa1   :  { %v408_v56 = vadd.f32 %v1169_v52, %v406_v17 }
  0xa3   :  { %v410_v47 = vadd.f32 %v1172_v8, %v408_v56 }
  0xa5   :  { %v411_v20 = vrot.slane %v410_v47, 4 }
  0xa7   :  { %v412_v39 = vadd.f32 %v411_v20, %v410_v47 }
  0xa9   :  { %v413_v3 = vrot.slane %v412_v39, 2 }
  0xab   :  { %v414_v48 = vadd.f32 %v413_v3, %v412_v39 }
  0xad   :  { %v415_v34 = vrot.slane %v414_v48, 1 }
  0xaf   :  { %v416_v53 = vadd.f32 %v415_v34, %v414_v48 }
  0xb1   :  { %v417_v54 = vadd.f32 %v416_v53, %v219_v37 }
  0xb3   :  { %418 = vst.msk [vmem:[%s1320_s2] sm:$0x1] %vm14_vm0, %v417_v54 }

// kernel: basic_block_forward.5
= control target key start
LH: loop header
LB: loop body
LE: loop exit
PB: predicated region body
PF: predicated region fallthrough
CT: control target
= control target key end

     0   :  { %vm540_vm0 = vcmask 27648   ;;  %s1345_s0 = inlined_call_operand.vmem [shape: f32[512,4], index: 0, kind: input, shape index: {}]   ;;  %s1346_s1 = inlined_call_operand.vmem [shape: f32[1,4], index: 1, kind: input, shape index: {}]   ;;  %s1347_s2 = inlined_call_operand.vmem [shape: f32[1,4], index: 2, kind: input, shape index: {}]   ;;  %s1348_s3 = inlined_call_operand.vmem [shape: bf16[512,4], index: 3, kind: output, shape index: {}]  }
   0x1   :  { %v14_v0 = vld [vmem:[%s1345_s0] sm:$0xff]  ;;  %v15_v4 = vld [vmem:[%s1345_s0 + $0x8] sm:$0xff]  ;;  %v16_v5 = vld [vmem:[%s1345_s0 + $0x10] sm:$0xff] }
   0x2   :  { %v765_v1 = vld [vmem:[%s1346_s1] ss:$0 sm:$0xff]  ;;  %v17_v6 = vld [vmem:[%s1345_s0 + $0x18] sm:$0xff]  ;;  %v19_v11 = vld [vmem:[%s1345_s0 + $0x28] sm:$0xff] }
   0x3   :  { %v770_v2 = vld [vmem:[%s1347_s2] ss:$0 sm:$0xff]  ;;  %v85_v3 = vmul.f32 %v765_v1, %v14_v0  ;;  %v86_v7 = vmul.f32 %v765_v1, %v15_v4  ;;  %v87_v8 = vmul.f32 %v765_v1, %v16_v5  ;;  %v88_v9 = vmul.f32 %v765_v1, %v17_v6  ;;  %v20_v12 = vld [vmem:[%s1345_s0 + $0x30] sm:$0xff]  ;;  %v21_v17 = vld [vmem:[%s1345_s0 + $0x38] sm:$0xff] }
   0x4   :  { %v18_v10 = vld [vmem:[%s1345_s0 + $0x20] sm:$0xff]  ;;  %v90_v15 = vmul.f32 %v765_v1, %v19_v11  ;;  %v91_v16 = vmul.f32 %v765_v1, %v20_v12  ;;  %v92_v21 = vmul.f32 %v765_v1, %v21_v17  ;;  %v23_v35 = vld [vmem:[%s1345_s0 + $0x48] sm:$0xff]  ;;  %v24_v36 = vld [vmem:[%s1345_s0 + $0x50] sm:$0xff] }
   0x5   :  { %v156_v13 = vadd.f32 %v770_v2, %v85_v3  ;;  %v89_v14 = vmul.f32 %v765_v1, %v18_v10  ;;  %v157_v18 = vadd.f32 %v770_v2, %v86_v7  ;;  %v158_v19 = vadd.f32 %v770_v2, %v87_v8  ;;  %v22_v30 = vld [vmem:[%s1345_s0 + $0x40] sm:$0xff]  ;;  %v25_v37 = vld [vmem:[%s1345_s0 + $0x58] sm:$0xff]  ;;  %v27_v43 = vld [vmem:[%s1345_s0 + $0x68] sm:$0xff] }
   0x6   :  { %v159_v20 = vadd.f32 %v770_v2, %v88_v9  ;;  %v161_v24 = vadd.f32 %v770_v2, %v90_v15  ;;  %v162_v25 = vadd.f32 %v770_v2, %v91_v16  ;;  %v163_v29 = vadd.f32 %v770_v2, %v92_v21  ;;  %v26_v42 = vld [vmem:[%s1345_s0 + $0x60] sm:$0xff]  ;;  %v28_v44 = vld [vmem:[%s1345_s0 + $0x70] sm:$0xff]  ;;  %v29_v49 = vld [vmem:[%s1345_s0 + $0x78] sm:$0xff] }
   0x7   :  { %v220_v22 = vmax.f32 %v156_v13, 0.0  ;;  %v160_v23 = vadd.f32 %v770_v2, %v89_v14  ;;  %v221_v26 = vmax.f32 %v157_v18, 0.0  ;;  %v222_v27 = vmax.f32 %v158_v19, 0.0  ;;  %v30_v8 = vld [vmem:[%s1345_s0 + $0x80] sm:$0xff]  ;;  %v31_v13 = vld [vmem:[%s1345_s0 + $0x88] sm:$0xff]  ;;  %v32_v14 = vld [vmem:[%s1345_s0 + $0x90] sm:$0xff] }
   0x8   :  { %v223_v28 = vmax.f32 %v159_v20, 0.0  ;;  %v225_v33 = vmax.f32 %v161_v24, 0.0  ;;  %v226_v34 = vmax.f32 %v162_v25, 0.0  ;;  %v227_v41 = vmax.f32 %v163_v29, 0.0  ;;  %v33_v15 = vld [vmem:[%s1345_s0 + $0x98] sm:$0xff]  ;;  %v34_v20 = vld [vmem:[%s1345_s0 + $0xa0] sm:$0xff] }
   0x9   :  { %v675_v31 = vpack.c.bf16 %v220_v22, %v220_v22  ;;  %v224_v32 = vmax.f32 %v160_v23, 0.0  ;;  %v676_v38 = vpack.c.bf16 %v221_v26, %v221_v26  ;;  %v677_v39 = vpack.c.bf16 %v222_v27, %v222_v27  ;;  %v35_v21 = vld [vmem:[%s1345_s0 + $0xa8] sm:$0xff]  ;;  %v36_v22 = vld [vmem:[%s1345_s0 + $0xb0] sm:$0xff]  ;;  %v37_v27 = vld [vmem:[%s1345_s0 + $0xb8] sm:$0xff] }
   0xa   :  { %v678_v40 = vpack.c.bf16 %v223_v28, %v223_v28  ;;  %v680_v46 = vpack.c.bf16 %v225_v33, %v225_v33  ;;  %v681_v47 = vpack.c.bf16 %v226_v34, %v226_v34  ;;  %v93_v48 = vmul.f32 %v765_v1, %v22_v30 }
   0xb   :  { %541 = vst.msk [vmem:[%s1348_s3] sm:$0xf] %vm540_vm0, %v675_v31  ;;  %v679_v45 = vpack.c.bf16 %v224_v32, %v224_v32  ;;  %542 = vst.msk [vmem:[%s1348_s3 + $0x4] sm:$0xf] %vm540_vm0, %v676_v38  ;;  %v682_v50 = vpack.c.bf16 %v227_v41, %v227_v41  ;;  %v94_v51 = vmul.f32 %v765_v1, %v23_v35 }
   0xc   :  { %543 = vst.msk [vmem:[%s1348_s3 + $0x8] sm:$0xf] %vm540_vm0, %v677_v39  ;;  %544 = vst.msk [vmem:[%s1348_s3 + $0xc] sm:$0xf] %vm540_vm0, %v678_v40  ;;  %v95_v52 = vmul.f32 %v765_v1, %v24_v36  ;;  %v96_v53 = vmul.f32 %v765_v1, %v25_v37  ;;  %v164_v54 = vadd.f32 %v770_v2, %v93_v48  ;;  %v38_v48 = vld [vmem:[%s1345_s0 + $0xc0] sm:$0xff] }
   0xd   :  { %545 = vst.msk [vmem:[%s1348_s3 + $0x10] sm:$0xf] %vm540_vm0, %v679_v45  ;;  %546 = vst.msk [vmem:[%s1348_s3 + $0x14] sm:$0xf] %vm540_vm0, %v680_v46  ;;  %v97_v55 = vmul.f32 %v765_v1, %v26_v42  ;;  %v98_v56 = vmul.f32 %v765_v1, %v27_v43  ;;  %v99_v57 = vmul.f32 %v765_v1, %v28_v44 }
   0xe   :  { %547 = vst.msk [vmem:[%s1348_s3 + $0x18] sm:$0xf] %vm540_vm0, %v681_v47  ;;  %548 = vst.msk [vmem:[%s1348_s3 + $0x1c] sm:$0xf] %vm540_vm0, %v682_v50  ;;  %v165_v58 = vadd.f32 %v770_v2, %v94_v51  ;;  %v166_v59 = vadd.f32 %v770_v2, %v95_v52  ;;  %v167_v60 = vadd.f32 %v770_v2, %v96_v53  ;;  %v228_v62 = vmax.f32 %v164_v54, 0.0  ;;  %v39_v53 = vld [vmem:[%s1345_s0 + $0xc8] sm:$0xff] }
   0xf   :  { %v100_v61 = vmul.f32 %v765_v1, %v29_v49  ;;  %v168_v63 = vadd.f32 %v770_v2, %v97_v55  ;;  %v169_v0 = vadd.f32 %v770_v2, %v98_v56  ;;  %v170_v3 = vadd.f32 %v770_v2, %v99_v57  ;;  %v40_v54 = vld [vmem:[%s1345_s0 + $0xd0] sm:$0xff]  ;;  %v41_v55 = vld [vmem:[%s1345_s0 + $0xd8] sm:$0xff] }
  0x10   :  { %v229_v4 = vmax.f32 %v165_v58, 0.0  ;;  %v230_v5 = vmax.f32 %v166_v59, 0.0  ;;  %v231_v6 = vmax.f32 %v167_v60, 0.0  ;;  %v683_v9 = vpack.c.bf16 %v228_v62, %v228_v62  ;;  %v42_v60 = vld [vmem:[%s1345_s0 + $0xe0] sm:$0xff]  ;;  %v44_v62 = vld [vmem:[%s1345_s0 + $0xf0] sm:$0xff] }
  0x11   :  { %v171_v7 = vadd.f32 %v770_v2, %v100_v61  ;;  %v232_v10 = vmax.f32 %v168_v63, 0.0  ;;  %v233_v11 = vmax.f32 %v169_v0, 0.0  ;;  %v234_v12 = vmax.f32 %v170_v3, 0.0  ;;  %v43_v61 = vld [vmem:[%s1345_s0 + $0xe8] sm:$0xff] }
  0x12   :  { %v684_v16 = vpack.c.bf16 %v229_v4, %v229_v4  ;;  %v685_v17 = vpack.c.bf16 %v230_v5, %v230_v5  ;;  %v686_v18 = vpack.c.bf16 %v231_v6, %v231_v6  ;;  %549 = vst.msk [vmem:[%s1348_s3 + $0x20] sm:$0xf] %vm540_vm0, %v683_v9  ;;  %v101_v26 = vmul.f32 %v765_v1, %v30_v8  ;;  %v45_v5 = vld [vmem:[%s1345_s0 + $0xf8] sm:$0xff] }
  0x13   :  { %v235_v19 = vmax.f32 %v171_v7, 0.0  ;;  %v687_v23 = vpack.c.bf16 %v232_v10, %v232_v10  ;;  %v688_v24 = vpack.c.bf16 %v233_v11, %v233_v11  ;;  %v689_v25 = vpack.c.bf16 %v234_v12, %v234_v12 }
  0x14   :  { %550 = vst.msk [vmem:[%s1348_s3 + $0x24] sm:$0xf] %vm540_vm0, %v684_v16  ;;  %551 = vst.msk [vmem:[%s1348_s3 + $0x28] sm:$0xf] %vm540_vm0, %v685_v17  ;;  %v102_v29 = vmul.f32 %v765_v1, %v31_v13  ;;  %v103_v30 = vmul.f32 %v765_v1, %v32_v14  ;;  %v104_v31 = vmul.f32 %v765_v1, %v33_v15 }
  0x15   :  { %552 = vst.msk [vmem:[%s1348_s3 + $0x2c] sm:$0xf] %vm540_vm0, %v686_v18  ;;  %v690_v28 = vpack.c.bf16 %v235_v19, %v235_v19  ;;  %553 = vst.msk [vmem:[%s1348_s3 + $0x30] sm:$0xf] %vm540_vm0, %v687_v23  ;;  %v172_v32 = vadd.f32 %v770_v2, %v101_v26  ;;  %v105_v33 = vmul.f32 %v765_v1, %v34_v20  ;;  %v46_v26 = vld [vmem:[%s1345_s0 + $0x100] sm:$0xff] }
  0x16   :  { %554 = vst.msk [vmem:[%s1348_s3 + $0x34] sm:$0xf] %vm540_vm0, %v688_v24  ;;  %555 = vst.msk [vmem:[%s1348_s3 + $0x38] sm:$0xf] %vm540_vm0, %v689_v25  ;;  %v106_v34 = vmul.f32 %v765_v1, %v35_v21  ;;  %v107_v35 = vmul.f32 %v765_v1, %v36_v22  ;;  %v173_v36 = vadd.f32 %v770_v2, %v102_v29 }
  0x17   :  { %556 = vst.msk [vmem:[%s1348_s3 + $0x3c] sm:$0xf] %vm540_vm0, %v690_v28  ;;  %v174_v37 = vadd.f32 %v770_v2, %v103_v30  ;;  %v175_v38 = vadd.f32 %v770_v2, %v104_v31  ;;  %v108_v39 = vmul.f32 %v765_v1, %v37_v27  ;;  %v236_v40 = vmax.f32 %v172_v32, 0.0  ;;  %v47_v31 = vld [vmem:[%s1345_s0 + $0x108] sm:$0xff]  ;;  %v48_v32 = vld [vmem:[%s1345_s0 + $0x110] sm:$0xff] }
  0x18   :  { %v176_v41 = vadd.f32 %v770_v2, %v105_v33  ;;  %v177_v42 = vadd.f32 %v770_v2, %v106_v34  ;;  %v178_v43 = vadd.f32 %v770_v2, %v107_v35  ;;  %v237_v44 = vmax.f32 %v173_v36, 0.0  ;;  %v49_v33 = vld [vmem:[%s1345_s0 + $0x118] sm:$0xff] }
  0x19   :  { %v238_v45 = vmax.f32 %v174_v37, 0.0  ;;  %v239_v46 = vmax.f32 %v175_v38, 0.0  ;;  %v179_v47 = vadd.f32 %v770_v2, %v108_v39  ;;  %v691_v49 = vpack.c.bf16 %v236_v40, %v236_v40  ;;  %v50_v38 = vld [vmem:[%s1345_s0 + $0x120] sm:$0xff]  ;;  %v51_v39 = vld [vmem:[%s1345_s0 + $0x128] sm:$0xff]  ;;  %v52_v40 = vld [vmem:[%s1345_s0 + $0x130] sm:$0xff] }
  0x1a   :  { %v240_v50 = vmax.f32 %v176_v41, 0.0  ;;  %v241_v51 = vmax.f32 %v177_v42, 0.0  ;;  %v242_v52 = vmax.f32 %v178_v43, 0.0  ;;  %v692_v56 = vpack.c.bf16 %v237_v44, %v237_v44 }
  0x1b   :  { %v693_v57 = vpack.c.bf16 %v238_v45, %v238_v45  ;;  %v694_v58 = vpack.c.bf16 %v239_v46, %v239_v46  ;;  %v243_v59 = vmax.f32 %v179_v47, 0.0  ;;  %557 = vst.msk [vmem:[%s1348_s3 + $0x40] sm:$0xf] %vm540_vm0, %v691_v49  ;;  %v109_v4 = vmul.f32 %v765_v1, %v38_v48  ;;  %v53_v45 = vld [vmem:[%s1345_s0 + $0x138] sm:$0xff] }
  0x1c   :  { %v695_v63 = vpack.c.bf16 %v240_v50, %v240_v50  ;;  %v696_v0 = vpack.c.bf16 %v241_v51, %v241_v51  ;;  %v697_v3 = vpack.c.bf16 %v242_v52, %v242_v52  ;;  %558 = vst.msk [vmem:[%s1348_s3 + $0x44] sm:$0xf] %vm540_vm0, %v692_v56  ;;  %v110_v7 = vmul.f32 %v765_v1, %v39_v53 }
  0x1d   :  { %559 = vst.msk [vmem:[%s1348_s3 + $0x48] sm:$0xf] %vm540_vm0, %v693_v57  ;;  %560 = vst.msk [vmem:[%s1348_s3 + $0x4c] sm:$0xf] %vm540_vm0, %v694_v58  ;;  %v698_v6 = vpack.c.bf16 %v243_v59, %v243_v59  ;;  %v111_v8 = vmul.f32 %v765_v1, %v40_v54  ;;  %v112_v9 = vmul.f32 %v765_v1, %v41_v55 }
  0x1e   :  { %561 = vst.msk [vmem:[%s1348_s3 + $0x50] sm:$0xf] %vm540_vm0, %v695_v63  ;;  %562 = vst.msk [vmem:[%s1348_s3 + $0x54] sm:$0xf] %vm540_vm0, %v696_v0  ;;  %v180_v10 = vadd.f32 %v770_v2, %v109_v4  ;;  %v113_v11 = vmul.f32 %v765_v1, %v42_v60  ;;  %v114_v12 = vmul.f32 %v765_v1, %v43_v61  ;;  %v54_v4 = vld [vmem:[%s1345_s0 + $0x140] sm:$0xff] }
  0x1f   :  { %563 = vst.msk [vmem:[%s1348_s3 + $0x58] sm:$0xf] %vm540_vm0, %v697_v3  ;;  %v115_v13 = vmul.f32 %v765_v1, %v44_v62  ;;  %564 = vst.msk [vmem:[%s1348_s3 + $0x5c] sm:$0xf] %vm540_vm0, %v698_v6  ;;  %v181_v14 = vadd.f32 %v770_v2, %v110_v7  ;;  %v182_v15 = vadd.f32 %v770_v2, %v111_v8 }
  0x20   :  { %v183_v16 = vadd.f32 %v770_v2, %v112_v9  ;;  %v116_v17 = vmul.f32 %v765_v1, %v45_v5  ;;  %v244_v18 = vmax.f32 %v180_v10, 0.0  ;;  %v184_v19 = vadd.f32 %v770_v2, %v113_v11  ;;  %v55_v9 = vld [vmem:[%s1345_s0 + $0x148] sm:$0xff]  ;;  %v56_v10 = vld [vmem:[%s1345_s0 + $0x150] sm:$0xff]  ;;  %v57_v11 = vld [vmem:[%s1345_s0 + $0x158] sm:$0xff] }
  0x21   :  { %v185_v20 = vadd.f32 %v770_v2, %v114_v12  ;;  %v186_v21 = vadd.f32 %v770_v2, %v115_v13  ;;  %v245_v22 = vmax.f32 %v181_v14, 0.0  ;;  %v246_v23 = vmax.f32 %v182_v15, 0.0 }
  0x22   :  { %v247_v24 = vmax.f32 %v183_v16, 0.0  ;;  %v187_v25 = vadd.f32 %v770_v2, %v116_v17  ;;  %v699_v27 = vpack.c.bf16 %v244_v18, %v244_v18  ;;  %v248_v28 = vmax.f32 %v184_v19, 0.0  ;;  %v58_v16 = vld [vmem:[%s1345_s0 + $0x160] sm:$0xff]  ;;  %v59_v17 = vld [vmem:[%s1345_s0 + $0x168] sm:$0xff]  ;;  %v60_v18 = vld [vmem:[%s1345_s0 + $0x170] sm:$0xff] }
  0x23   :  { %v249_v29 = vmax.f32 %v185_v20, 0.0  ;;  %v250_v30 = vmax.f32 %v186_v21, 0.0  ;;  %v700_v34 = vpack.c.bf16 %v245_v22, %v245_v22  ;;  %v701_v35 = vpack.c.bf16 %v246_v23, %v246_v23  ;;  %v61_v23 = vld [vmem:[%s1345_s0 + $0x178] sm:$0xff] }
  0x24   :  { %v702_v36 = vpack.c.bf16 %v247_v24, %v247_v24  ;;  %v251_v37 = vmax.f32 %v187_v25, 0.0  ;;  %565 = vst.msk [vmem:[%s1348_s3 + $0x60] sm:$0xf] %vm540_vm0, %v699_v27  ;;  %v703_v41 = vpack.c.bf16 %v248_v28, %v248_v28  ;;  %v117_v44 = vmul.f32 %v765_v1, %v46_v26 }
  0x25   :  { %v704_v42 = vpack.c.bf16 %v249_v29, %v249_v29  ;;  %v705_v43 = vpack.c.bf16 %v250_v30, %v250_v30  ;;  %566 = vst.msk [vmem:[%s1348_s3 + $0x64] sm:$0xf] %vm540_vm0, %v700_v34  ;;  %567 = vst.msk [vmem:[%s1348_s3 + $0x68] sm:$0xf] %vm540_vm0, %v701_v35  ;;  %v118_v47 = vmul.f32 %v765_v1, %v47_v31 }
  0x26   :  { %568 = vst.msk [vmem:[%s1348_s3 + $0x6c] sm:$0xf] %vm540_vm0, %v702_v36  ;;  %v706_v46 = vpack.c.bf16 %v251_v37, %v251_v37  ;;  %v119_v48 = vmul.f32 %v765_v1, %v48_v32  ;;  %v120_v49 = vmul.f32 %v765_v1, %v49_v33  ;;  %569 = vst.msk [vmem:[%s1348_s3 + $0x70] sm:$0xf] %vm540_vm0, %v703_v41 }
  0x27   :  { %570 = vst.msk [vmem:[%s1348_s3 + $0x74] sm:$0xf] %vm540_vm0, %v704_v42  ;;  %571 = vst.msk [vmem:[%s1348_s3 + $0x78] sm:$0xf] %vm540_vm0, %v705_v43  ;;  %v188_v50 = vadd.f32 %v770_v2, %v117_v44  ;;  %v121_v51 = vmul.f32 %v765_v1, %v50_v38  ;;  %v122_v52 = vmul.f32 %v765_v1, %v51_v39  ;;  %v62_v44 = vld [vmem:[%s1345_s0 + $0x180] sm:$0xff] }
  0x28   :  { %v123_v53 = vmul.f32 %v765_v1, %v52_v40  ;;  %572 = vst.msk [vmem:[%s1348_s3 + $0x7c] sm:$0xf] %vm540_vm0, %v706_v46  ;;  %v189_v54 = vadd.f32 %v770_v2, %v118_v47  ;;  %v190_v55 = vadd.f32 %v770_v2, %v119_v48  ;;  %v191_v56 = vadd.f32 %v770_v2, %v120_v49  ;;  %v63_v49 = vld [vmem:[%s1345_s0 + $0x188] sm:$0xff] }
  0x29   :  { %v124_v57 = vmul.f32 %v765_v1, %v53_v45  ;;  %v252_v58 = vmax.f32 %v188_v50, 0.0  ;;  %v192_v59 = vadd.f32 %v770_v2, %v121_v51  ;;  %v193_v60 = vadd.f32 %v770_v2, %v122_v52  ;;  %v64_v50 = vld [vmem:[%s1345_s0 + $0x190] sm:$0xff]  ;;  %v65_v51 = vld [vmem:[%s1345_s0 + $0x198] sm:$0xff] }
  0x2a   :  { %v194_v61 = vadd.f32 %v770_v2, %v123_v53  ;;  %v253_v62 = vmax.f32 %v189_v54, 0.0  ;;  %v254_v63 = vmax.f32 %v190_v55, 0.0  ;;  %v255_v0 = vmax.f32 %v191_v56, 0.0  ;;  %v66_v56 = vld [vmem:[%s1345_s0 + $0x1a0] sm:$0xff] }
  0x2b   :  { %v195_v3 = vadd.f32 %v770_v2, %v124_v57  ;;  %v707_v5 = vpack.c.bf16 %v252_v58, %v252_v58  ;;  %v256_v6 = vmax.f32 %v192_v59, 0.0  ;;  %v257_v7 = vmax.f32 %v193_v60, 0.0  ;;  %v67_v57 = vld [vmem:[%s1345_s0 + $0x1a8] sm:$0xff]  ;;  %v68_v58 = vld [vmem:[%s1345_s0 + $0x1b0] sm:$0xff] }
  0x2c   :  { %v258_v8 = vmax.f32 %v194_v61, 0.0  ;;  %v708_v12 = vpack.c.bf16 %v253_v62, %v253_v62  ;;  %v709_v13 = vpack.c.bf16 %v254_v63, %v254_v63  ;;  %v710_v14 = vpack.c.bf16 %v255_v0, %v255_v0  ;;  %v69_v63 = vld [vmem:[%s1345_s0 + $0x1b8] sm:$0xff] }
  0x2d   :  { %v259_v15 = vmax.f32 %v195_v3, 0.0  ;;  %573 = vst.msk [vmem:[%s1348_s3 + $0x80] sm:$0xf] %vm540_vm0, %v707_v5  ;;  %v711_v19 = vpack.c.bf16 %v256_v6, %v256_v6  ;;  %v712_v20 = vpack.c.bf16 %v257_v7, %v257_v7  ;;  %v125_v22 = vmul.f32 %v765_v1, %v54_v4 }
  0x2e   :  { %v713_v21 = vpack.c.bf16 %v258_v8, %v258_v8  ;;  %574 = vst.msk [vmem:[%s1348_s3 + $0x84] sm:$0xf] %vm540_vm0, %v708_v12  ;;  %575 = vst.msk [vmem:[%s1348_s3 + $0x88] sm:$0xf] %vm540_vm0, %v709_v13  ;;  %v126_v25 = vmul.f32 %v765_v1, %v55_v9  ;;  %v127_v26 = vmul.f32 %v765_v1, %v56_v10 }
  0x2f   :  { %576 = vst.msk [vmem:[%s1348_s3 + $0x8c] sm:$0xf] %vm540_vm0, %v710_v14  ;;  %v714_v24 = vpack.c.bf16 %v259_v15, %v259_v15  ;;  %v128_v27 = vmul.f32 %v765_v1, %v57_v11  ;;  %577 = vst.msk [vmem:[%s1348_s3 + $0x90] sm:$0xf] %vm540_vm0, %v711_v19  ;;  %v196_v28 = vadd.f32 %v770_v2, %v125_v22  ;;  %v70_v22 = vld [vmem:[%s1345_s0 + $0x1c0] sm:$0xff] }
  0x30   :  { %578 = vst.msk [vmem:[%s1348_s3 + $0x94] sm:$0xf] %vm540_vm0, %v712_v20  ;;  %579 = vst.msk [vmem:[%s1348_s3 + $0x98] sm:$0xf] %vm540_vm0, %v713_v21  ;;  %v129_v29 = vmul.f32 %v765_v1, %v58_v16  ;;  %v130_v30 = vmul.f32 %v765_v1, %v59_v17  ;;  %v131_v31 = vmul.f32 %v765_v1, %v60_v18 }
  0x31   :  { %580 = vst.msk [vmem:[%s1348_s3 + $0x9c] sm:$0xf] %vm540_vm0, %v714_v24  ;;  %v197_v32 = vadd.f32 %v770_v2, %v126_v25  ;;  %v198_v33 = vadd.f32 %v770_v2, %v127_v26  ;;  %v199_v34 = vadd.f32 %v770_v2, %v128_v27  ;;  %v132_v35 = vmul.f32 %v765_v1, %v61_v23  ;;  %v71_v27 = vld [vmem:[%s1345_s0 + $0x1c8] sm:$0xff] }
  0x32   :  { %v260_v36 = vmax.f32 %v196_v28, 0.0  ;;  %v200_v37 = vadd.f32 %v770_v2, %v129_v29  ;;  %v201_v38 = vadd.f32 %v770_v2, %v130_v30  ;;  %v202_v39 = vadd.f32 %v770_v2, %v131_v31  ;;  %v72_v28 = vld [vmem:[%s1345_s0 + $0x1d0] sm:$0xff]  ;;  %v73_v29 = vld [vmem:[%s1345_s0 + $0x1d8] sm:$0xff] }
  0x33   :  { %v261_v40 = vmax.f32 %v197_v32, 0.0  ;;  %v262_v41 = vmax.f32 %v198_v33, 0.0  ;;  %v263_v42 = vmax.f32 %v199_v34, 0.0  ;;  %v203_v43 = vadd.f32 %v770_v2, %v132_v35  ;;  %v74_v34 = vld [vmem:[%s1345_s0 + $0x1e0] sm:$0xff]  ;;  %v75_v35 = vld [vmem:[%s1345_s0 + $0x1e8] sm:$0xff] }
  0x34   :  { %v715_v45 = vpack.c.bf16 %v260_v36, %v260_v36  ;;  %v264_v46 = vmax.f32 %v200_v37, 0.0  ;;  %v265_v47 = vmax.f32 %v201_v38, 0.0  ;;  %v266_v48 = vmax.f32 %v202_v39, 0.0  ;;  %v76_v36 = vld [vmem:[%s1345_s0 + $0x1f0] sm:$0xff] }
  0x35   :  { %v716_v52 = vpack.c.bf16 %v261_v40, %v261_v40  ;;  %v717_v53 = vpack.c.bf16 %v262_v41, %v262_v41  ;;  %v718_v54 = vpack.c.bf16 %v263_v42, %v263_v42  ;;  %v267_v55 = vmax.f32 %v203_v43, 0.0  ;;  %v77_v41 = vld [vmem:[%s1345_s0 + $0x1f8] sm:$0xff] }
  0x36   :  { %581 = vst.msk [vmem:[%s1348_s3 + $0xa0] sm:$0xf] %vm540_vm0, %v715_v45  ;;  %v719_v59 = vpack.c.bf16 %v264_v46, %v264_v46  ;;  %v720_v60 = vpack.c.bf16 %v265_v47, %v265_v47  ;;  %v721_v61 = vpack.c.bf16 %v266_v48, %v266_v48  ;;  %v133_v62 = vmul.f32 %v765_v1, %v62_v44 }
  0x37   :  { %582 = vst.msk [vmem:[%s1348_s3 + $0xa4] sm:$0xf] %vm540_vm0, %v716_v52  ;;  %583 = vst.msk [vmem:[%s1348_s3 + $0xa8] sm:$0xf] %vm540_vm0, %v717_v53  ;;  %v722_v0 = vpack.c.bf16 %v267_v55, %v267_v55  ;;  %v134_v3 = vmul.f32 %v765_v1, %v63_v49  ;;  %v135_v4 = vmul.f32 %v765_v1, %v64_v50 }
  0x38   :  { %584 = vst.msk [vmem:[%s1348_s3 + $0xac] sm:$0xf] %vm540_vm0, %v718_v54  ;;  %v136_v5 = vmul.f32 %v765_v1, %v65_v51  ;;  %585 = vst.msk [vmem:[%s1348_s3 + $0xb0] sm:$0xf] %vm540_vm0, %v719_v59  ;;  %v204_v6 = vadd.f32 %v770_v2, %v133_v62  ;;  %v137_v7 = vmul.f32 %v765_v1, %v66_v56 }
  0x39   :  { %586 = vst.msk [vmem:[%s1348_s3 + $0xb4] sm:$0xf] %vm540_vm0, %v720_v60  ;;  %587 = vst.msk [vmem:[%s1348_s3 + $0xb8] sm:$0xf] %vm540_vm0, %v721_v61  ;;  %v138_v8 = vmul.f32 %v765_v1, %v67_v57  ;;  %v139_v9 = vmul.f32 %v765_v1, %v68_v58  ;;  %v205_v10 = vadd.f32 %v770_v2, %v134_v3 }
  0x3a   :  { %588 = vst.msk [vmem:[%s1348_s3 + $0xbc] sm:$0xf] %vm540_vm0, %v722_v0  ;;  %v206_v11 = vadd.f32 %v770_v2, %v135_v4  ;;  %v207_v12 = vadd.f32 %v770_v2, %v136_v5  ;;  %v140_v13 = vmul.f32 %v765_v1, %v69_v63  ;;  %v268_v14 = vmax.f32 %v204_v6, 0.0 }
  0x3b   :  { %v208_v15 = vadd.f32 %v770_v2, %v137_v7  ;;  %v209_v16 = vadd.f32 %v770_v2, %v138_v8  ;;  %v210_v17 = vadd.f32 %v770_v2, %v139_v9  ;;  %v269_v18 = vmax.f32 %v205_v10, 0.0 }
  0x3c   :  { %v270_v19 = vmax.f32 %v206_v11, 0.0  ;;  %v271_v20 = vmax.f32 %v207_v12, 0.0  ;;  %v211_v21 = vadd.f32 %v770_v2, %v140_v13  ;;  %v723_v23 = vpack.c.bf16 %v268_v14, %v268_v14 }
  0x3d   :  { %v272_v24 = vmax.f32 %v208_v15, 0.0  ;;  %v273_v25 = vmax.f32 %v209_v16, 0.0  ;;  %v274_v26 = vmax.f32 %v210_v17, 0.0  ;;  %v724_v30 = vpack.c.bf16 %v269_v18, %v269_v18 }
  0x3e   :  { %v725_v31 = vpack.c.bf16 %v270_v19, %v270_v19  ;;  %v726_v32 = vpack.c.bf16 %v271_v20, %v271_v20  ;;  %v275_v33 = vmax.f32 %v211_v21, 0.0  ;;  %589 = vst.msk [vmem:[%s1348_s3 + $0xc0] sm:$0xf] %vm540_vm0, %v723_v23  ;;  %v141_v40 = vmul.f32 %v765_v1, %v70_v22 }
  0x3f   :  { %v727_v37 = vpack.c.bf16 %v272_v24, %v272_v24  ;;  %v728_v38 = vpack.c.bf16 %v273_v25, %v273_v25  ;;  %v729_v39 = vpack.c.bf16 %v274_v26, %v274_v26  ;;  %590 = vst.msk [vmem:[%s1348_s3 + $0xc4] sm:$0xf] %vm540_vm0, %v724_v30  ;;  %v142_v43 = vmul.f32 %v765_v1, %v71_v27 }
  0x40   :  { %591 = vst.msk [vmem:[%s1348_s3 + $0xc8] sm:$0xf] %vm540_vm0, %v725_v31  ;;  %592 = vst.msk [vmem:[%s1348_s3 + $0xcc] sm:$0xf] %vm540_vm0, %v726_v32  ;;  %v730_v42 = vpack.c.bf16 %v275_v33, %v275_v33  ;;  %v143_v44 = vmul.f32 %v765_v1, %v72_v28  ;;  %v144_v45 = vmul.f32 %v765_v1, %v73_v29 }
  0x41   :  { %593 = vst.msk [vmem:[%s1348_s3 + $0xd0] sm:$0xf] %vm540_vm0, %v727_v37  ;;  %594 = vst.msk [vmem:[%s1348_s3 + $0xd4] sm:$0xf] %vm540_vm0, %v728_v38  ;;  %v212_v46 = vadd.f32 %v770_v2, %v141_v40  ;;  %v145_v47 = vmul.f32 %v765_v1, %v74_v34  ;;  %v146_v48 = vmul.f32 %v765_v1, %v75_v35 }
  0x42   :  { %595 = vst.msk [vmem:[%s1348_s3 + $0xd8] sm:$0xf] %vm540_vm0, %v729_v39  ;;  %v147_v49 = vmul.f32 %v765_v1, %v76_v36  ;;  %596 = vst.msk [vmem:[%s1348_s3 + $0xdc] sm:$0xf] %vm540_vm0, %v730_v42  ;;  %v213_v50 = vadd.f32 %v770_v2, %v142_v43  ;;  %v214_v51 = vadd.f32 %v770_v2, %v143_v44 }
  0x43   :  { %v215_v52 = vadd.f32 %v770_v2, %v144_v45  ;;  %v148_v53 = vmul.f32 %v765_v1, %v77_v41  ;;  %v276_v54 = vmax.f32 %v212_v46, 0.0  ;;  %v216_v55 = vadd.f32 %v770_v2, %v145_v47 }
  0x44   :  { %v217_v56 = vadd.f32 %v770_v2, %v146_v48  ;;  %v218_v57 = vadd.f32 %v770_v2, %v147_v49  ;;  %v277_v58 = vmax.f32 %v213_v50, 0.0  ;;  %v278_v59 = vmax.f32 %v214_v51, 0.0 }
  0x45   :  { %v279_v60 = vmax.f32 %v215_v52, 0.0  ;;  %v219_v61 = vadd.f32 %v770_v2, %v148_v53  ;;  %v731_v62 = vpack.c.bf16 %v276_v54, %v276_v54  ;;  %v280_v63 = vmax.f32 %v216_v55, 0.0 }
  0x46   :  { %v281_v0 = vmax.f32 %v217_v56, 0.0  ;;  %v282_v3 = vmax.f32 %v218_v57, 0.0  ;;  %v732_v4 = vpack.c.bf16 %v277_v58, %v277_v58  ;;  %v733_v5 = vpack.c.bf16 %v278_v59, %v278_v59 }
  0x47   :  { %v734_v6 = vpack.c.bf16 %v279_v60, %v279_v60  ;;  %v283_v1 = vmax.f32 %v219_v61, 0.0  ;;  %597 = vst.msk [vmem:[%s1348_s3 + $0xe0] sm:$0xf] %vm540_vm0, %v731_v62  ;;  %v735_v7 = vpack.c.bf16 %v280_v63, %v280_v63 }
  0x48   :  { %v736_v8 = vpack.c.bf16 %v281_v0, %v281_v0  ;;  %v737_v9 = vpack.c.bf16 %v282_v3, %v282_v3  ;;  %598 = vst.msk [vmem:[%s1348_s3 + $0xe4] sm:$0xf] %vm540_vm0, %v732_v4  ;;  %599 = vst.msk [vmem:[%s1348_s3 + $0xe8] sm:$0xf] %vm540_vm0, %v733_v5 }
  0x49   :  { %600 = vst.msk [vmem:[%s1348_s3 + $0xec] sm:$0xf] %vm540_vm0, %v734_v6  ;;  %v738_v2 = vpack.c.bf16 %v283_v1, %v283_v1  ;;  %601 = vst.msk [vmem:[%s1348_s3 + $0xf0] sm:$0xf] %vm540_vm0, %v735_v7 }
  0x4a   :  { %602 = vst.msk [vmem:[%s1348_s3 + $0xf4] sm:$0xf] %vm540_vm0, %v736_v8  ;;  %603 = vst.msk [vmem:[%s1348_s3 + $0xf8] sm:$0xf] %vm540_vm0, %v737_v9 }
  0x4b   :  { %604 = vst.msk [vmem:[%s1348_s3 + $0xfc] sm:$0xf] %vm540_vm0, %v738_v2 }

// kernel: basic_block_forward.6
= control target key start
LH: loop header
LB: loop body
LE: loop exit
PB: predicated region body
PF: predicated region fallthrough
CT: control target
= control target key end

     0   :  { %s3526_s21 = smov 0   ;;  %s3959_s0 = inlined_call_operand.vmem [shape: bf16[8,9,9,128], index: 0, kind: input, shape index: {}]   ;;  %s3960_s1 = inlined_call_operand.vmem [shape: bf16[9,128,128], index: 1, kind: input, shape index: {}]   ;;  %s3961_s2 = inlined_call_operand.vmem [shape: bf16[2,8,8,128], index: 2, kind: input, shape index: {}]   ;;  %s3962_s3 = inlined_call_operand.vmem [shape: bf16[128,128], index: 3, kind: input, shape index: {}]   ;;  %s3963_s4 = inlined_call_operand.vmem [shape: bf16[2,8,8,128], index: 4, kind: output, shape index: {0}]   ;;  %s3964_s5 = inlined_call_operand.vmem [shape: bf16[2,8,8,128], index: 5, kind: output, shape index: {1}]   ;;  %s3965_s6 = inlined_call_operand.vmem [shape: f32[2,8,128], index: 6, kind: output, shape index: {2}]  }
   0x1 LB: > { %s3532_s22 = sadd.s32 4294967295, %s3488_s21   ;;  %p2559_p0 = scmp.ge.s32.totalorder %s3488_s21, 1  ;;  %s3488_s21 = sphi %s3526_s21, %s17_s21  }
   0x2   : > { %p229_p1 = scmp.lt.s32.totalorder %s3488_s21, 3 }
   0x4   : > { %p230_p2 = pnand %p2559_p0, %p229_p1 }
   0x5   : > { %v3374_v0 = vld [vmem:[%s3960_s1 + $0x40] sm:$0xff] (!%p230_p2)   ;;  %s2560_s25 = sshll.u32 (!%p230_p2), %s3532_s22, 2  ;;  %v3376_v2 = vld [vmem:[%s3960_s1 + $0x48] sm:$0xff] (!%p230_p2)   ;;  %v3378_v4 = vld [vmem:[%s3960_s1 + $0x50] sm:$0xff] (!%p230_p2)   ;;  %vm641_vm0 = vsmask.f32 (!%p230_p2), 3328 }
   0x6   : > { %233 = sbr.rel (%p230_p2) target bundleno = 413 (0x19d), region = 36  ;;  %v3375_v1 = vld [vmem:[%s3960_s1 + $0x100] sm:$0xff] (!%p230_p2)   ;;  %p275_p3 = scmp.lt.s32.totalorder (!%p230_p2), %s2560_s25, 7  ;;  %3060 = vmatprep.subr.bf16.mxu1 (!%p230_p2), %v3374_v0  ;;  %v3377_v3 = vld [vmem:[%s3960_s1 + $0x108] sm:$0xff] (!%p230_p2)   ;;  %v3379_v5 = vld [vmem:[%s3960_s1 + $0x110] sm:$0xff] (!%p230_p2)  }
   0x7   : > { %3156 = vmatprep.subr.bf16.mxu0 (!%p230_p2), %v3375_v1  ;;  %3061 = vmatpush3.bf16.msra.mxu1 (!%p230_p2), %v3374_v0  ;;  %v3380_v6 = vld [vmem:[%s3960_s1 + $0x58] sm:$0xff] (!%p230_p2)   ;;  %v3382_v8 = vld [vmem:[%s3960_s1 + $0x60] sm:$0xff] (!%p230_p2)   ;;  %v3384_v10 = vld [vmem:[%s3960_s1 + $0x68] sm:$0xff] (!%p230_p2)   ;;  %vm642_vm1 = vsmask.f32 (!%p230_p2), 7440  ;;  %p281_p4 = scmp.lt.s32.totalorder (!%p230_p2), %s3532_s22, 1 }
   0x8   : > { %3157 = vmatpush3.bf16.msra.mxu0 (!%p230_p2), %v3375_v1  ;;  %3062 = vmatprep.subr.bf16.mxu1 (!%p230_p2), %v3376_v2  ;;  %v3381_v7 = vld [vmem:[%s3960_s1 + $0x118] sm:$0xff] (!%p230_p2)   ;;  %v3383_v9 = vld [vmem:[%s3960_s1 + $0x120] sm:$0xff] (!%p230_p2)   ;;  %v3385_v12 = vld [vmem:[%s3960_s1 + $0x128] sm:$0xff] (!%p230_p2)  }
   0x9   : > { %3158 = vmatprep.subr.bf16.mxu0 (!%p230_p2), %v3377_v3  ;;  %v3386_v14 = vld [vmem:[%s3960_s1 + $0x70] sm:$0xff] (!%p230_p2)   ;;  %v3388_v16 = vld [vmem:[%s3960_s1 + $0x78] sm:$0xff] (!%p230_p2)   ;;  %v3391_v18 = vld [vmem:[%s3960_s1] sm:$0xff] (!%p230_p2)  }
   0xa   : > { %v3387_v15 = vld [vmem:[%s3960_s1 + $0x130] sm:$0xff] (!%p230_p2)   ;;  %v3389_v17 = vld [vmem:[%s3960_s1 + $0x138] sm:$0xff] (!%p230_p2)   ;;  %v3393_v19 = vld [vmem:[%s3960_s1 + $0x140] sm:$0xff] (!%p230_p2)  }
   0xb   : > { %3063 = vmatpush3.bf16.msra.mxu1 (!%p230_p2), %v3376_v2  ;;  %v3396_v22 = vld [vmem:[%s3960_s1 + $0x8] sm:$0xff] (!%p230_p2)   ;;  %v3398_v26 = vld [vmem:[%s3960_s1 + $0x10] sm:$0xff] (!%p230_p2)   ;;  %v3400_v28 = vld [vmem:[%s3960_s1 + $0x18] sm:$0xff] (!%p230_p2)  }
   0xc   : > { %3159 = vmatpush3.bf16.msra.mxu0 (!%p230_p2), %v3377_v3  ;;  %3064 = vmatprep.subr.bf16.mxu1 (!%p230_p2), %v3378_v4  ;;  %v3397_v23 = vld [vmem:[%s3960_s1 + $0x148] sm:$0xff] (!%p230_p2)   ;;  %v3399_v27 = vld [vmem:[%s3960_s1 + $0x150] sm:$0xff] (!%p230_p2)   ;;  %v3401_v31 = vld [vmem:[%s3960_s1 + $0x158] sm:$0xff] (!%p230_p2)  }
   0xd   : > { %s3969_s25 = smov (!%p275_p3, %s2560_s25), 7  ;;  %3160 = vmatprep.subr.bf16.mxu0 %v3379_v5  ;;  %v3402_v38 = vld [vmem:[%s3960_s1 + $0x20] sm:$0xff]   ;;  %v3404_v47 = vld [vmem:[%s3960_s1 + $0x28] sm:$0xff]   ;;  %vm3641_vm2 = vmor %vm641_vm0, %vm642_vm1  ;;  %s3971_s22 = smov (!%p281_p4, %s3532_s22), 1 }
   0xe   : > { %s3364_s16 = smul.u32 72, %s3969_s25  ;;  %v3403_v43 = vld [vmem:[%s3960_s1 + $0x160] sm:$0xff]   ;;  %v3405_v50 = vld [vmem:[%s3960_s1 + $0x168] sm:$0xff]   ;;  %v3407_v2 = vld [vmem:[%s3960_s1 + $0x30] sm:$0xff]   ;;  %s3841_s13 = sshll.u32 %s3971_s22, 5 }
   0xf   : > { %3065 = vmatpush3.bf16.msra.mxu1 %v3378_v4  ;;  %s3856_s18 = scalar_lea.vmem %s3961_s2, %s3841_s13  ;;  %s3936_s28 = scalar_lea.vmem %s3964_s5, %s3841_s13 }
  0x10   : > { %3161 = vmatpush3.bf16.msra.mxu0 %v3379_v5  ;;  %3066 = vmatprep.subr.bf16.mxu1 %v3380_v6  ;;  %s3570_s26 = scalar_lea.vmem %s3959_s0, %s3364_s16  ;;  %s3942_s7 = scalar_lea.vmem %s3963_s4, %s3841_s13 }
  0x11   : > { %3162 = vmatprep.subr.bf16.mxu0 %v3381_v7  ;;  %v3390_v11 = vld [vmem:[%s3570_s26 + $0x48] ss:$8 sps:$4 sm:$0xff]   ;;  %v3392_v13 = vld [vmem:[%s3570_s26 + $0xd8] ss:$8 sps:$4 sm:$0xff]   ;;  %v2718_v34 = vld [vmem:[%s3570_s26 + $0x94] sm:$0x1] }
  0x12   : > { %3076 = vmatprep.mubr.bf16.mxu1 %v3390_v11  ;;  %3172 = vmatprep.mubr.bf16.mxu0 %v3392_v13  ;;  %v3394_v20 = vld [vmem:[%s3570_s26 + $0x58] ss:$8 sps:$4 sm:$0xff]   ;;  %v3395_v21 = vld [vmem:[%s3570_s26 + $0xe8] ss:$8 sps:$4 sm:$0xff]   ;;  %v2720_v39 = vld [vmem:[%s3570_s26 + $0x9c] sm:$0x1] }
  0x13   : > { %3067 = vmatpush3.bf16.msra.mxu1 %v3380_v6  ;;  %v3406_v24 = vld [vmem:[%s3570_s26 + $0x68] ss:$8 sps:$4 sm:$0xff]   ;;  %v3408_v25 = vld [vmem:[%s3570_s26 + $0xf8] ss:$8 sps:$4 sm:$0xff]   ;;  %v1278_v40 = vshll.u32 %v2718_v34, 16  ;;  %v1292_v46 = vshll.u32 %v2720_v39, 16 }
  0x14   : > { %3163 = vmatpush3.bf16.msra.mxu0 %v3381_v7  ;;  %3068 = vmatprep.subr.bf16.mxu1 %v3382_v8  ;;  %v3410_v29 = vld [vmem:[%s3570_s26 + $0x78] ss:$8 sps:$4 sm:$0xff]   ;;  %v3411_v30 = vld [vmem:[%s3570_s26 + $0x108] ss:$8 sps:$4 sm:$0xff]   ;;  %v2722_v57 = vld [vmem:[%s3570_s26 + $0xa4] sm:$0x1] }
  0x15   : > { %3164 = vmatprep.subr.bf16.mxu0 %v3383_v9  ;;  %v3414_v32 = vld [vmem:[%s3570_s26] ss:$8 sps:$4 sm:$0xff]   ;;  %v2717_v33 = vld [vmem:[%s3570_s26 + $0x90] sm:$0xf]  ;;  %v2719_v35 = vld [vmem:[%s3570_s26 + $0x98] sm:$0xf] }
  0x16   : > { %v1269_v36 = vshrl.u32 %v2717_v33, 16  ;;  %v1272_v37 = vshll.u32 %v2717_v33, 16  ;;  %v1283_v41 = vshrl.u32 %v2719_v35, 16  ;;  %v1286_v42 = vshll.u32 %v2719_v35, 16  ;;  %v2721_v56 = vld [vmem:[%s3570_s26 + $0xa0] sm:$0xf] }
  0x17   : > { %3069 = vmatpush3.bf16.msra.mxu1 %v3382_v8  ;;  %v1280_v52 = vrot.slane %v1278_v40, 5  ;;  %v1294_v55 = vrot.slane %v1292_v46, 5  ;;  %v2723_v59 = vld [vmem:[%s3570_s26 + $0xa8] sm:$0xf]  ;;  %v2724_v60 = vld [vmem:[%s3570_s26 + $0xac] sm:$0x1] }
  0x18   : > { %3165 = vmatpush3.bf16.msra.mxu0 %v3383_v9  ;;  %3070 = vmatprep.subr.bf16.mxu1 %v3384_v10  ;;  %v1271_v44 = vrot.slane %v1269_v36, 4  ;;  %v1274_v45 = vrot.slane %v1272_v37, 5  ;;  %v1285_v48 = vrot.slane %v1283_v41, 4  ;;  %v1288_v49 = vrot.slane %v1286_v42, 5  ;;  %v3409_v6 = vld [vmem:[%s3960_s1 + $0x170] sm:$0xff]  }
  0x19   : > { %3166 = vmatprep.subr.bf16.mxu0 %v3385_v12  ;;  %v1297_v61 = vshrl.u32 %v2721_v56, 16  ;;  %v1300_v63 = vshll.u32 %v2721_v56, 16  ;;  %v1306_v0 = vshll.u32 %v2722_v57, 16  ;;  %v1311_v1 = vshrl.u32 %v2723_v59, 16  ;;  %v3428_v37 = vld [vmem:[%s3570_s26 + $0x20] ss:$8 sps:$4 sm:$0xff]  }
  0x1a   : > { %v1275_v51 = vor.u32 %v1274_v45, %v1271_v44  ;;  %v1289_v54 = vor.u32 %v1288_v49, %v1285_v48  ;;  %v1314_v5 = vshll.u32 %v2723_v59, 16  ;;  %v3431_v48 = vld [vmem:[%s3570_s26 + $0x30] ss:$8 sps:$4 sm:$0xff]   ;;  %v2729_v49 = vld [vmem:[%s3570_s26 + $0xc0] sm:$0xf] }
  0x1b   : > { %3071 = vmatpush3.bf16.msra.mxu1 %v3384_v10  ;;  %v1299_v4 = vrot.slane %v1297_v61, 4  ;;  %v1302_v8 = vrot.slane %v1300_v63, 5  ;;  %v1313_v9 = vrot.slane %v1311_v1, 4  ;;  %v1320_v10 = vshll.u32 %v2724_v60, 16  ;;  %v3422_v59 = vld [vmem:[%s3960_s1 + $0x98] sm:$0xff]  }
  0x1c   : > { %3167 = vmatpush3.bf16.msra.mxu0 %v3385_v12  ;;  %3072 = vmatprep.subr.bf16.mxu1 %v3386_v14  ;;  %v1276_v58 = vrot.slane %v1275_v51, 4  ;;  %v1290_v62 = vrot.slane %v1289_v54, 4  ;;  %v1308_v12 = vrot.slane %v1306_v0, 5  ;;  %v1316_v13 = vrot.slane %v1314_v5, 5  ;;  %v2731_v51 = vld [vmem:[%s3570_s26 + $0xc8] sm:$0xf] }
  0x1d   : > { %3168 = vmatprep.subr.bf16.mxu0 %v3387_v15  ;;  %v1353_v56 = vshrl.u32 %v2729_v49, 16  ;;  %v1356_v57 = vshll.u32 %v2729_v49, 16  ;;  %v1367_v61 = vshrl.u32 %v2731_v51, 16 }
  0x1e   : > { %v1281_v3 = vsel %vm3641_vm2, %v1276_v58, %v1280_v52  ;;  %v1295_v7 = vsel %vm3641_vm2, %v1290_v62, %v1294_v55  ;;  %v3421_v52 = vld [vmem:[%s3960_s1 + $0x190] sm:$0xff]   ;;  %v2732_v55 = vld [vmem:[%s3570_s26 + $0xcc] sm:$0x1]  ;;  %v1370_v62 = vshll.u32 %v2731_v51, 16 }
  0x1f   : > { %3073 = vmatpush3.bf16.msra.mxu1 %v3386_v14  ;;  %v2749_v11 = vcombine.low %v1281_v3, %v1295_v7  ;;  %v3412_v14 = vld [vmem:[%s3960_s1 + $0x38] sm:$0xff]   ;;  %v1376_v63 = vshll.u32 %v2732_v55, 16  ;;  %v1355_v1 = vrot.slane %v1353_v56, 4 }
  0x20   : > { %3169 = vmatpush3.bf16.msra.mxu0 %v3387_v15  ;;  %3074 = vmatprep.subr.bf16.mxu1 %v3388_v16  ;;  %v1303_v15 = vor.u32 %v1302_v8, %v1299_v4  ;;  %v3423_v4 = vld [vmem:[%s3960_s1 + $0x198] sm:$0xff]   ;;  %v1372_v7 = vrot.slane %v1370_v62, 5 }
  0x21   : > { %3170 = vmatprep.subr.bf16.mxu0 %v3389_v17  ;;  %v1378_v8 = vrot.slane %v1376_v63, 5 }
  0x23   : > { %3075 = vmatpush3.bf16.msra.mxu1 %v3388_v16  ;;  %v1317_v16 = vor.u32 %v1316_v13, %v1313_v9  ;;  %v3424_v13 = vld [vmem:[%s3960_s1 + $0xa0] sm:$0xff]  }
  0x24   : > { %3171 = vmatpush3.bf16.msra.mxu0 %v3389_v17  ;;  %3084 = vmatprep.subr.bf16.mxu1 %v3391_v18  ;;  %v1304_v17 = vrot.slane %v1303_v15, 4 }
  0x25   : > { %3180 = vmatprep.subr.bf16.mxu0 %v3393_v19 }
  0x26   : > { %3077 = vmatmul.mubr.bf16.vlgmr.msra.gmra.mrb[0].mxu1 %v3394_v20  ;;  %v1318_v20 = vrot.slane %v1317_v16, 4  ;;  %v627_v16 = vld [vmem:[%s3570_s26 + $0x8] sm:$0xf] }
  0x27   : > { %3085 = vmatpush3.bf16.msra.mxu1 %v3391_v18  ;;  %3173 = vmatmul.mubr.bf16.vlgmr.msra.gmra.mrb[0].mxu0 %v3395_v21  ;;  %v1322_v18 = vrot.slane %v1320_v10, 5  ;;  %v3415_v21 = vld [vmem:[%s3960_s1 + $0x80] sm:$0xff]  }
  0x28   : > { %3181 = vmatpush3.bf16.msra.mxu0 %v3393_v19  ;;  %3086 = vmatprep.subr.bf16.mxu1 %v3396_v22  ;;  %v3413_v19 = vld [vmem:[%s3960_s1 + $0x178] sm:$0xff]  }
  0x29   : > { %3182 = vmatprep.subr.bf16.mxu0 %v3397_v23  ;;  %3080 = vmatprep.mubr.bf16.mxu1 %v3406_v24  ;;  %v3416_v24 = vld [vmem:[%s3960_s1 + $0x180] sm:$0xff]  }
  0x2a   : > { %3176 = vmatprep.mubr.bf16.mxu0 %v3408_v25  ;;  %v3417_v25 = vld [vmem:[%s3570_s26 + $0x10] ss:$8 sps:$4 sm:$0xff]  }
  0x2b   : > { %3087 = vmatpush3.bf16.msra.mxu1 %v3396_v22  ;;  %v1309_v22 = vsel %vm3641_vm2, %v1304_v17, %v1308_v12  ;;  %v626_v12 = vld [vmem:[%s3570_s26 + $0x4] sm:$0x1]  ;;  %v628_v17 = vld [vmem:[%s3570_s26 + $0xc] sm:$0x1] }
  0x2c   : > { %3183 = vmatpush3.bf16.msra.mxu0 %v3397_v23  ;;  %3088 = vmatprep.subr.bf16.mxu1 %v3398_v26  ;;  %v1323_v23 = vsel %vm3641_vm2, %v1318_v20, %v1322_v18 }
  0x2d   : > { %3184 = vmatprep.subr.bf16.mxu0 %v3399_v27 }
  0x2e   : > { %3081 = vmatmul.mubr.bf16.gmra.mrb[4].mxu1 %v3410_v29  ;;  %v3419_v29 = vld [vmem:[%s3960_s1 + $0x188] sm:$0xff]  }
  0x2f   : > { %3089 = vmatpush3.bf16.msra.mxu1 %v3398_v26  ;;  %3177 = vmatmul.mubr.bf16.gmra.mrb[4].mxu0 %v3411_v30  ;;  %v3418_v26 = vld [vmem:[%s3960_s1 + $0x88] sm:$0xff]   ;;  %v2726_v30 = vld [vmem:[%s3570_s26 + $0xb4] sm:$0x1] }
  0x30   : > { %3185 = vmatpush3.bf16.msra.mxu0 %v3399_v27  ;;  %3090 = vmatprep.subr.bf16.mxu1 %v3400_v28  ;;  %v2725_v27 = vld [vmem:[%s3570_s26 + $0xb0] sm:$0xf]  ;;  %v1334_v35 = vshll.u32 %v2726_v30, 16 }
  0x31   : > { %3186 = vmatprep.subr.bf16.mxu0 %v3401_v31  ;;  %3100 = vmatprep.mubr.bf16.mxu1 %v3414_v32  ;;  %v2728_v32 = vld [vmem:[%s3570_s26 + $0xbc] sm:$0x1]  ;;  %v1325_v33 = vshrl.u32 %v2725_v27, 16  ;;  %v1328_v34 = vshll.u32 %v2725_v27, 16  ;;  %v668_v27 = vshll.u32 %v628_v17, 16 }
  0x32   : > { %3196 = vmatprep.mubr.bf16.mxu0 %v2749_v11  ;;  %v1348_v39 = vshll.u32 %v2728_v32, 16  ;;  %v1336_v44 = vrot.slane %v1334_v35, 5  ;;  %v625_v11 = vld [vmem:[%s3570_s26] sm:$0xf]  ;;  %v3426_v32 = vld [vmem:[%s3960_s1 + $0xa8] sm:$0xff]  }
  0x33   : > { %3091 = vmatpush3.bf16.msra.mxu1 %v3400_v28  ;;  %v2750_v28 = vcombine.low %v1309_v22, %v1323_v23  ;;  %v1327_v40 = vrot.slane %v1325_v33, 4  ;;  %v1330_v41 = vrot.slane %v1328_v34, 5  ;;  %v645_v18 = vshrl.u32 %v625_v11, 16  ;;  %v636_v17 = vld [vmem:[%s3570_s26 + $0x2c] sm:$0x1] }
  0x34   : > { %3187 = vmatpush3.bf16.msra.mxu0 %v3401_v31  ;;  %3092 = vmatprep.subr.bf16.mxu1 %v3402_v38  ;;  %v2727_v31 = vld [vmem:[%s3570_s26 + $0xb8] sm:$0xf]  ;;  %v1350_v46 = vrot.slane %v1348_v39, 5  ;;  %v659_v22 = vshrl.u32 %v627_v16, 16  ;;  %v662_v23 = vshll.u32 %v627_v16, 16 }
  0x35   : > { %3188 = vmatprep.subr.bf16.mxu0 %v3403_v43  ;;  %v1339_v36 = vshrl.u32 %v2727_v31, 16  ;;  %v635_v16 = vld [vmem:[%s3570_s26 + $0x28] sm:$0xf] }
  0x36   : > { %v661_v30 = vrot.slane %v659_v22, 4  ;;  %v715_v22 = vshrl.u32 %v635_v16, 16 }
  0x37   : > { %3093 = vmatpush3.bf16.msra.mxu1 %v3402_v38  ;;  %v1342_v38 = vshll.u32 %v2727_v31, 16  ;;  %v1341_v42 = vrot.slane %v1339_v36, 4  ;;  %v664_v31 = vrot.slane %v662_v23, 5  ;;  %v670_v36 = vrot.slane %v668_v27, 5  ;;  %v637_v23 = vld [vmem:[%s3570_s26 + $0x30] sm:$0xf] }
  0x38   : > { %3189 = vmatpush3.bf16.msra.mxu0 %v3403_v43  ;;  %3094 = vmatprep.subr.bf16.mxu1 %v3404_v47  ;;  %v3420_v43 = vld [vmem:[%s3960_s1 + $0x90] sm:$0xff]   ;;  %v639_v27 = vld [vmem:[%s3570_s26 + $0x38] sm:$0xf] }
  0x39   : > { %3190 = vmatprep.subr.bf16.mxu0 %v3405_v50  ;;  %v1344_v45 = vrot.slane %v1342_v38, 5  ;;  %v3427_v38 = vld [vmem:[%s3960_s1 + $0x1a8] sm:$0xff]  }
  0x3b   : > { %3095 = vmatpush3.bf16.msra.mxu1 %v3404_v47  ;;  %v1331_v47 = vor.u32 %v1330_v41, %v1327_v40  ;;  %v1345_v54 = vor.u32 %v1344_v45, %v1341_v42  ;;  %v665_v40 = vor.u32 %v664_v31, %v661_v30  ;;  %v629_v41 = vld [vmem:[%s3570_s26 + $0x10] sm:$0xf]  ;;  %v717_v31 = vrot.slane %v715_v22, 4 }
  0x3c   : > { %3191 = vmatpush3.bf16.msra.mxu0 %v3405_v50  ;;  %3096 = vmatprep.subr.bf16.mxu1 %v3407_v2  ;;  %v2730_v50 = vld [vmem:[%s3570_s26 + $0xc4] sm:$0x1]  ;;  %v673_v45 = vshrl.u32 %v629_v41, 16  ;;  %v3472_v22 = vld [vmem:[%s3570_s26 + $0x70] ss:$8 sps:$4 sm:$0xff]  }
  0x3d   : > { %3192 = vmatprep.subr.bf16.mxu0 %v3409_v6  ;;  %v1362_v58 = vshll.u32 %v2730_v50, 16  ;;  %v1332_v60 = vrot.slane %v1331_v47, 4  ;;  %v1346_v0 = vrot.slane %v1345_v54, 4  ;;  %v632_v47 = vld [vmem:[%s3570_s26 + $0x1c] sm:$0x1] }
  0x3f   : > { %3097 = vmatpush3.bf16.msra.mxu1 %v3407_v2  ;;  %v1358_v2 = vrot.slane %v1356_v57, 5  ;;  %v1364_v3 = vrot.slane %v1362_v58, 5  ;;  %v1337_v5 = vsel %vm3641_vm2, %v1332_v60, %v1336_v44  ;;  %v1351_v9 = vsel %vm3641_vm2, %v1346_v0, %v1350_v46  ;;  %v631_v44 = vld [vmem:[%s3570_s26 + $0x18] sm:$0xf]  ;;  %v3430_v60 = vld [vmem:[%s3960_s1 + $0x1b0] sm:$0xff]  }
  0x40   : > { %3193 = vmatpush3.bf16.msra.mxu0 %v3409_v6  ;;  %3098 = vmatprep.subr.bf16.mxu1 %v3412_v14  ;;  %v1369_v6 = vrot.slane %v1367_v61, 4  ;;  %v666_v46 = vrot.slane %v665_v40, 4  ;;  %v687_v50 = vshrl.u32 %v631_v44, 16  ;;  %v690_v54 = vshll.u32 %v631_v44, 16 }
  0x41   : > { %3194 = vmatprep.subr.bf16.mxu0 %v3413_v19  ;;  %v1359_v10 = vor.u32 %v1358_v2, %v1355_v1  ;;  %v696_v58 = vshll.u32 %v632_v47, 16  ;;  %v743_v40 = vshrl.u32 %v639_v27, 16 }
  0x42   : > { %v1373_v15 = vor.u32 %v1372_v7, %v1369_v6  ;;  %v671_v55 = vsel %vm3641_vm2, %v666_v46, %v670_v36  ;;  %v689_v57 = vrot.slane %v687_v50, 4  ;;  %v692_v63 = vrot.slane %v690_v54, 5  ;;  %v3433_v6 = vld [vmem:[%s3960_s1 + $0x1b8] sm:$0xff]   ;;  %v3434_v7 = vld [vmem:[%s3960_s1 + $0xc0] sm:$0xff]  }
  0x43   : > { %3099 = vmatpush3.bf16.msra.mxu1 %v3412_v14  ;;  %v2751_v14 = vcombine.low %v1337_v5, %v1351_v9  ;;  %v1360_v20 = vrot.slane %v1359_v10, 4  ;;  %v3436_v10 = vld [vmem:[%s3960_s1 + $0x1c0] sm:$0xff]   ;;  %v732_v36 = vshll.u32 %v637_v23, 16 }
  0x44   : > { %3195 = vmatpush3.bf16.msra.mxu0 %v3413_v19  ;;  %3108 = vmatprep.subr.bf16.mxu1 %v3415_v21  ;;  %v648_v19 = vshll.u32 %v625_v11, 16  ;;  %v693_v1 = vor.u32 %v692_v63, %v689_v57  ;;  %v3437_v11 = vld [vmem:[%s3570_s26 + $0x18] ss:$8 sps:$4 sm:$0xff]  }
  0x45   : > { %3204 = vmatprep.subr.bf16.mxu0 %v3416_v24 }
  0x46   : > { %3101 = vmatmul.mubr.bf16.vlgmr.msra.gmra.mrb[0].mxu1 %v3417_v25  ;;  %v647_v25 = vrot.slane %v645_v18, 4  ;;  %v694_v5 = vrot.slane %v693_v1, 4  ;;  %v3439_v18 = vld [vmem:[%s3960_s1 + $0x1c8] sm:$0xff]   ;;  %v3444_v1 = vld [vmem:[%s3960_s1 + $0xe0] sm:$0xff]  }
  0x47   : > { %3109 = vmatpush3.bf16.msra.mxu1 %v3415_v21  ;;  %3197 = vmatmul.mubr.bf16.vlgmr.msra.gmra.mrb[0].mxu0 %v2750_v28  ;;  %v654_v21 = vshll.u32 %v626_v12, 16  ;;  %v3425_v28 = vld [vmem:[%s3960_s1 + $0x1a0] sm:$0xff]  }
  0x48   : > { %3205 = vmatpush3.bf16.msra.mxu0 %v3416_v24  ;;  %3110 = vmatprep.subr.bf16.mxu1 %v3418_v26  ;;  %v1374_v24 = vrot.slane %v1373_v15, 4  ;;  %v633_v12 = vld [vmem:[%s3570_s26 + $0x20] sm:$0xf]  ;;  %v634_v15 = vld [vmem:[%s3570_s26 + $0x24] sm:$0x1] }
  0x49   : > { %3206 = vmatprep.subr.bf16.mxu0 %v3419_v29  ;;  %3104 = vmatprep.mubr.bf16.mxu1 %v3428_v37  ;;  %v656_v35 = vrot.slane %v654_v21, 5  ;;  %v3435_v37 = vld [vmem:[%s3570_s26 + $0x8] ss:$8 sps:$4 sm:$0xff]   ;;  %v710_v21 = vshll.u32 %v634_v15, 16  ;;  %v3458_v15 = vld [vmem:[%s3962_s3] sm:$0xff]  }
  0x4a   : > { %3200 = vmatprep.mubr.bf16.mxu0 %v2751_v14  ;;  %v1379_v33 = vsel %vm3641_vm2, %v1374_v24, %v1378_v8  ;;  %v3438_v14 = vld [vmem:[%s3960_s1 + $0xc8] sm:$0xff]   ;;  %v718_v24 = vshll.u32 %v635_v16, 16  ;;  %v3457_v16 = vld [vmem:[%s3960_s1 + $0x200] sm:$0xff]  }
  0x4b   : > { %3111 = vmatpush3.bf16.msra.mxu1 %v3418_v26  ;;  %v650_v26 = vrot.slane %v648_v19, 5  ;;  %v701_v19 = vshrl.u32 %v633_v12, 16  ;;  %v712_v30 = vrot.slane %v710_v21, 5  ;;  %v3465_v21 = vld [vmem:[%s3962_s3 + $0x10] sm:$0xff]  }
  0x4c   : > { %3207 = vmatpush3.bf16.msra.mxu0 %v3419_v29  ;;  %3112 = vmatprep.subr.bf16.mxu1 %v3420_v43  ;;  %v1365_v29 = vsel %vm3641_vm2, %v1360_v20, %v1364_v3  ;;  %v698_v3 = vrot.slane %v696_v58, 5  ;;  %v704_v20 = vshll.u32 %v633_v12, 16  ;;  %v3442_v58 = vld [vmem:[%s3960_s1 + $0xd8] sm:$0xff]  }
  0x4d   : > { %3208 = vmatprep.subr.bf16.mxu0 %v3421_v52  ;;  %v651_v34 = vor.u32 %v650_v26, %v647_v25  ;;  %v2752_v39 = vcombine.low %v1365_v29, %v1379_v33  ;;  %v724_v25 = vshll.u32 %v636_v17, 16  ;;  %v638_v26 = vld [vmem:[%s3570_s26 + $0x34] sm:$0x1]  ;;  %v720_v33 = vrot.slane %v718_v24, 5  ;;  %v3452_v12 = vld [vmem:[%s3960_s1 + $0xf8] sm:$0xff]  }
  0x4e   : > { %3105 = vmatmul.mubr.bf16.gmra.mrb[4].mxu1 %v3431_v48  ;;  %v676_v48 = vshll.u32 %v629_v41, 16  ;;  %v699_v9 = vsel %vm3641_vm2, %v694_v5, %v698_v3  ;;  %v706_v29 = vrot.slane %v704_v20, 5  ;;  %v746_v41 = vshll.u32 %v639_v27, 16  ;;  %v3445_v5 = vld [vmem:[%s3960_s1 + $0x1e0] sm:$0xff]   ;;  %v3462_v20 = vld [vmem:[%s3570_s26 + $0xb0] ss:$8 sps:$4 sm:$0xff]  }
  0x4f   : > { %3113 = vmatpush3.bf16.msra.mxu1 %v3420_v43  ;;  %v652_v42 = vrot.slane %v651_v34, 4  ;;  %v630_v43 = vld [vmem:[%s3570_s26 + $0x14] sm:$0x1]  ;;  %3201 = vmatmul.mubr.bf16.gmra.mrb[4].mxu0 %v2752_v39  ;;  %v726_v34 = vrot.slane %v724_v25, 5  ;;  %v738_v39 = vshll.u32 %v638_v26, 16 }
  0x50   : > { %3209 = vmatpush3.bf16.msra.mxu0 %v3421_v52  ;;  %3114 = vmatprep.subr.bf16.mxu1 %v3422_v59  ;;  %v682_v49 = vshll.u32 %v630_v43, 16  ;;  %v675_v52 = vrot.slane %v673_v45, 4  ;;  %v678_v56 = vrot.slane %v676_v48, 5  ;;  %v721_v43 = vor.u32 %v720_v33, %v717_v31  ;;  %v3459_v17 = vld [vmem:[%s3570_s26 + $0x60] ss:$8 sps:$4 sm:$0xff]   ;;  %v3464_v33 = vld [vmem:[%s3960_s1 + $0x210] sm:$0xff]  }
  0x51   : > { %3210 = vmatprep.subr.bf16.mxu0 %v3423_v4  ;;  %v657_v51 = vsel %vm3641_vm2, %v652_v42, %v656_v35  ;;  %3220 = vmatprep.mubr.bf16.mxu0 %v3435_v37  ;;  %v729_v35 = vshrl.u32 %v637_v23, 16  ;;  %v3440_v37 = vld [vmem:[%s3960_s1 + $0xd0] sm:$0xff]   ;;  %v734_v45 = vrot.slane %v732_v36, 5  ;;  %v740_v48 = vrot.slane %v738_v39, 5  ;;  %v2833_v23 = vld [vmem:[%s3570_s26 + $0x8] sm:$0xf] }
  0x52   : > { %v2633_v61 = vcombine.low %v657_v51, %v671_v55  ;;  %v684_v62 = vrot.slane %v682_v49, 5  ;;  %v679_v0 = vor.u32 %v678_v56, %v675_v52  ;;  %v3441_v42 = vld [vmem:[%s3960_s1 + $0x1d0] sm:$0xff]   ;;  %v745_v49 = vrot.slane %v743_v40, 4  ;;  %v2834_v24 = vld [vmem:[%s3570_s26 + $0xc] sm:$0x1] }
  0x53   : > { %3115 = vmatpush3.bf16.msra.mxu1 %v3422_v59  ;;  %v3429_v59 = vld [vmem:[%s3960_s1 + $0xb0] sm:$0xff]   ;;  %v731_v44 = vrot.slane %v729_v35, 4  ;;  %v748_v50 = vrot.slane %v746_v41, 5  ;;  %v722_v51 = vrot.slane %v721_v43, 4  ;;  %v1893_v27 = vshrl.u32 %v2833_v23, 16  ;;  %v3467_v43 = vld [vmem:[%s3962_s3 + $0x18] sm:$0xff]  }
  0x54   : > { %3211 = vmatpush3.bf16.msra.mxu0 %v3423_v4  ;;  %3116 = vmatprep.subr.bf16.mxu1 %v3424_v13  ;;  %v680_v2 = vrot.slane %v679_v0, 4  ;;  %v3432_v4 = vld [vmem:[%s3960_s1 + $0xb8] sm:$0xff]   ;;  %v3449_v55 = vld [vmem:[%s3570_s26 + $0x28] ss:$8 sps:$4 sm:$0xff]   ;;  %v2836_v26 = vld [vmem:[%s3570_s26 + $0x14] sm:$0x1] }
  0x55   : > { %3212 = vmatprep.subr.bf16.mxu0 %v3425_v28  ;;  %3124 = vmatprep.mubr.bf16.mxu1 %v2633_v61  ;;  %v735_v52 = vor.u32 %v734_v45, %v731_v44  ;;  %v749_v57 = vor.u32 %v748_v50, %v745_v49  ;;  %v3451_v61 = vld [vmem:[%s3570_s26 + $0x38] ss:$8 sps:$4 sm:$0xff]   ;;  %v2835_v25 = vld [vmem:[%s3570_s26 + $0x10] sm:$0xf] }
  0x56   : > { %v685_v8 = vsel %vm3641_vm2, %v680_v2, %v684_v62  ;;  %v3443_v62 = vld [vmem:[%s3960_s1 + $0x1d8] sm:$0xff]   ;;  %v1910_v31 = vshll.u32 %v2835_v25, 16  ;;  %v3463_v36 = vld [vmem:[%s3570_s26 + $0xc0] ss:$8 sps:$4 sm:$0xff]  }
  0x57   : > { %3117 = vmatpush3.bf16.msra.mxu1 %v3424_v13  ;;  %v2634_v13 = vcombine.low %v685_v8, %v699_v9  ;;  %v750_v0 = vrot.slane %v749_v57, 4  ;;  %v3446_v8 = vld [vmem:[%s3960_s1 + $0xe8] sm:$0xff]   ;;  %v3478_v49 = vld [vmem:[%s3856_s18] sm:$0xff]  }
  0x58   : > { %3213 = vmatpush3.bf16.msra.mxu0 %v3425_v28  ;;  %3118 = vmatprep.subr.bf16.mxu1 %v3426_v32  ;;  %v703_v28 = vrot.slane %v701_v19, 4  ;;  %v3447_v9 = vld [vmem:[%s3960_s1 + $0x1e8] sm:$0xff]  }
  0x59   : > { %3214 = vmatprep.subr.bf16.mxu0 %v3427_v38  ;;  %v3461_v19 = vld [vmem:[%s3962_s3 + $0x8] sm:$0xff]  }
  0x5a   : > { %v3473_v39 = vld [vmem:[%s3570_s26 + $0x80] ss:$8 sps:$4 sm:$0xff]  }
  0x5b   : > { %3119 = vmatpush3.bf16.msra.mxu1 %v3426_v32  ;;  %v640_v32 = vld [vmem:[%s3570_s26 + $0x3c] sm:$0x1] }
  0x5c   : > { %3215 = vmatpush3.bf16.msra.mxu0 %v3427_v38  ;;  %3120 = vmatprep.subr.bf16.mxu1 %v3429_v59  ;;  %v707_v38 = vor.u32 %v706_v29, %v703_v28  ;;  %v752_v46 = vshll.u32 %v640_v32, 16  ;;  %v1896_v28 = vshll.u32 %v2833_v23, 16  ;;  %v1902_v29 = vshll.u32 %v2834_v24, 16  ;;  %v3475_v23 = vld [vmem:[%s3962_s3 + $0x30] sm:$0xff]  }
  0x5d   : > { %3216 = vmatprep.subr.bf16.mxu0 %v3430_v60  ;;  %v1916_v32 = vshll.u32 %v2836_v26, 16 }
  0x5e   : > { %v708_v47 = vrot.slane %v707_v38, 4  ;;  %v754_v54 = vrot.slane %v752_v46, 5  ;;  %v1898_v35 = vrot.slane %v1896_v28, 5  ;;  %v1912_v38 = vrot.slane %v1910_v31, 5  ;;  %v2839_v46 = vld [vmem:[%s3570_s26 + $0x20] sm:$0xf] }
  0x5f   : > { %3121 = vmatpush3.bf16.msra.mxu1 %v3429_v59  ;;  %v727_v59 = vsel %vm3641_vm2, %v722_v51, %v726_v34  ;;  %v1895_v34 = vrot.slane %v1893_v27, 4  ;;  %v1904_v41 = vrot.slane %v1902_v29, 5  ;;  %v1918_v45 = vrot.slane %v1916_v32, 5  ;;  %v3474_v28 = vld [vmem:[%s3960_s1 + $0x230] sm:$0xff]  }
  0x60   : > { %3217 = vmatpush3.bf16.msra.mxu0 %v3430_v60  ;;  %3122 = vmatprep.subr.bf16.mxu1 %v3432_v4  ;;  %v713_v56 = vsel %vm3641_vm2, %v708_v47, %v712_v30  ;;  %v736_v60 = vrot.slane %v735_v52, 4  ;;  %v755_v3 = vsel %vm3641_vm2, %v750_v0, %v754_v54  ;;  %v1907_v30 = vshrl.u32 %v2835_v25, 16  ;;  %v3466_v47 = vld [vmem:[%s3960_s1 + $0x218] sm:$0xff]   ;;  %v2841_v52 = vld [vmem:[%s3570_s26 + $0x28] sm:$0xf] }
  0x61   : > { %3218 = vmatprep.subr.bf16.mxu0 %v3433_v6  ;;  %v2635_v63 = vcombine.low %v713_v56, %v727_v59  ;;  %v1899_v40 = vor.u32 %v1898_v35, %v1895_v34  ;;  %v1935_v56 = vshrl.u32 %v2839_v46, 16  ;;  %v1938_v57 = vshll.u32 %v2839_v46, 16  ;;  %v3477_v34 = vld [vmem:[%s3962_s3 + $0x38] sm:$0xff]  }
  0x62   : > { %v741_v2 = vsel %vm3641_vm2, %v736_v60, %v740_v48  ;;  %v2843_v60 = vld [vmem:[%s3570_s26 + $0x30] sm:$0xf] }
  0x63   : > { %3123 = vmatpush3.bf16.msra.mxu1 %v3432_v4  ;;  %v3454_v4 = vld [vmem:[%s3570_s26 + $0x90] ss:$8 sps:$4 sm:$0xff]   ;;  %v1900_v48 = vrot.slane %v1899_v40, 4 }
  0x64   : > { %3219 = vmatpush3.bf16.msra.mxu0 %v3433_v6  ;;  %3132 = vmatprep.subr.bf16.mxu1 %v3434_v7  ;;  %v2636_v6 = vcombine.low %v741_v2, %v755_v3  ;;  %v3471_v2 = vld [vmem:[%s3962_s3 + $0x28] sm:$0xff]   ;;  %v1966_v3 = vshll.u32 %v2843_v60, 16 }
  0x65   : > { %3228 = vmatprep.subr.bf16.mxu0 %v3436_v10  ;;  %v1905_v54 = vsel %vm3641_vm2, %v1900_v48, %v1904_v41  ;;  %v2848_v48 = vld [vmem:[%s3570_s26 + $0x44] sm:$0x1] }
  0x66   : > { %3125 = vmatmul.mubr.bf16.vlgmr.msra.gmra.mrb[0].mxu1 %v2634_v13  ;;  %v3453_v13 = vld [vmem:[%s3960_s1 + $0x1f8] sm:$0xff]  }
  0x67   : > { %3133 = vmatpush3.bf16.msra.mxu1 %v3434_v7  ;;  %3221 = vmatmul.mubr.bf16.vlgmr.msra.gmra.mrb[0].mxu0 %v3437_v11  ;;  %v3456_v7 = vld [vmem:[%s3570_s26 + $0x50] ss:$8 sps:$4 sm:$0xff]  }
  0x68   : > { %3229 = vmatpush3.bf16.msra.mxu0 %v3436_v10  ;;  %3134 = vmatprep.subr.bf16.mxu1 %v3438_v14  ;;  %v3448_v10 = vld [vmem:[%s3960_s1 + $0xf0] sm:$0xff]  }
  0x69   : > { %3230 = vmatprep.subr.bf16.mxu0 %v3439_v18  ;;  %3224 = vmatprep.mubr.bf16.mxu0 %v3449_v55  ;;  %v3450_v11 = vld [vmem:[%s3960_s1 + $0x1f0] sm:$0xff]  }
  0x6a   : > { %3128 = vmatprep.mubr.bf16.mxu1 %v2635_v63  ;;  %v3468_v63 = vld [vmem:[%s3960_s1 + $0x220] sm:$0xff]  }
  0x6b   : > { %3135 = vmatpush3.bf16.msra.mxu1 %v3438_v14  ;;  %v3455_v14 = vld [vmem:[%s3570_s26 + $0xa0] ss:$8 sps:$4 sm:$0xff]  }
  0x6c   : > { %3231 = vmatpush3.bf16.msra.mxu0 %v3439_v18  ;;  %3136 = vmatprep.subr.bf16.mxu1 %v3440_v37  ;;  %v3460_v18 = vld [vmem:[%s3960_s1 + $0x208] sm:$0xff]  }
  0x6d   : > { %3232 = vmatprep.subr.bf16.mxu0 %v3441_v42 }
  0x6e   : > { %3129 = vmatmul.mubr.bf16.gmra.mrb[4].mxu1 %v2636_v6 }
  0x6f   : > { %3137 = vmatpush3.bf16.msra.mxu1 %v3440_v37  ;;  %3225 = vmatmul.mubr.bf16.gmra.mrb[4].mxu0 %v3451_v61  ;;  %v1909_v37 = vrot.slane %v1907_v30, 4  ;;  %v1949_v61 = vshrl.u32 %v2841_v52, 16 }
  0x70   : > { %3233 = vmatpush3.bf16.msra.mxu0 %v3441_v42  ;;  %3138 = vmatprep.subr.bf16.mxu1 %v3442_v58  ;;  %v2837_v42 = vld [vmem:[%s3570_s26 + $0x18] sm:$0xf] }
  0x71   : > { %3234 = vmatprep.subr.bf16.mxu0 %v3443_v62  ;;  %3148 = vmatprep.mubr.bf16.mxu1 %v3454_v4  ;;  %v1913_v44 = vor.u32 %v1912_v38, %v1909_v37  ;;  %v1921_v51 = vshrl.u32 %v2837_v42, 16  ;;  %v1924_v55 = vshll.u32 %v2837_v42, 16  ;;  %v3470_v4 = vld [vmem:[%s3960_s1 + $0x228] sm:$0xff]  }
  0x72   : > { %3244 = vmatprep.mubr.bf16.mxu0 %v3456_v7 }
  0x73   : > { %3139 = vmatpush3.bf16.msra.mxu1 %v3442_v58  ;;  %v1914_v50 = vrot.slane %v1913_v44, 4  ;;  %v3469_v58 = vld [vmem:[%s3962_s3 + $0x20] sm:$0xff]   ;;  %v1923_v6 = vrot.slane %v1921_v51, 4  ;;  %v1926_v7 = vrot.slane %v1924_v55, 5  ;;  %v2000_v55 = vshll.u32 %v2848_v48, 16 }
  0x74   : > { %3235 = vmatpush3.bf16.msra.mxu0 %v3443_v62  ;;  %3140 = vmatprep.subr.bf16.mxu1 %v3444_v1  ;;  %v1952_v62 = vshll.u32 %v2841_v52, 16 }
  0x75   : > { %3236 = vmatprep.subr.bf16.mxu0 %v3445_v5  ;;  %v1919_v59 = vsel %vm3641_vm2, %v1914_v50, %v1918_v45 }
  0x76   : > { %v2865_v0 = vcombine.low %v1905_v54, %v1919_v59 }
  0x77   : > { %3141 = vmatpush3.bf16.msra.mxu1 %v3444_v1  ;;  %v1963_v1 = vshrl.u32 %v2843_v60, 16  ;;  %v3480_v60 = vld [vmem:[%s3856_s18 + $0x10] sm:$0xff]  }
  0x78   : > { %3237 = vmatpush3.bf16.msra.mxu0 %v3445_v5  ;;  %3142 = vmatprep.subr.bf16.mxu1 %v3446_v8  ;;  %v2838_v5 = vld [vmem:[%s3570_s26 + $0x1c] sm:$0x1] }
  0x79   : > { %3238 = vmatprep.subr.bf16.mxu0 %v3447_v9 }
  0x7b   : > { %3143 = vmatpush3.bf16.msra.mxu1 %v3446_v8  ;;  %v1937_v8 = vrot.slane %v1935_v56, 4 }
  0x7c   : > { %3239 = vmatpush3.bf16.msra.mxu0 %v3447_v9  ;;  %3144 = vmatprep.subr.bf16.mxu1 %v3448_v10  ;;  %v1940_v9 = vrot.slane %v1938_v57, 5 }
  0x7d   : > { %3240 = vmatprep.subr.bf16.mxu0 %v3450_v11 }
  0x7f   : > { %3145 = vmatpush3.bf16.msra.mxu1 %v3448_v10  ;;  %v2840_v10 = vld [vmem:[%s3570_s26 + $0x24] sm:$0x1] }
  0x80   : > { %3241 = vmatpush3.bf16.msra.mxu0 %v3450_v11  ;;  %3146 = vmatprep.subr.bf16.mxu1 %v3452_v12  ;;  %v1951_v11 = vrot.slane %v1949_v61, 4 }
  0x81   : > { %3242 = vmatprep.subr.bf16.mxu0 %v3453_v13 }
  0x83   : > { %3147 = vmatpush3.bf16.msra.mxu1 %v3452_v12  ;;  %v1954_v12 = vrot.slane %v1952_v62, 5 }
  0x84   : > { %3243 = vmatpush3.bf16.msra.mxu0 %v3453_v13  ;;  %3276 = vmatprep.subr.bf16.mxu1 %v3458_v15  ;;  %v2845_v13 = vld [vmem:[%s3570_s26 + $0x38] sm:$0xf] }
  0x85   : > { %3252 = vmatprep.subr.bf16.mxu0 %v3457_v16  ;;  %v1977_v24 = vshrl.u32 %v2845_v13, 16  ;;  %v1980_v25 = vshll.u32 %v2845_v13, 16  ;;  %v1955_v29 = vor.u32 %v1954_v12, %v1951_v11 }
  0x86   : > { %3149 = vmatmul.mubr.bf16.vlgmr.msra.gmra.mrb[0].mxu1 %v3455_v14  ;;  %v1965_v14 = vrot.slane %v1963_v1, 4  ;;  %v2002_v1 = vrot.slane %v2000_v55, 5 }
  0x87   : > { %3245 = vmatmul.mubr.bf16.vlgmr.msra.gmra.mrb[0].mxu0 %v3459_v17  ;;  %3277 = vmatpush3.bf16.msra.mxu1 %v3458_v15  ;;  %v1968_v15 = vrot.slane %v1966_v3, 5  ;;  %v2842_v17 = vld [vmem:[%s3570_s26 + $0x2c] sm:$0x1]  ;;  %v1979_v40 = vrot.slane %v1977_v24, 4  ;;  %v1982_v41 = vrot.slane %v1980_v25, 5  ;;  %v1956_v44 = vrot.slane %v1955_v29, 4 }
  0x88   : > { %3253 = vmatpush3.bf16.msra.mxu0 %v3457_v16  ;;  %3278 = vmatprep.subr.bf16.mxu1 %v3461_v19  ;;  %v2847_v16 = vld [vmem:[%s3570_s26 + $0x40] sm:$0xf]  ;;  %v1958_v30 = vshll.u32 %v2842_v17, 16 }
  0x89   : > { %3254 = vmatprep.subr.bf16.mxu0 %v3460_v18  ;;  %3152 = vmatprep.mubr.bf16.mxu1 %v3462_v20  ;;  %v1930_v20 = vshll.u32 %v2838_v5, 16  ;;  %v1991_v26 = vshrl.u32 %v2847_v16, 16  ;;  %v1994_v27 = vshll.u32 %v2847_v16, 16  ;;  %v1969_v31 = vor.u32 %v1968_v15, %v1965_v14 }
  0x8a   : > { %3248 = vmatprep.mubr.bf16.mxu0 %v3472_v22  ;;  %v1944_v22 = vshll.u32 %v2840_v10, 16  ;;  %v1960_v45 = vrot.slane %v1958_v30, 5  ;;  %v1983_v52 = vor.u32 %v1982_v41, %v1979_v40 }
  0x8b   : > { %3279 = vmatpush3.bf16.msra.mxu1 %v3461_v19  ;;  %v1927_v19 = vor.u32 %v1926_v7, %v1923_v6  ;;  %v1993_v42 = vrot.slane %v1991_v26, 4  ;;  %v1970_v46 = vrot.slane %v1969_v31, 4  ;;  %v3490_v6 = vmov 0.0  }
  0x8c   : > { %3255 = vmatpush3.bf16.msra.mxu0 %v3460_v18  ;;  %3280 = vmatprep.subr.bf16.mxu1 %v3465_v21  ;;  %v2844_v18 = vld [vmem:[%s3570_s26 + $0x34] sm:$0x1]  ;;  %v1946_v38 = vrot.slane %v1944_v22, 5  ;;  %v1961_v56 = vsel %vm3641_vm2, %v1956_v44, %v1960_v45 }
  0x8d   : > { %3256 = vmatprep.subr.bf16.mxu0 %v3464_v33  ;;  %v1972_v32 = vshll.u32 %v2844_v18, 16  ;;  %v1928_v35 = vrot.slane %v1927_v19, 4 }
  0x8e   : > { %3153 = vmatmul.mubr.bf16.gmra.mrb[4].mxu1 %v3463_v36  ;;  %v1932_v36 = vrot.slane %v1930_v20, 5 }
  0x8f   : > { %3281 = vmatpush3.bf16.msra.mxu1 %v3465_v21  ;;  %3249 = vmatmul.mubr.bf16.gmra.mrb[4].mxu0 %v3473_v39  ;;  %v1941_v21 = vor.u32 %v1940_v9, %v1937_v8  ;;  %v2846_v39 = vld [vmem:[%s3570_s26 + $0x3c] sm:$0x1]  ;;  %s2568_s26 = sshll.u32 %s3971_s22, 3 }
  0x90   : > { %3257 = vmatpush3.bf16.msra.mxu0 %v3464_v33  ;;  %3282 = vmatprep.subr.bf16.mxu1 %v3467_v43  ;;  %v3476_v33 = vld [vmem:[%s3960_s1 + $0x238] sm:$0xff]   ;;  %v1986_v50 = vshll.u32 %v2846_v39, 16  ;;  %s3929_s27 = scalar_lea.vmem %s3965_s6, %s2568_s26 }
  0x91   : > { %3258 = vmatprep.subr.bf16.mxu0 %v3466_v47  ;;  %3292 = vmatprep.mubr.bf16.mxu1 %v3478_v49  ;;  %v1942_v37 = vrot.slane %v1941_v21, 4  ;;  %v1933_v49 = vsel %vm3641_vm2, %v1928_v35, %v1932_v36  ;;  %2423 = vst [vmem:[%s3929_s27 + $0x4] sm:$0xf] %v3490_v6 }
  0x92   : > { %3268 = vmatprep.mubr.bf16.mxu0 %v2865_v0  ;;  %v1988_v61 = vrot.slane %v1986_v50, 5 }
  0x93   : > { %3283 = vmatpush3.bf16.msra.mxu1 %v3467_v43  ;;  %v1996_v43 = vrot.slane %v1994_v27, 5  ;;  %v1947_v51 = vsel %vm3641_vm2, %v1942_v37, %v1946_v38 }
  0x94   : > { %3259 = vmatpush3.bf16.msra.mxu0 %v3466_v47  ;;  %3284 = vmatprep.subr.bf16.mxu1 %v3469_v58  ;;  %v1974_v47 = vrot.slane %v1972_v32, 5  ;;  %v2866_v59 = vcombine.low %v1933_v49, %v1947_v51 }
  0x95   : > { %3260 = vmatprep.subr.bf16.mxu0 %v3468_v63  ;;  %v1997_v54 = vor.u32 %v1996_v43, %v1993_v42 }
  0x96   : > { %v1975_v57 = vsel %vm3641_vm2, %v1970_v46, %v1974_v47 }
  0x97   : > { %3285 = vmatpush3.bf16.msra.mxu1 %v3469_v58  ;;  %v3479_v58 = vld [vmem:[%s3856_s18 + $0x8] sm:$0xff]   ;;  %v2867_v62 = vcombine.low %v1961_v56, %v1975_v57  ;;  %v1998_v0 = vrot.slane %v1997_v54, 4 }
  0x98   : > { %3261 = vmatpush3.bf16.msra.mxu0 %v3468_v63  ;;  %3286 = vmatprep.subr.bf16.mxu1 %v3471_v2  ;;  %v1984_v63 = vrot.slane %v1983_v52, 4 }
  0x99   : > { %3262 = vmatprep.subr.bf16.mxu0 %v3470_v4  ;;  %v2003_v3 = vsel %vm3641_vm2, %v1998_v0, %v2002_v1 }
  0x9b   : > { %3287 = vmatpush3.bf16.msra.mxu1 %v3471_v2  ;;  %v1989_v2 = vsel %vm3641_vm2, %v1984_v63, %v1988_v61 }
  0x9c   : > { %3263 = vmatpush3.bf16.msra.mxu0 %v3470_v4  ;;  %3288 = vmatprep.subr.bf16.mxu1 %v3475_v23  ;;  %v3481_v4 = vld [vmem:[%s3856_s18 + $0x18] sm:$0xff]   ;;  %v2868_v5 = vcombine.low %v1989_v2, %v2003_v3 }
  0x9d   : > { %3264 = vmatprep.subr.bf16.mxu0 %v3474_v28 }
  0x9f   : > { %3289 = vmatpush3.bf16.msra.mxu1 %v3475_v23 }
  0xa0   : > { %3265 = vmatpush3.bf16.msra.mxu0 %v3474_v28  ;;  %3290 = vmatprep.subr.bf16.mxu1 %v3477_v34 }
  0xa1   : > { %3266 = vmatprep.subr.bf16.mxu0 %v3476_v33 }
  0xa3   : > { %3291 = vmatpush3.bf16.msra.mxu1 %v3477_v34 }
  0xa4   : > { %3267 = vmatpush3.bf16.msra.mxu0 %v3476_v33 }
  0xa6   : > { %3293 = vmatmul.mubr.bf16.vlgmr.msra.gmra.mrb[8].mxu1 %v3479_v58 }
  0xa7   : > { %3269 = vmatmul.mubr.bf16.vlgmr.msra.gmra.mrb[0].mxu0 %v2866_v59  ;;  %3296 = vmatprep.mubr.bf16.mxu1 %v3480_v60 }
  0xa8   : > { %3272 = vmatprep.mubr.bf16.mxu0 %v2867_v62 }
  0xae   : > { %3297 = vmatmul.mubr.bf16.gmra.mrb[12].mxu1 %v3481_v4 }
  0xaf   : > { %3273 = vmatmul.mubr.bf16.gmra.mrb[4].mxu0 %v2868_v5 }
 0x159   : > { %v3150_v7 = vpop.f32.mrb[0].mxu1 }
 0x15a   : > { %v1042_v8 = vpop.f32.mrb[1].mxu1 }
 0x15b   : > { %v3151_v9 = vpop.f32.mrb[2].mxu1 }
 0x15c   : > { %v1045_v10 = vpop.f32.mrb[3].mxu1 }
 0x161   : > { %v3154_v53 = vpop.f32.mrb[4].mxu1 }
 0x162   : > { %v1058_v11 = vpop.f32.mrb[5].mxu1 }
 0x163   : > { %v3155_v12 = vpop.f32.mrb[6].mxu1 }
 0x164   : > { %v1061_v13 = vpop.f32.mrb[7].mxu1 }
 0x179   : > { %v3294_v14 = vpop.f32.mrb[8].mxu1 }
 0x17a   : > { %v3270_v15 = vpop.f32.mrb[0].mxu0  ;;  %v2340_v16 = vpop.f32.mrb[9].mxu1  ;;  %v2403_v31 = vmul.f32 %v3294_v14, %v3294_v14 }
 0x17b   : > { %v3300_v17 = vadd.f32 %v3270_v15, %v3150_v7  ;;  %v2119_v18 = vpop.f32.mrb[1].mxu0  ;;  %v3295_v19 = vpop.f32.mrb[10].mxu1  ;;  %v2401_v21 = vmul.f32 %v2340_v16, %v2340_v16 }
 0x17c   : > { %v3301_v20 = vadd.f32 %v2119_v18, %v1042_v8  ;;  %v3271_v22 = vpop.f32.mrb[2].mxu0  ;;  %v2922_v23 = vpack.c.bf16 %v3295_v19, %v3294_v14  ;;  %v2343_v24 = vpop.f32.mrb[11].mxu1  ;;  %v2404_v39 = vmul.f32 %v3295_v19, %v3295_v19 }
 0x17d   : > { %v3302_v25 = vadd.f32 %v3271_v22, %v3151_v9  ;;  %v2122_v26 = vpop.f32.mrb[3].mxu0  ;;  %v2917_v27 = vpack.c.bf16 %v2343_v24, %v2340_v16  ;;  %v2387_v28 = vadd.f32 %v2343_v24, %v2340_v16  ;;  %v2402_v30 = vmul.f32 %v2343_v24, %v2343_v24 }
 0x17e   : > { %2937 = vst [vmem:[%s3936_s28 + $0x8] sm:$0xff] %v2922_v23   ;;  %v3303_v29 = vadd.f32 %v2122_v26, %v1045_v10  ;;  %v2188_v32 = vmul.f32 %v3301_v20, %v3301_v20  ;;  %v2190_v42 = vmul.f32 %v3300_v17, %v3300_v17 }
 0x17f   : > { %v2902_v33 = vpack.c.bf16 %v3302_v25, %v3300_v17  ;;  %2918 = vst [vmem:[%s3936_s28] sm:$0xff] %v2917_v27   ;;  %v2388_v34 = vadd.f32 %v3294_v14, %v2387_v28  ;;  %v2409_v38 = vadd.f32 %v2402_v30, %v2401_v21  ;;  %v2191_v48 = vmul.f32 %v3302_v25, %v3302_v25 }
 0x180   : > { %v2897_v35 = vpack.c.bf16 %v3303_v29, %v3301_v20  ;;  %v2174_v36 = vadd.f32 %v3303_v29, %v3301_v20  ;;  %v2189_v37 = vmul.f32 %v3303_v29, %v3303_v29 }
 0x181   : > { %2934 = vst [vmem:[%s3942_s7 + $0x8] sm:$0xff] %v2902_v33   ;;  %v3298_v40 = vpop.f32.mrb[12].mxu1  ;;  %v2389_v41 = vadd.f32 %v3295_v19, %v2388_v34  ;;  %v2410_v45 = vadd.f32 %v2409_v38, %v2403_v31 }
 0x182   : > { %2898 = vst [vmem:[%s3942_s7] sm:$0xff] %v2897_v35   ;;  %v2175_v43 = vadd.f32 %v3300_v17, %v2174_v36  ;;  %v2196_v44 = vadd.f32 %v2189_v37, %v2188_v32  ;;  %v3274_v46 = vpop.f32.mrb[4].mxu0  ;;  %v2356_v47 = vpop.f32.mrb[13].mxu1 }
 0x183   : > { %v3304_v49 = vadd.f32 %v3274_v46, %v3154_v53  ;;  %v2135_v50 = vpop.f32.mrb[5].mxu0  ;;  %v2390_v51 = vadd.f32 %v2389_v41, %v2356_v47  ;;  %v2405_v52 = vmul.f32 %v2356_v47, %v2356_v47  ;;  %v3299_v54 = vpop.f32.mrb[14].mxu1  ;;  %v2411_v58 = vadd.f32 %v2410_v45, %v2404_v39 }
 0x184   : > { %v2197_v55 = vadd.f32 %v2196_v44, %v2190_v42  ;;  %v3305_v56 = vadd.f32 %v2135_v50, %v1058_v11  ;;  %v2176_v57 = vadd.f32 %v3302_v25, %v2175_v43  ;;  %v3275_v59 = vpop.f32.mrb[6].mxu0  ;;  %v2359_v60 = vpop.f32.mrb[15].mxu1  ;;  %v2932_v62 = vpack.c.bf16 %v3299_v54, %v3298_v40 }
 0x185   : > { %v3306_v61 = vadd.f32 %v3275_v59, %v3155_v12  ;;  %v2138_v63 = vpop.f32.mrb[7].mxu0  ;;  %v2412_v3 = vadd.f32 %v2411_v58, %v2405_v52  ;;  %v2927_v6 = vpack.c.bf16 %v2359_v60, %v2356_v47  ;;  %v2391_v8 = vadd.f32 %v2390_v51, %v2359_v60 }
 0x186   : > { %v2177_v0 = vadd.f32 %v3305_v56, %v2176_v57  ;;  %v2192_v1 = vmul.f32 %v3305_v56, %v3305_v56  ;;  %v2198_v2 = vadd.f32 %v2197_v55, %v2191_v48  ;;  %2939 = vst [vmem:[%s3936_s28 + $0x18] sm:$0xff] %v2932_v62   ;;  %v3307_v5 = vadd.f32 %v2138_v63, %v1061_v13 }
 0x187   : > { %v2912_v4 = vpack.c.bf16 %v3306_v61, %v3304_v49  ;;  %v2406_v9 = vmul.f32 %v2359_v60, %v2359_v60  ;;  %2938 = vst [vmem:[%s3936_s28 + $0x10] sm:$0xff] %v2927_v6   ;;  %v2407_v12 = vmul.f32 %v3298_v40, %v3298_v40  ;;  %v2392_v14 = vadd.f32 %v3298_v40, %v2391_v8 }
 0x188   : > { %v2199_v7 = vadd.f32 %v2198_v2, %v2192_v1  ;;  %v2907_v10 = vpack.c.bf16 %v3307_v5, %v3305_v56  ;;  %v2178_v53 = vadd.f32 %v3307_v5, %v2177_v0  ;;  %v2193_v11 = vmul.f32 %v3307_v5, %v3307_v5 }
 0x189   : > { %2936 = vst [vmem:[%s3942_s7 + $0x18] sm:$0xff] %v2912_v4   ;;  %v2413_v15 = vadd.f32 %v2412_v3, %v2406_v9  ;;  %v2194_v16 = vmul.f32 %v3304_v49, %v3304_v49  ;;  %v2408_v19 = vmul.f32 %v3299_v54, %v3299_v54  ;;  %v2393_v20 = vadd.f32 %v3299_v54, %v2392_v14 }
 0x18a   : > { %2935 = vst [vmem:[%s3942_s7 + $0x10] sm:$0xff] %v2907_v10   ;;  %v2179_v17 = vadd.f32 %v3304_v49, %v2178_v53  ;;  %v2200_v18 = vadd.f32 %v2199_v7, %v2193_v11  ;;  %v2195_v13 = vmul.f32 %v3306_v61, %v3306_v61 }
 0x18b   : > { %v2414_v21 = vadd.f32 %v2413_v15, %v2407_v12  ;;  %v2394_v24 = vrot.slane %v2393_v20, 4 }
 0x18c   : > { %v2180_v22 = vadd.f32 %v3306_v61, %v2179_v17  ;;  %v2201_v23 = vadd.f32 %v2200_v18, %v2194_v16 }
 0x18d   : > { %v2415_v25 = vadd.f32 %v2414_v21, %v2408_v19  ;;  %v2395_v28 = vadd.f32 %v2394_v24, %v2393_v20 }
 0x18e   : > { %v2181_v26 = vrot.slane %v2180_v22, 4  ;;  %v2202_v27 = vadd.f32 %v2201_v23, %v2195_v13 }
 0x18f   : > { %v2416_v29 = vrot.slane %v2415_v25, 4  ;;  %v2396_v32 = vrot.slane %v2395_v28, 2 }
 0x190   : > { %v2182_v30 = vadd.f32 %v2181_v26, %v2180_v22  ;;  %v2203_v31 = vrot.slane %v2202_v27, 4 }
 0x191   : > { %v2417_v33 = vadd.f32 %v2416_v29, %v2415_v25  ;;  %v2397_v36 = vadd.f32 %v2396_v32, %v2395_v28 }
 0x192   : > { %v2183_v34 = vrot.slane %v2182_v30, 2  ;;  %v2204_v35 = vadd.f32 %v2203_v31, %v2202_v27 }
 0x193   : > { %v2418_v37 = vrot.slane %v2417_v33, 2  ;;  %v2398_v40 = vrot.slane %v2397_v36, 1 }
 0x194   : > { %v2184_v38 = vadd.f32 %v2183_v34, %v2182_v30  ;;  %v2205_v39 = vrot.slane %v2204_v35, 2 }
 0x195   : > { %v2419_v41 = vadd.f32 %v2418_v37, %v2417_v33  ;;  %v2399_v44 = vadd.f32 %v2398_v40, %v2397_v36 }
 0x196   : > { %v2185_v42 = vrot.slane %v2184_v38, 1  ;;  %v2206_v43 = vadd.f32 %v2205_v39, %v2204_v35 }
 0x197   : > { %v2420_v45 = vrot.slane %v2419_v41, 1  ;;  %2400 = vst [vmem:[%s3929_s27 + $0x2] sm:$0x1] %v2399_v44 }
 0x198   : > { %v2186_v46 = vadd.f32 %v2185_v42, %v2184_v38  ;;  %v2207_v47 = vrot.slane %v2206_v43, 1 }
 0x199   : > { %v2421_v48 = vadd.f32 %v2420_v45, %v2419_v41 }
 0x19a   : > { %2187 = vst [vmem:[%s3929_s27] sm:$0x1] %v2186_v46  ;;  %v2208_v49 = vadd.f32 %v2207_v47, %v2206_v43 }
 0x19b   : > { %2422 = vst [vmem:[%s3929_s27 + $0x3] sm:$0x1] %v2421_v48 }
 0x19c   : > { %2209 = vst [vmem:[%s3929_s27 + $0x1] sm:$0x1] %v2208_v49 }
 0x19d PF: > { %s17_s21 = sadd.s32 1, %s3488_s21  }
 0x19e   : > { %p14_p5 = scmp.ge.s32.totalorder %s17_s21, 4  }
 0x1a0   :  { %16 = sbr.rel (!%p14_p5) target bundleno = 1 (0x1), region = 106 }

// kernel: basic_block_forward.7
= control target key start
LH: loop header
LB: loop body
LE: loop exit
PB: predicated region body
PF: predicated region fallthrough
CT: control target
= control target key end

     0   :  { %s3620_s27 = smov 0   ;;  %s4320_s0 = inlined_call_operand.vmem [shape: bf16[2,8,8,128], index: 0, kind: input, shape index: {}]   ;;  %s4321_s1 = inlined_call_operand.vmem [shape: bf16[2,8,8,128], index: 1, kind: input, shape index: {}]   ;;  %s4322_s2 = inlined_call_operand.vmem [shape: bf16[9,128,128], index: 2, kind: input, shape index: {}]   ;;  %s4323_s3 = inlined_call_operand.vmem [shape: f32[1,128], index: 3, kind: input, shape index: {}]   ;;  %s4324_s4 = inlined_call_operand.vmem [shape: f32[1,128], index: 4, kind: input, shape index: {}]   ;;  %s4325_s5 = inlined_call_operand.vmem [shape: f32[1,128], index: 5, kind: input, shape index: {}]   ;;  %s4326_s6 = inlined_call_operand.vmem [shape: f32[1,128], index: 6, kind: input, shape index: {}]   ;;  %s4327_s7 = inlined_call_operand.vmem [shape: f32[1,128], index: 7, kind: input, shape index: {}]   ;;  %s4328_s8 = inlined_call_operand.vmem [shape: f32[2,8,8,128], index: 8, kind: output, shape index: {}]  }
   0x1 LB: > { %s2734_s28 = sadd.s32 4294967295, %s3572_s27   ;;  %p2738_p0 = scmp.ge.s32.totalorder %s3572_s27, 1  ;;  %s3572_s27 = sphi %s3620_s27, %s18_s27  }
   0x2   : > { %p272_p1 = scmp.lt.s32.totalorder %s3572_s27, 3 }
   0x4   : > { %p273_p2 = pnand %p2738_p0, %p272_p1 }
   0x5   : > { %v3482_v0 = vld [vmem:[%s4322_s2 + $0x40] sm:$0xff] (!%p273_p2)   ;;  %v3484_v2 = vld [vmem:[%s4322_s2 + $0x48] sm:$0xff] (!%p273_p2)   ;;  %v3574_v3 = vmov (!%p273_p2), 0   ;;  %v3486_v5 = vld [vmem:[%s4322_s2 + $0x50] sm:$0xff] (!%p273_p2)   ;;  %p311_p3 = scmp.lt.s32.totalorder (!%p273_p2), %s2734_s28, 1  ;;  %vm332_vm0 = vcmask (!%p273_p2), 1040384  }
   0x6   : > { %276 = sbr.rel (%p273_p2) target bundleno = 437 (0x1b5), region = 52  ;;  %v3483_v1 = vld [vmem:[%s4322_s2 + $0x100] sm:$0xff] (!%p273_p2)   ;;  %3177 = vmatprep.subr.bf16.mxu1 (!%p273_p2), %v3482_v0  ;;  %327 = vst [vmem:[#allocation2] sm:$0xf] (!%p273_p2), %v3574_v3  ;;  %328 = vst [vmem:[#allocation2 + $0x4] sm:$0x1] (!%p273_p2), %v3574_v3 }
   0x7   : > { %330 = vst [vmem:[#allocation2 + $0x48] sm:$0xf] (!%p273_p2), %v3574_v3  ;;  %331 = vst [vmem:[#allocation2 + $0x4c] sm:$0x1] (!%p273_p2), %v3574_v3  ;;  %3273 = vmatprep.subr.bf16.mxu0 (!%p273_p2), %v3483_v1  ;;  %3178 = vmatpush3.bf16.msra.mxu1 (!%p273_p2), %v3482_v0  ;;  %v3485_v4 = vld [vmem:[%s4322_s2 + $0x108] sm:$0xff] (!%p273_p2)   ;;  %v3487_v6 = vld [vmem:[%s4322_s2 + $0x110] sm:$0xff] (!%p273_p2)  }
   0x8   : > { %3274 = vmatpush3.bf16.msra.mxu0 (!%p273_p2), %v3483_v1  ;;  %3179 = vmatprep.subr.bf16.mxu1 (!%p273_p2), %v3484_v2  ;;  %v3488_v7 = vld [vmem:[%s4322_s2 + $0x58] sm:$0xff] (!%p273_p2)   ;;  %v3490_v9 = vld [vmem:[%s4322_s2 + $0x60] sm:$0xff] (!%p273_p2)   ;;  %v3492_v11 = vld [vmem:[%s4322_s2 + $0x68] sm:$0xff] (!%p273_p2)   ;;  %vm333_vm1 = vsmask.f32 (!%p273_p2), 256  ;;  %vm564_vm5 = vcmask (!%p273_p2), 1043456  }
   0x9   : > { %3275 = vmatprep.subr.bf16.mxu0 (!%p273_p2), %v3485_v4  ;;  %v3489_v8 = vld [vmem:[%s4322_s2 + $0x118] sm:$0xff] (!%p273_p2)   ;;  %v3491_v10 = vld [vmem:[%s4322_s2 + $0x120] sm:$0xff] (!%p273_p2)   ;;  %v3493_v12 = vld [vmem:[%s4322_s2 + $0x128] sm:$0xff] (!%p273_p2)   ;;  %vm365_vm3 = vsmask.f32 (!%p273_p2), 7938  ;;  %vm1068_vm10 = vcmask (!%p273_p2), 1042432  }
   0xa   : > { %v338_v14 = vld [vmem:[#allocation2 + $0x8] sm:$0x1] (!%p273_p2)  ;;  %vm3675_vm2 = vmand (!%p273_p2), %vm332_vm0, %vm333_vm1  ;;  %v370_v17 = vld [vmem:[#allocation2 + $0xc] sm:$0x1] (!%p273_p2)  ;;  %vm646_vm6 = vsmask.f32 (!%p273_p2), 3328 }
   0xb   : > { %3180 = vmatpush3.bf16.msra.mxu1 (!%p273_p2), %v3484_v2  ;;  %v339_v19 = vsel (!%p273_p2), %vm3675_vm2, 0, %v338_v14  ;;  %vm3685_vm4 = vmand (!%p273_p2), %vm332_vm0, %vm365_vm3  ;;  %v3494_v21 = vld [vmem:[%s4322_s2 + $0x70] sm:$0xff] (!%p273_p2)   ;;  %v3699_v24 = vld [vmem:[%s4323_s3] ss:$0 sm:$0xff] (!%p273_p2)  ;;  %vm647_vm8 = vsmask.f32 (!%p273_p2), 7440 }
   0xc   : > { %3276 = vmatpush3.bf16.msra.mxu0 (!%p273_p2), %v3485_v4  ;;  %3181 = vmatprep.subr.bf16.mxu1 (!%p273_p2), %v3486_v5  ;;  %340 = vst [vmem:[#allocation2 + $0x8] sm:$0x1] (!%p273_p2), %v339_v19  ;;  %v371_v23 = vsel (!%p273_p2), %vm3685_vm4, 0, %v370_v17  ;;  %v3495_v26 = vld [vmem:[%s4322_s2 + $0x130] sm:$0xff] (!%p273_p2)   ;;  %v3708_v29 = vld [vmem:[%s4324_s4] ss:$0 sm:$0xff] (!%p273_p2)  ;;  %vm3756_vm7 = vmand (!%p273_p2), %vm564_vm5, %vm365_vm3 }
   0xd   : > { %3277 = vmatprep.subr.bf16.mxu0 %v3487_v6  ;;  %s4340_s28 = smov (!%p311_p3, %s2734_s28), 1  ;;  %v335_v13 = vld [vmem:[#allocation2] sm:$0x1]  ;;  %v367_v16 = vld [vmem:[#allocation2 + $0x4] sm:$0x1]  ;;  %v3496_v38 = vld [vmem:[%s4322_s2 + $0x78] sm:$0xff]  }
   0xe   : > { %s3020_s29 = sshll.u32 %s4340_s28, 5  ;;  %v336_v18 = vsel %vm3675_vm2, 0, %v335_v13  ;;  %v368_v22 = vsel %vm3685_vm4, 0, %v367_v16  ;;  %372 = vst [vmem:[#allocation2 + $0xc] sm:$0x1] %v371_v23  ;;  %v3497_v45 = vld [vmem:[%s4322_s2 + $0x138] sm:$0xff]   ;;  %vm3776_vm9 = vmor %vm646_vm6, %vm647_vm8 }
   0xf   : > { %3182 = vmatpush3.bf16.msra.mxu1 %v3486_v5  ;;  %s3672_s14 = scalar_lea.vmem %s4320_s0, %s3020_s29  ;;  %337 = vst [vmem:[#allocation2] sm:$0x1] %v336_v18  ;;  %369 = vst [vmem:[#allocation2 + $0x4] sm:$0x1] %v368_v22  ;;  %v341_v30 = vld [vmem:[#allocation2 + $0x10] sm:$0x1]  ;;  %s320_s30 = scalar_lea.vmem %s4321_s1, %s3020_s29 }
  0x10   : > { %3278 = vmatpush3.bf16.msra.mxu0 %v3487_v6  ;;  %3183 = vmatprep.subr.bf16.mxu1 %v3488_v7  ;;  %v3032_v25 = vld [vmem:[%s3672_s14] sm:$0xff]   ;;  %v373_v31 = vld [vmem:[#allocation2 + $0x14] sm:$0x1]  ;;  %v342_v33 = vsel %vm3675_vm2, 0, %v341_v30  ;;  %v344_v36 = vld [vmem:[#allocation2 + $0x18] sm:$0x1] }
  0x11   : > { %3279 = vmatprep.subr.bf16.mxu0 %v3489_v8  ;;  %v3033_v27 = vunpack.c.l.bf16 %v3032_v25  ;;  %v3034_v28 = vunpack.c.h.bf16 %v3032_v25  ;;  %v374_v34 = vsel %vm3685_vm4, 0, %v373_v31  ;;  %343 = vst [vmem:[#allocation2 + $0x10] sm:$0x1] %v342_v33  ;;  %v376_v37 = vld [vmem:[#allocation2 + $0x1c] sm:$0x1]  ;;  %v345_v41 = vsel %vm3675_vm2, 0, %v344_v36 }
  0x12   : > { %375 = vst [vmem:[#allocation2 + $0x14] sm:$0x1] %v374_v34  ;;  %v377_v42 = vsel %vm3685_vm4, 0, %v376_v37  ;;  %v3063_v43 = vld [vmem:[%s3672_s14 + $0x8] sm:$0xff]   ;;  %v347_v44 = vld [vmem:[#allocation2 + $0x20] sm:$0x1] }
  0x13   : > { %3184 = vmatpush3.bf16.msra.mxu1 %v3488_v7  ;;  %v421_v32 = vmul.f32 %v3033_v27, %v3699_v24  ;;  %v422_v35 = vmul.f32 %v3034_v28, %v3699_v24  ;;  %346 = vst [vmem:[#allocation2 + $0x18] sm:$0x1] %v345_v41  ;;  %378 = vst [vmem:[#allocation2 + $0x1c] sm:$0x1] %v377_v42  ;;  %v3037_v46 = vunpack.c.l.bf16 %v3063_v43  ;;  %v348_v47 = vsel %vm3675_vm2, 0, %v347_v44  ;;  %v3739_v57 = vld [vmem:[%s4322_s2] sm:$0xff]  }
  0x14   : > { %3280 = vmatpush3.bf16.msra.mxu0 %v3489_v8  ;;  %3185 = vmatprep.subr.bf16.mxu1 %v3490_v9  ;;  %v3038_v48 = vunpack.c.h.bf16 %v3063_v43  ;;  %349 = vst [vmem:[#allocation2 + $0x20] sm:$0x1] %v348_v47  ;;  %v379_v52 = vld [vmem:[#allocation2 + $0x24] sm:$0x1]  ;;  %v566_v2 = vld [vmem:[#allocation2 + $0x8] sm:$0xf] }
  0x15   : > { %3281 = vmatprep.subr.bf16.mxu0 %v3491_v10  ;;  %v435_v39 = vadd.f32 %v3708_v29, %v421_v32  ;;  %v436_v40 = vadd.f32 %v3708_v29, %v422_v35  ;;  %v423_v53 = vmul.f32 %v3037_v46, %v3699_v24  ;;  %v3745_v60 = vld [vmem:[%s4322_s2 + $0x140] sm:$0xff]   ;;  %v380_v62 = vsel %vm3685_vm4, 0, %v379_v52  ;;  %v569_v3 = vld [vmem:[#allocation2 + $0xc] sm:$0x1]  ;;  %s3022_s15 = sshll.u32 %s4340_s28, 6 }
  0x16   : > { %v3731_v50 = vld [vmem:[#allocation2] sm:$0xf]  ;;  %v424_v54 = vmul.f32 %v3038_v48, %v3699_v24  ;;  %381 = vst [vmem:[#allocation2 + $0x24] sm:$0x1] %v380_v62  ;;  %v3751_v8 = vld [vmem:[#allocation2 + $0x4] sm:$0x1]  ;;  %s4303_s17 = scalar_lea.vmem %s4328_s8, %s3022_s15 }
  0x17   : > { %3186 = vmatpush3.bf16.msra.mxu1 %v3490_v9  ;;  %v443_v49 = vmax.f32 %v435_v39, 0.0  ;;  %v444_v51 = vmax.f32 %v436_v40, 0.0  ;;  %v650_v56 = vshrl.u32 %v3731_v50, 16  ;;  %v653_v59 = vshll.u32 %v3731_v50, 16  ;;  %v382_v52 = vld [vmem:[#allocation2 + $0x2c] sm:$0x1] }
  0x18   : > { %3282 = vmatpush3.bf16.msra.mxu0 %v3491_v10  ;;  %3187 = vmatprep.subr.bf16.mxu1 %v3492_v11  ;;  %v437_v61 = vadd.f32 %v3708_v29, %v423_v53  ;;  %v438_v6 = vadd.f32 %v3708_v29, %v424_v54  ;;  %v659_v33 = vshll.u32 %v3751_v8, 16  ;;  %vm1069_vm11 = vcmask 1046532   ;;  %v3525_v15 = vld [vmem:[%s4322_s2 + $0x1a0] sm:$0xff]  }
  0x19   : > { %3283 = vmatprep.subr.bf16.mxu0 %v3493_v12  ;;  %v3023_v55 = vpack.c.bf16 %v443_v49, %v443_v49  ;;  %v3024_v58 = vpack.c.bf16 %v444_v51, %v444_v51  ;;  %v652_v9 = vrot.slane %v650_v56, 4  ;;  %v655_v13 = vrot.slane %v653_v59, 5  ;;  %v575_v14 = vld [vmem:[#allocation2 + $0x14] sm:$0x1]  ;;  %v350_v51 = vld [vmem:[#allocation2 + $0x28] sm:$0x1]  ;;  %vm4008_vm12 = vmor %vm1068_vm10, %vm1069_vm11 }
  0x1a   : > { %v445_v5 = vmax.f32 %v437_v61, 0.0  ;;  %v446_v17 = vmax.f32 %v438_v6, 0.0  ;;  %v578_v32 = vld [vmem:[#allocation2 + $0x18] sm:$0xf]  ;;  %v581_v35 = vld [vmem:[#allocation2 + $0x1c] sm:$0x1] }
  0x1b   : > { %3188 = vmatpush3.bf16.msra.mxu1 %v3492_v11  ;;  %v484_v63 = vshrl.u32 %v3023_v55, 16  ;;  %v487_v0 = vshll.u32 %v3023_v55, 16  ;;  %v492_v1 = vshrl.u32 %v3024_v58, 16  ;;  %v495_v4 = vshll.u32 %v3024_v58, 16  ;;  %v572_v11 = vld [vmem:[#allocation2 + $0x10] sm:$0xf] }
  0x1c   : > { %3284 = vmatpush3.bf16.msra.mxu0 %v3493_v12  ;;  %3189 = vmatprep.subr.bf16.mxu1 %v3494_v21  ;;  %v3025_v16 = vpack.c.bf16 %v445_v5, %v445_v5  ;;  %v584_v39 = vld [vmem:[#allocation2 + $0x20] sm:$0xf]  ;;  %v661_v49 = vrot.slane %v659_v33, 5  ;;  %v351_v56 = vsel %vm3675_vm2, 0, %v350_v51  ;;  %v383_v58 = vsel %vm3685_vm4, 0, %v382_v52 }
  0x1d   : > { %3285 = vmatprep.subr.bf16.mxu0 %v3495_v26  ;;  %v486_v7 = vrot.slane %v484_v63, 7  ;;  %v494_v10 = vrot.slane %v492_v1, 7  ;;  %v587_v43 = vld [vmem:[#allocation2 + $0x24] sm:$0x1]  ;;  %352 = vst [vmem:[#allocation2 + $0x28] sm:$0x1] %v351_v56 }
  0x1e   : > { %v500_v23 = vshrl.u32 %v3025_v16, 16  ;;  %v503_v25 = vshll.u32 %v3025_v16, 16  ;;  %384 = vst [vmem:[#allocation2 + $0x2c] sm:$0x1] %v383_v58 }
  0x1f   : > { %3190 = vmatpush3.bf16.msra.mxu1 %v3494_v21  ;;  %v489_v18 = vor.u32 %v487_v0, %v486_v7  ;;  %v490_v19 = vrot.slane %v486_v7, 4  ;;  %v497_v21 = vor.u32 %v495_v4, %v494_v10  ;;  %v498_v22 = vrot.slane %v494_v10, 4 }
  0x20   : > { %3286 = vmatpush3.bf16.msra.mxu0 %v3495_v26  ;;  %3191 = vmatprep.subr.bf16.mxu1 %v3496_v38  ;;  %v3026_v26 = vpack.c.bf16 %v446_v17, %v446_v17  ;;  %v502_v34 = vrot.slane %v500_v23, 7 }
  0x21   : > { %3287 = vmatprep.subr.bf16.mxu0 %v3497_v45  ;;  %v567_v27 = vsel %vm3756_vm7, %v489_v18, %v566_v2  ;;  %v570_v28 = vsel %vm3675_vm2, %v490_v19, %v569_v3  ;;  %v573_v30 = vsel %vm3756_vm7, %v497_v21, %v572_v11  ;;  %v576_v31 = vsel %vm3675_vm2, %v498_v22, %v575_v14  ;;  %v3798_v3 = vld [vmem:[%s3672_s14 + $0x10] sm:$0xff]  }
  0x22   : > { %568 = vst [vmem:[#allocation2 + $0x8] sm:$0xf] %v567_v27  ;;  %571 = vst [vmem:[#allocation2 + $0xc] sm:$0x1] %v570_v28  ;;  %v508_v36 = vshrl.u32 %v3026_v26, 16  ;;  %v511_v37 = vshll.u32 %v3026_v26, 16  ;;  %v505_v40 = vor.u32 %v503_v25, %v502_v34  ;;  %v3041_v27 = vunpack.c.l.bf16 %v3798_v3 }
  0x23   : > { %3192 = vmatpush3.bf16.msra.mxu1 %v3496_v38  ;;  %574 = vst [vmem:[#allocation2 + $0x10] sm:$0xf] %v573_v30  ;;  %577 = vst [vmem:[#allocation2 + $0x14] sm:$0x1] %v576_v31  ;;  %v656_v38 = vor.u32 %v655_v13, %v652_v9  ;;  %v506_v41 = vrot.slane %v502_v34, 4 }
  0x24   : > { %3288 = vmatpush3.bf16.msra.mxu0 %v3497_v45  ;;  %3201 = vmatprep.subr.bf16.mxu1 %v3739_v57  ;;  %v510_v42 = vrot.slane %v508_v36, 7  ;;  %v579_v44 = vsel %vm3756_vm7, %v505_v40, %v578_v32 }
  0x25   : > { %3297 = vmatprep.subr.bf16.mxu0 %v3745_v60  ;;  %v582_v45 = vsel %vm3675_vm2, %v506_v41, %v581_v35  ;;  %v657_v48 = vrot.slane %v656_v38, 4  ;;  %580 = vst [vmem:[#allocation2 + $0x18] sm:$0xf] %v579_v44 }
  0x26   : > { %v513_v46 = vor.u32 %v511_v37, %v510_v42  ;;  %v514_v47 = vrot.slane %v510_v42, 4  ;;  %583 = vst [vmem:[#allocation2 + $0x1c] sm:$0x1] %v582_v45 }
  0x27   : > { %v662_v9 = vsel %vm3776_vm9, %v657_v48, %v661_v49 }
  0x28   : > { %v585_v54 = vsel %vm3756_vm7, %v513_v46, %v584_v39  ;;  %v588_v55 = vsel %vm3675_vm2, %v514_v47, %v587_v43 }
  0x29   : > { %v3788_v59 = vld [vmem:[#allocation2 + $0x8] sm:$0xf]  ;;  %v3790_v61 = vld [vmem:[#allocation2 + $0xc] sm:$0x1]  ;;  %586 = vst [vmem:[#allocation2 + $0x20] sm:$0xf] %v585_v54 }
  0x2a   : > { %v1427_v62 = vld [vmem:[#allocation2 + $0x8] sm:$0xf]  ;;  %589 = vst [vmem:[#allocation2 + $0x24] sm:$0x1] %v588_v55  ;;  %v664_v63 = vshrl.u32 %v3788_v59, 16  ;;  %v667_v0 = vshll.u32 %v3788_v59, 16 }
  0x2b   : > { %v673_v1 = vshll.u32 %v3790_v61, 16  ;;  %v3795_v2 = vld [vmem:[#allocation2 + $0xc] sm:$0x1]  ;;  %v1429_v4 = vld [vmem:[#allocation2 + $0x10] sm:$0xf]  ;;  %v1444_v6 = vshrl.u32 %v1427_v62, 16 }
  0x2c   : > { %v3800_v5 = vld [vmem:[#allocation2 + $0x14] sm:$0x1]  ;;  %v1447_v7 = vshll.u32 %v1427_v62, 16  ;;  %v666_v10 = vrot.slane %v664_v63, 4  ;;  %v669_v11 = vrot.slane %v667_v0, 5  ;;  %v1453_v13 = vshll.u32 %v3795_v2, 16 }
  0x2d   : > { %v1446_v14 = vrot.slane %v1444_v6, 4  ;;  %v1458_v17 = vshrl.u32 %v1429_v4, 16  ;;  %v1461_v18 = vshll.u32 %v1429_v4, 16  ;;  %v3805_v19 = vld [vmem:[#allocation2 + $0x10] sm:$0xf]  ;;  %v675_v22 = vrot.slane %v673_v1, 5 }
  0x2e   : > { %v1449_v16 = vrot.slane %v1447_v7, 5  ;;  %v670_v21 = vor.u32 %v669_v11, %v666_v10  ;;  %v1467_v23 = vshll.u32 %v3800_v5, 16  ;;  %v3808_v25 = vld [vmem:[#allocation2 + $0x18] sm:$0xf]  ;;  %v3810_v26 = vld [vmem:[#allocation2 + $0x14] sm:$0x1]  ;;  %v425_v4 = vmul.f32 %v3041_v27, %v3699_v24 }
  0x2f   : > { %v1455_v30 = vrot.slane %v1453_v13, 5  ;;  %v1460_v31 = vrot.slane %v1458_v17, 4  ;;  %v1463_v32 = vrot.slane %v1461_v18, 5  ;;  %v678_v35 = vshrl.u32 %v3805_v19, 16  ;;  %v3815_v39 = vld [vmem:[#allocation2 + $0x1c] sm:$0x1] }
  0x30   : > { %v1450_v28 = vor.u32 %v1449_v16, %v1446_v14  ;;  %v671_v33 = vrot.slane %v670_v21, 4  ;;  %v1469_v34 = vrot.slane %v1467_v23, 5  ;;  %v681_v36 = vshll.u32 %v3805_v19, 16  ;;  %v1431_v46 = vld [vmem:[#allocation2 + $0x18] sm:$0xf] }
  0x31   : > { %v1464_v38 = vor.u32 %v1463_v32, %v1460_v31  ;;  %v687_v40 = vshll.u32 %v3810_v26, 16  ;;  %v692_v41 = vshrl.u32 %v3808_v25, 16  ;;  %v680_v43 = vrot.slane %v678_v35, 4  ;;  %v3824_v52 = vld [vmem:[#allocation2 + $0x1c] sm:$0x1] }
  0x32   : > { %v1451_v37 = vrot.slane %v1450_v28, 4  ;;  %v676_v42 = vsel %vm3776_vm9, %v671_v33, %v675_v22  ;;  %v683_v44 = vrot.slane %v681_v36, 5  ;;  %v695_v45 = vshll.u32 %v3808_v25, 16  ;;  %v1433_v62 = vld [vmem:[#allocation2 + $0x20] sm:$0xf] }
  0x33   : > { %v2771_v47 = vcombine.low %v662_v9, %v676_v42  ;;  %v1465_v49 = vrot.slane %v1464_v38, 4  ;;  %v689_v51 = vrot.slane %v687_v40, 5  ;;  %v694_v55 = vrot.slane %v692_v41, 4  ;;  %v3829_v0 = vld [vmem:[#allocation2 + $0x24] sm:$0x1] }
  0x34   : > { %v1456_v48 = vsel %vm3776_vm9, %v1451_v37, %v1455_v30  ;;  %v684_v54 = vor.u32 %v683_v44, %v680_v43  ;;  %v697_v56 = vrot.slane %v695_v45, 5  ;;  %v701_v58 = vshll.u32 %v3815_v39, 16  ;;  %v385_v32 = vld [vmem:[#allocation2 + $0x34] sm:$0x1]  ;;  %v3500_v37 = vld [vmem:[%s4322_s2 + $0x8] sm:$0xff]  }
  0x35   : > { %3193 = vmatprep.mubr.bf16.mxu1 %v2771_v47  ;;  %v1470_v63 = vsel %vm3776_vm9, %v1465_v49, %v1469_v34  ;;  %v1472_v1 = vshrl.u32 %v1431_v46, 16  ;;  %v3042_v6 = vunpack.c.h.bf16 %v3798_v3  ;;  %v1475_v14 = vshll.u32 %v1431_v46, 16  ;;  %v353_v3 = vld [vmem:[#allocation2 + $0x30] sm:$0x1]  ;;  %v3844_v40 = vld [vmem:[#allocation2 + $0x20] sm:$0xf] }
  0x36   : > { %v2875_v7 = vcombine.low %v1456_v48, %v1470_v63  ;;  %v685_v9 = vrot.slane %v684_v54, 4  ;;  %v698_v10 = vor.u32 %v697_v56, %v694_v55  ;;  %v703_v11 = vrot.slane %v701_v58, 5  ;;  %v356_v44 = vld [vmem:[#allocation2 + $0x38] sm:$0x1]  ;;  %v388_v45 = vld [vmem:[#allocation2 + $0x3c] sm:$0x1] }
  0x37   : > { %v1474_v13 = vrot.slane %v1472_v1, 4  ;;  %v1481_v16 = vshll.u32 %v3824_v52, 16  ;;  %v1486_v17 = vshrl.u32 %v1433_v62, 16  ;;  %v1489_v22 = vshll.u32 %v1433_v62, 16  ;;  %v3502_v47 = vld [vmem:[%s4322_s2 + $0x10] sm:$0xff]  }
  0x38   : > { %3289 = vmatprep.mubr.bf16.mxu0 %v2875_v7  ;;  %v690_v18 = vsel %vm3776_vm9, %v685_v9, %v689_v51  ;;  %v699_v21 = vrot.slane %v698_v10, 4  ;;  %v1495_v23 = vshll.u32 %v3829_v0, 16  ;;  %v1477_v27 = vrot.slane %v1475_v14, 5  ;;  %v3065_v51 = vld [vmem:[%s3672_s14 + $0x18] sm:$0xff]   ;;  %v359_v54 = vld [vmem:[#allocation2 + $0x40] sm:$0x1] }
  0x39   : > { %v1488_v28 = vrot.slane %v1486_v17, 4  ;;  %v1491_v31 = vrot.slane %v1489_v22, 5  ;;  %v426_v33 = vmul.f32 %v3042_v6, %v3699_v24  ;;  %v1483_v36 = vrot.slane %v1481_v16, 5  ;;  %v391_v62 = vld [vmem:[#allocation2 + $0x44] sm:$0x1] }
  0x3a   : > { %v704_v30 = vsel %vm3776_vm9, %v699_v21, %v703_v11  ;;  %v1478_v35 = vor.u32 %v1477_v27, %v1474_v13  ;;  %v439_v38 = vadd.f32 %v3708_v29, %v425_v4  ;;  %v1497_v42 = vrot.slane %v1495_v23, 5  ;;  %v3501_v13 = vld [vmem:[%s4322_s2 + $0x148] sm:$0xff]   ;;  %v3504_v27 = vld [vmem:[%s4322_s2 + $0x18] sm:$0xff]  }
  0x3b   : > { %v2772_v34 = vcombine.low %v690_v18, %v704_v30  ;;  %v1492_v41 = vor.u32 %v1491_v31, %v1488_v28  ;;  %v354_v43 = vsel %vm3675_vm2, 0, %v353_v3  ;;  %v386_v49 = vsel %vm3685_vm4, 0, %v385_v32  ;;  %v590_v18 = vld [vmem:[#allocation2 + $0x28] sm:$0xf]  ;;  %v593_v30 = vld [vmem:[#allocation2 + $0x2c] sm:$0x1] }
  0x3c   : > { %v1479_v46 = vrot.slane %v1478_v35, 4  ;;  %v447_v48 = vmax.f32 %v439_v38, 0.0  ;;  %355 = vst [vmem:[#allocation2 + $0x30] sm:$0x1] %v354_v43  ;;  %v706_v56 = vshrl.u32 %v3844_v40, 16  ;;  %v440_v58 = vadd.f32 %v3708_v29, %v426_v33  ;;  %v3503_v35 = vld [vmem:[%s4322_s2 + $0x150] sm:$0xff]  }
  0x3d   : > { %3194 = vmatmul.mubr.bf16.vlgmr.msra.gmra.mrb[0].mxu1 %v2772_v34  ;;  %v1493_v55 = vrot.slane %v1492_v41, 4  ;;  %387 = vst [vmem:[#allocation2 + $0x34] sm:$0x1] %v386_v49  ;;  %v357_v4 = vsel %vm3675_vm2, 0, %v356_v44  ;;  %v389_v6 = vsel %vm3685_vm4, 0, %v388_v45  ;;  %v709_v7 = vshll.u32 %v3844_v40, 16 }
  0x3e   : > { %3202 = vmatpush3.bf16.msra.mxu1 %v3739_v57  ;;  %v1484_v63 = vsel %vm3776_vm9, %v1479_v46, %v1483_v36  ;;  %v3027_v1 = vpack.c.bf16 %v447_v48, %v447_v48  ;;  %v448_v9 = vmax.f32 %v440_v58, 0.0  ;;  %358 = vst [vmem:[#allocation2 + $0x38] sm:$0x1] %v357_v4  ;;  %390 = vst [vmem:[#allocation2 + $0x3c] sm:$0x1] %v389_v6  ;;  %v3045_v10 = vunpack.c.l.bf16 %v3065_v51  ;;  %v3506_v44 = vld [vmem:[%s4322_s2 + $0x20] sm:$0xff]  }
  0x3f   : > { %3203 = vmatprep.subr.bf16.mxu1 %v3500_v37  ;;  %v1498_v57 = vsel %vm3776_vm9, %v1493_v55, %v1497_v42  ;;  %v360_v17 = vsel %vm3675_vm2, 0, %v359_v54  ;;  %v392_v23 = vsel %vm3685_vm4, 0, %v391_v62  ;;  %v3046_v3 = vunpack.c.h.bf16 %v3065_v51  ;;  %v3882_v38 = vld [vmem:[#allocation2 + $0x24] sm:$0x1]  ;;  %v3505_v62 = vld [vmem:[%s4322_s2 + $0x158] sm:$0xff]  }
  0x40   : > { %v2876_v11 = vcombine.low %v1484_v63, %v1498_v57  ;;  %v516_v14 = vshrl.u32 %v3027_v1, 16  ;;  %v519_v16 = vshll.u32 %v3027_v1, 16  ;;  %v3028_v21 = vpack.c.bf16 %v448_v9, %v448_v9  ;;  %361 = vst [vmem:[#allocation2 + $0x40] sm:$0x1] %v360_v17  ;;  %393 = vst [vmem:[#allocation2 + $0x44] sm:$0x1] %v392_v23 }
  0x41   : > { %v427_v22 = vmul.f32 %v3045_v10, %v3699_v24  ;;  %v708_v31 = vrot.slane %v706_v56, 4  ;;  %v711_v41 = vrot.slane %v709_v7, 5  ;;  %v428_v42 = vmul.f32 %v3046_v3, %v3699_v24  ;;  %v3507_v9 = vld [vmem:[%s4322_s2 + $0x160] sm:$0xff]  }
  0x42   : > { %3204 = vmatpush3.bf16.msra.mxu1 %v3500_v37  ;;  %3290 = vmatmul.mubr.bf16.vlgmr.msra.gmra.mrb[0].mxu0 %v2876_v11  ;;  %v518_v28 = vrot.slane %v516_v14, 7  ;;  %v524_v32 = vshrl.u32 %v3028_v21, 16  ;;  %v527_v33 = vshll.u32 %v3028_v21, 16  ;;  %v715_v24 = vshll.u32 %v3882_v38, 16 }
  0x43   : > { %3205 = vmatprep.subr.bf16.mxu1 %v3502_v47  ;;  %3298 = vmatpush3.bf16.msra.mxu0 %v3745_v60  ;;  %v441_v34 = vadd.f32 %v3708_v29, %v427_v22  ;;  %v596_v48 = vld [vmem:[#allocation2 + $0x30] sm:$0xf]  ;;  %v442_v51 = vadd.f32 %v3708_v29, %v428_v42  ;;  %v1073_v56 = vrot.slane %v3751_v8, 5  ;;  %v1077_v58 = vrot.slane %v3790_v61, 5  ;;  %v3508_v29 = vld [vmem:[%s4322_s2 + $0x28] sm:$0xff]  }
  0x44   : > { %3299 = vmatprep.subr.bf16.mxu0 %v3501_v13  ;;  %v521_v36 = vor.u32 %v519_v16, %v518_v28  ;;  %v522_v37 = vrot.slane %v518_v28, 4  ;;  %v526_v60 = vrot.slane %v524_v32, 7  ;;  %v599_v49 = vld [vmem:[#allocation2 + $0x34] sm:$0x1]  ;;  %v712_v63 = vor.u32 %v711_v41, %v708_v31  ;;  %v3509_v28 = vld [vmem:[%s4322_s2 + $0x168] sm:$0xff]  }
  0x45   : > { %v449_v43 = vmax.f32 %v441_v34, 0.0  ;;  %v450_v1 = vmax.f32 %v442_v51, 0.0  ;;  %v3911_v11 = vrot.slane %v715_v24, 5  ;;  %v602_v14 = vld [vmem:[#allocation2 + $0x38] sm:$0xf]  ;;  %v2784_v8 = vcombine.low %v3805_v19, %v3808_v25 }
  0x46   : > { %3206 = vmatpush3.bf16.msra.mxu1 %v3502_v47  ;;  %v591_v45 = vsel %vm3756_vm7, %v521_v36, %v590_v18  ;;  %v594_v46 = vsel %vm3675_vm2, %v522_v37, %v593_v30  ;;  %v529_v47 = vor.u32 %v527_v33, %v526_v60  ;;  %v530_v54 = vrot.slane %v526_v60, 4  ;;  %v605_v16 = vld [vmem:[#allocation2 + $0x3c] sm:$0x1]  ;;  %v3510_v18 = vld [vmem:[%s4322_s2 + $0x30] sm:$0xff]  }
  0x47   : > { %3207 = vmatprep.subr.bf16.mxu1 %v3504_v27  ;;  %3300 = vmatpush3.bf16.msra.mxu0 %v3501_v13  ;;  %592 = vst [vmem:[#allocation2 + $0x28] sm:$0xf] %v591_v45  ;;  %595 = vst [vmem:[#allocation2 + $0x2c] sm:$0x1] %v594_v46  ;;  %v3029_v55 = vpack.c.bf16 %v449_v43, %v449_v43  ;;  %v3909_v10 = vpack.c.bf16 %v450_v1, %v450_v1  ;;  %v3913_v17 = vrot.slane %v712_v63, 4  ;;  %v3512_v43 = vld [vmem:[%s4322_s2 + $0x38] sm:$0xff]  }
  0x48   : > { %3301 = vmatprep.subr.bf16.mxu0 %v3503_v35  ;;  %v597_v4 = vsel %vm3756_vm7, %v529_v47, %v596_v48  ;;  %v600_v6 = vsel %vm3675_vm2, %v530_v54, %v599_v49 }
  0x49   : > { %v532_v57 = vshrl.u32 %v3029_v55, 16  ;;  %v535_v7 = vshll.u32 %v3029_v55, 16  ;;  %598 = vst [vmem:[#allocation2 + $0x30] sm:$0xf] %v597_v4  ;;  %601 = vst [vmem:[#allocation2 + $0x34] sm:$0x1] %v600_v6  ;;  %v718_v63 = vsel %vm3776_vm9, %v3913_v17, %v3911_v11 }
  0x4a   : > { %3208 = vmatpush3.bf16.msra.mxu1 %v3504_v27  ;;  %v540_v21 = vshrl.u32 %v3909_v10, 16  ;;  %v543_v27 = vshll.u32 %v3909_v10, 16 }
  0x4b   : > { %3209 = vmatprep.subr.bf16.mxu1 %v3506_v44  ;;  %3302 = vmatpush3.bf16.msra.mxu0 %v3503_v35  ;;  %v534_v13 = vrot.slane %v532_v57, 7 }
  0x4c   : > { %3303 = vmatprep.subr.bf16.mxu0 %v3505_v62  ;;  %v542_v57 = vrot.slane %v540_v21, 7  ;;  %v611_v21 = vld [vmem:[#allocation2 + $0x44] sm:$0x1] }
  0x4d   : > { %v537_v22 = vor.u32 %v535_v7, %v534_v13  ;;  %v538_v23 = vrot.slane %v534_v13, 4  ;;  %v608_v7 = vld [vmem:[#allocation2 + $0x40] sm:$0xf] }
  0x4e   : > { %3210 = vmatpush3.bf16.msra.mxu1 %v3506_v44  ;;  %v3923_v3 = vld [vmem:[#allocation2 + $0x28] sm:$0xf]  ;;  %v3925_v30 = vld [vmem:[#allocation2 + $0x2c] sm:$0x1] }
  0x4f   : > { %3211 = vmatprep.subr.bf16.mxu1 %v3508_v29  ;;  %v1435_v31 = vld [vmem:[#allocation2 + $0x28] sm:$0xf]  ;;  %3304 = vmatpush3.bf16.msra.mxu0 %v3505_v62  ;;  %v720_v32 = vshrl.u32 %v3923_v3, 16  ;;  %v723_v33 = vshll.u32 %v3923_v3, 16  ;;  %v729_v34 = vshll.u32 %v3925_v30, 16  ;;  %v603_v42 = vsel %vm3756_vm7, %v537_v22, %v602_v14  ;;  %v3511_v62 = vld [vmem:[%s4322_s2 + $0x170] sm:$0xff]  }
  0x50   : > { %v3930_v35 = vld [vmem:[#allocation2 + $0x2c] sm:$0x1]  ;;  %v1500_v36 = vshrl.u32 %v1435_v31, 16  ;;  %3305 = vmatprep.subr.bf16.mxu0 %v3507_v9  ;;  %v1503_v37 = vshll.u32 %v1435_v31, 16  ;;  %v606_v60 = vsel %vm3675_vm2, %v538_v23, %v605_v16  ;;  %v1437_v48 = vld [vmem:[#allocation2 + $0x30] sm:$0xf] }
  0x51   : > { %v1509_v41 = vshll.u32 %v3930_v35, 16  ;;  %v722_v44 = vrot.slane %v720_v32, 4  ;;  %v725_v45 = vrot.slane %v723_v33, 5  ;;  %v731_v46 = vrot.slane %v729_v34, 5  ;;  %604 = vst [vmem:[#allocation2 + $0x38] sm:$0xf] %v603_v42 }
  0x52   : > { %3212 = vmatpush3.bf16.msra.mxu1 %v3508_v29  ;;  %v1502_v49 = vrot.slane %v1500_v36, 4  ;;  %607 = vst [vmem:[#allocation2 + $0x3c] sm:$0x1] %v606_v60  ;;  %v3940_v51 = vld [vmem:[#allocation2 + $0x34] sm:$0x1]  ;;  %v1505_v24 = vrot.slane %v1503_v37, 5  ;;  %v545_v34 = vor.u32 %v543_v27, %v542_v57 }
  0x53   : > { %3213 = vmatprep.subr.bf16.mxu1 %v3510_v18  ;;  %v1511_v47 = vrot.slane %v1509_v41, 5  ;;  %v1514_v54 = vshrl.u32 %v1437_v48, 16  ;;  %v1517_v55 = vshll.u32 %v1437_v48, 16  ;;  %3306 = vmatpush3.bf16.msra.mxu0 %v3507_v9  ;;  %v726_v1 = vor.u32 %v725_v45, %v722_v44  ;;  %v3950_v4 = vld [vmem:[#allocation2 + $0x30] sm:$0xf]  ;;  %v3958_v16 = vld [vmem:[%s4322_s2 + $0x80] sm:$0xff]  }
  0x54   : > { %v1523_v29 = vshll.u32 %v3940_v51, 16  ;;  %v3952_v6 = vld [vmem:[#allocation2 + $0x34] sm:$0x1]  ;;  %3307 = vmatprep.subr.bf16.mxu0 %v3509_v28  ;;  %v1506_v10 = vor.u32 %v1505_v24, %v1502_v49  ;;  %v734_v9 = vshrl.u32 %v3950_v4, 16  ;;  %v737_v22 = vshll.u32 %v3950_v4, 16 }
  0x55   : > { %v1516_v13 = vrot.slane %v1514_v54, 4  ;;  %v1519_v14 = vrot.slane %v1517_v55, 5  ;;  %v727_v11 = vrot.slane %v726_v1, 4  ;;  %v743_v23 = vshll.u32 %v3952_v6, 16 }
  0x56   : > { %v1525_v17 = vrot.slane %v1523_v29, 5  ;;  %3214 = vmatpush3.bf16.msra.mxu1 %v3510_v18  ;;  %v1507_v31 = vrot.slane %v1506_v10, 4  ;;  %v736_v33 = vrot.slane %v734_v9, 4  ;;  %v739_v37 = vrot.slane %v737_v22, 5 }
  0x57   : > { %v1520_v32 = vor.u32 %v1519_v14, %v1516_v13  ;;  %3215 = vmatprep.subr.bf16.mxu1 %v3512_v43  ;;  %3308 = vmatpush3.bf16.msra.mxu0 %v3509_v28  ;;  %v732_v36 = vsel %vm3776_vm9, %v727_v11, %v731_v46  ;;  %v3964_v41 = vrot.slane %v743_v23, 5  ;;  %v546_v42 = vrot.slane %v542_v57, 4  ;;  %v3513_v46 = vld [vmem:[%s4322_s2 + $0x178] sm:$0xff]   ;;  %v1709_v11 = vld [vmem:[#allocation2 + $0x8] sm:$0xe] }
  0x58   : > { %v2773_v60 = vcombine.low %v718_v63, %v732_v36  ;;  %v1512_v18 = vsel %vm3776_vm9, %v1507_v31, %v1511_v47  ;;  %3309 = vmatprep.subr.bf16.mxu0 %v3511_v62  ;;  %v3968_v45 = vld [vmem:[#allocation2 + $0x38] sm:$0xf]  ;;  %v609_v28 = vsel %vm3756_vm7, %v545_v34, %v608_v7  ;;  %v740_v48 = vor.u32 %v739_v37, %v736_v33 }
  0x59   : > { %v1521_v44 = vrot.slane %v1520_v32, 4  ;;  %v3970_v27 = vld [vmem:[#allocation2 + $0x3c] sm:$0x1]  ;;  %v748_v49 = vshrl.u32 %v3968_v45, 16  ;;  %v751_v24 = vshll.u32 %v3968_v45, 16  ;;  %v612_v12 = vsel %vm3675_vm2, %v546_v42, %v611_v21 }
  0x5a   : > { %v757_v47 = vshll.u32 %v3970_v27, 16  ;;  %610 = vst [vmem:[#allocation2 + $0x40] sm:$0xf] %v609_v28  ;;  %v1439_v54 = vld [vmem:[#allocation2 + $0x38] sm:$0xf]  ;;  %3216 = vmatpush3.bf16.msra.mxu1 %v3512_v43  ;;  %3197 = vmatprep.mubr.bf16.mxu1 %v2773_v60  ;;  %v741_v57 = vrot.slane %v740_v48, 4  ;;  %v2783_v28 = vcombine.low %v3731_v50, %v3788_v59 }
  0x5b   : > { %v1526_v55 = vsel %vm3776_vm9, %v1521_v44, %v1525_v17  ;;  %v1528_v63 = vshrl.u32 %v1439_v54, 16  ;;  %v1531_v1 = vshll.u32 %v1439_v54, 16  ;;  %3225 = vmatprep.subr.bf16.mxu1 %v3958_v16  ;;  %v750_v7 = vrot.slane %v748_v49, 4  ;;  %613 = vst [vmem:[#allocation2 + $0x44] sm:$0x1] %v612_v12  ;;  %3310 = vmatpush3.bf16.msra.mxu0 %v3511_v62  ;;  %v3990_v43 = vld [vmem:[%s4322_s2 + $0x180] sm:$0xff]  }
  0x5c   : > { %v2877_v29 = vcombine.low %v1512_v18, %v1526_v55  ;;  %v753_v10 = vrot.slane %v751_v24, 5  ;;  %v3985_v13 = vld [vmem:[#allocation2 + $0x3c] sm:$0x1]  ;;  %3311 = vmatprep.subr.bf16.mxu0 %v3513_v46  ;;  %v1710_v17 = vld [vmem:[#allocation2 + $0x10] sm:$0xe]  ;;  %v1735_v22 = vrot.slane %v3795_v2, 5  ;;  %v746_v36 = vsel %vm3776_vm9, %v741_v57, %v3964_v41 }
  0x5d   : > { %v1530_v14 = vrot.slane %v1528_v63, 4  ;;  %v1533_v9 = vrot.slane %v1531_v1, 5  ;;  %v759_v21 = vrot.slane %v757_v47, 5  ;;  %v1739_v31 = vrot.slane %v3800_v5, 5  ;;  %v1711_v5 = vld [vmem:[#allocation2 + $0x18] sm:$0xe] }
  0x5e   : > { %3293 = vmatprep.mubr.bf16.mxu0 %v2877_v29  ;;  %v754_v23 = vor.u32 %v753_v10, %v750_v7  ;;  %v1081_v32 = vrot.slane %v3810_v26, 5  ;;  %v1085_v62 = vrot.slane %v3815_v39, 5  ;;  %v1537_v33 = vshll.u32 %v3985_v13, 16  ;;  %v1713_v48 = vld [vmem:[#allocation2 + $0x28] sm:$0xe] }
  0x5f   : > { %v1743_v34 = vrot.slane %v3824_v52, 5  ;;  %v1534_v42 = vor.u32 %v1533_v9, %v1530_v14  ;;  %3312 = vmatpush3.bf16.msra.mxu0 %v3513_v46  ;;  %v2887_v60 = vrot.slane %v1709_v11, 9  ;;  %v2888_v18 = vrot.slane %v1710_v17, 9  ;;  %v1712_v46 = vld [vmem:[#allocation2 + $0x20] sm:$0xe]  ;;  %v3519_v52 = vld [vmem:[%s4322_s2 + $0x188] sm:$0xff]  }
  0x60   : > { %v755_v37 = vrot.slane %v754_v23, 4  ;;  %3321 = vmatprep.subr.bf16.mxu0 %v3990_v43  ;;  %v1747_v49 = vrot.slane %v3829_v0, 5  ;;  %v1539_v54 = vrot.slane %v1537_v33, 5  ;;  %v1044_v55 = vld [vmem:[#allocation2] sm:$0xe]  ;;  %v2889_v11 = vrot.slane %v1711_v5, 9 }
  0x61   : > { %v1441_v2 = vld [vmem:[#allocation2 + $0x40] sm:$0xf]  ;;  %v1535_v12 = vrot.slane %v1534_v42, 4  ;;  %v1045_v59 = vld [vmem:[#allocation2 + $0x8] sm:$0xe]  ;;  %v1736_v29 = vsel %vm4008_vm12, %v2887_v60, %v1735_v22  ;;  %v2795_v7 = vrot.slane %v1044_v55, 9  ;;  %v1740_v9 = vsel %vm4008_vm12, %v2888_v18, %v1739_v31 }
  0x62   : > { %v760_v26 = vsel %vm3776_vm9, %v755_v37, %v759_v21  ;;  %v1542_v39 = vshrl.u32 %v1441_v2, 16  ;;  %v1545_v44 = vshll.u32 %v1441_v2, 16  ;;  %v4013_v47 = vld [vmem:[#allocation2 + $0x44] sm:$0x1]  ;;  %v1714_v57 = vld [vmem:[#allocation2 + $0x30] sm:$0xe]  ;;  %v2911_v18 = vcombine.low %v1736_v29, %v1740_v9 }
  0x63   : > { %v2774_v24 = vcombine.low %v746_v36, %v760_v26  ;;  %v1551_v50 = vshll.u32 %v4013_v47, 16  ;;  %v2796_v10 = vrot.slane %v1045_v59, 9  ;;  %v2890_v17 = vrot.slane %v1712_v46, 9  ;;  %v1046_v42 = vld [vmem:[#allocation2 + $0x10] sm:$0xe]  ;;  %v3522_v55 = vld [vmem:[%s4322_s2 + $0x98] sm:$0xff]  }
  0x64   : > { %v1544_v63 = vrot.slane %v1542_v39, 4  ;;  %v1547_v1 = vrot.slane %v1545_v44, 5  ;;  %v2891_v23 = vrot.slane %v1713_v48, 9  ;;  %v1074_v21 = vsel %vm4008_vm12, %v2795_v7, %v1073_v56  ;;  %v1047_v2 = vld [vmem:[#allocation2 + $0x18] sm:$0xe]  ;;  %v3518_v56 = vld [vmem:[%s4322_s2 + $0x88] sm:$0xff]  }
  0x65   : > { %3198 = vmatmul.mubr.bf16.gmra.mrb[4].mxu1 %v2774_v24  ;;  %v1553_v0 = vrot.slane %v1551_v50, 5  ;;  %v1078_v22 = vsel %vm4008_vm12, %v2796_v10, %v1077_v58  ;;  %v1540_v33 = vsel %vm3776_vm9, %v1535_v12, %v1539_v54  ;;  %v1751_v37 = vrot.slane %v3930_v35, 5  ;;  %v3523_v50 = vld [vmem:[%s4322_s2 + $0x198] sm:$0xff]   ;;  %v3526_v59 = vld [vmem:[%s4322_s2 + $0xa8] sm:$0xff]   ;;  %v1048_v7 = vld [vmem:[#allocation2 + $0x20] sm:$0xe] }
  0x66   : > { %v1548_v14 = vor.u32 %v1547_v1, %v1544_v63  ;;  %3217 = vmatprep.mubr.bf16.mxu1 %v2783_v28  ;;  %v2819_v31 = vcombine.low %v1074_v21, %v1078_v22  ;;  %v2797_v61 = vrot.slane %v1046_v42, 9  ;;  %v2798_v60 = vrot.slane %v1047_v2, 9  ;;  %v1715_v28 = vld [vmem:[#allocation2 + $0x38] sm:$0xe]  ;;  %v3524_v63 = vld [vmem:[%s4322_s2 + $0xa0] sm:$0xff]   ;;  %v3530_v21 = vld [vmem:[%s4322_s2 + $0x1b0] sm:$0xff]  }
  0x67   : > { %v2892_v5 = vrot.slane %v1714_v57, 9  ;;  %v1755_v26 = vrot.slane %v3940_v51, 5  ;;  %v2785_v39 = vcombine.low %v3844_v40, %v3923_v3  ;;  %v3520_v51 = vld [vmem:[%s4322_s2 + $0x90] sm:$0xff]   ;;  %v1744_v40 = vsel %vm4008_vm12, %v2889_v11, %v1743_v34  ;;  %v1049_v10 = vld [vmem:[#allocation2 + $0x28] sm:$0xe] }
  0x68   : > { %v1549_v36 = vrot.slane %v1548_v14, 4  ;;  %v4043_v19 = vsel %vm4008_vm12, %v2797_v61, %v1081_v32  ;;  %v4047_v25 = vsel %vm4008_vm12, %v2798_v60, %v1085_v62  ;;  %v1748_v3 = vsel %vm4008_vm12, %v2890_v17, %v1747_v49  ;;  %v1716_v32 = vld [vmem:[#allocation2 + $0x40] sm:$0xe]  ;;  %v3535_v29 = vld [vmem:[#allocation2 + $0x10] ss:$8 sps:$4 sm:$0xff]   ;;  %v3527_v14 = vld [vmem:[%s4322_s2 + $0x1a8] sm:$0xff]  }
  0x69   : > { %v2820_v44 = vcombine.low %v4043_v19, %v4047_v25  ;;  %v2912_v62 = vcombine.low %v1744_v40, %v1748_v3  ;;  %v1752_v46 = vsel %vm4008_vm12, %v2891_v23, %v1751_v37  ;;  %v1756_v48 = vsel %vm4008_vm12, %v2892_v5, %v1755_v26  ;;  %v3529_v57 = vld [vmem:[%s4322_s2 + $0xb0] sm:$0xff]   ;;  %v3533_v5 = vld [vmem:[%s4322_s2 + $0x1b8] sm:$0xff]   ;;  %v3538_v26 = vld [vmem:[%s4322_s2 + $0xc8] sm:$0xff]  }
  0x6a   : > { %v1554_v58 = vsel %vm3776_vm9, %v1549_v36, %v1553_v0  ;;  %v2893_v34 = vrot.slane %v1715_v28, 9  ;;  %v1759_v49 = vrot.slane %v3985_v13, 5  ;;  %v2894_v24 = vrot.slane %v1716_v32, 9  ;;  %v3532_v0 = vld [vmem:[%s4322_s2 + $0xb8] sm:$0xff]   ;;  %v2090_v22 = vld [vmem:[#allocation2 + $0x10] sm:$0xf] }
  0x6b   : > { %v2878_v35 = vcombine.low %v1540_v33, %v1554_v58  ;;  %v1763_v54 = vrot.slane %v4013_v47, 5  ;;  %v2913_v12 = vcombine.low %v1752_v46, %v1756_v48  ;;  %v362_v47 = vld [vmem:[#allocation2 + $0x48] sm:$0x1]  ;;  %v2799_v9 = vrot.slane %v1048_v7, 9  ;;  %v2092_v33 = vld [vmem:[#allocation2 + $0x18] sm:$0xf] }
  0x6c   : > { %v1089_v11 = vrot.slane %v3882_v38, 5  ;;  %v2800_v17 = vrot.slane %v1049_v10, 9  ;;  %v1093_v23 = vrot.slane %v3925_v30, 5  ;;  %v3534_v36 = vld [vmem:[%s4322_s2 + $0xc0] sm:$0xff]   ;;  %v1050_v37 = vld [vmem:[#allocation2 + $0x30] sm:$0xe] }
  0x6d   : > { %3294 = vmatmul.mubr.bf16.gmra.mrb[4].mxu0 %v2878_v35  ;;  %3218 = vmatmul.mubr.bf16.vlgmr.msra.gmra.mrb[0].mxu1 %v2784_v8  ;;  %v1764_v13 = vsel %vm4008_vm12, %v2894_v24, %v1763_v54  ;;  %v2107_v42 = vshrl.u32 %v2090_v22, 16  ;;  %v2110_v2 = vshll.u32 %v2090_v22, 16  ;;  %v2121_v8 = vshrl.u32 %v2092_v33, 16  ;;  %v394_v35 = vld [vmem:[#allocation2 + $0x4c] sm:$0x1]  ;;  %v3540_v25 = vld [vmem:[%s4322_s2 + $0xd0] sm:$0xff]  }
  0x6e   : > { %3313 = vmatprep.mubr.bf16.mxu0 %v2911_v18  ;;  %3226 = vmatpush3.bf16.msra.mxu1 %v3958_v16  ;;  %v2786_v16 = vcombine.low %v3950_v4, %v3968_v45  ;;  %v3521_v4 = vld [vmem:[%s4322_s2 + $0x190] sm:$0xff]   ;;  %v1760_v45 = vsel %vm4008_vm12, %v2893_v34, %v1759_v49  ;;  %v1090_v38 = vsel %vm4008_vm12, %v2799_v9, %v1089_v11  ;;  %v2801_v61 = vrot.slane %v1050_v37, 9  ;;  %v4128_v28 = vld [vmem:[#allocation2 + $0x1c] sm:$0x1]  ;;  %v3537_v19 = vld [vmem:[#allocation2 + $0x20] ss:$8 sps:$4 sm:$0xff]  }
  0x6f   : > { %3227 = vmatprep.subr.bf16.mxu1 %v3518_v56  ;;  %3221 = vmatprep.mubr.bf16.mxu1 %v2785_v39  ;;  %v2914_v1 = vcombine.low %v1760_v45, %v1764_v13  ;;  %v1094_v30 = vsel %vm4008_vm12, %v2800_v17, %v1093_v23  ;;  %v1097_v60 = vrot.slane %v3952_v6, 5  ;;  %v1101_v18 = vrot.slane %v3970_v27, 5  ;;  %v3539_v49 = vld [vmem:[%s4322_s2 + $0x1c8] sm:$0xff]   ;;  %v3542_v24 = vld [vmem:[%s4322_s2 + $0xd8] sm:$0xff]   ;;  %v3545_v23 = vld [vmem:[%s4322_s2 + $0x1e0] sm:$0xff]  }
  0x70   : > { %v2821_v39 = vcombine.low %v1090_v38, %v1094_v30  ;;  %v395_v6 = vsel %vm3685_vm4, 0, %v394_v35  ;;  %v2109_v27 = vrot.slane %v2107_v42, 4  ;;  %v2112_v40 = vrot.slane %v2110_v2, 5  ;;  %v3548_v54 = vld [vmem:[#allocation2 + $0x30] ss:$8 sps:$4 sm:$0xff]  }
  0x71   : > { %v2123_v3 = vrot.slane %v2121_v8, 4  ;;  %396 = vst [vmem:[#allocation2 + $0x4c] sm:$0x1] %v395_v6  ;;  %v1098_v46 = vsel %vm4008_vm12, %v2801_v61, %v1097_v60  ;;  %v2130_v48 = vshll.u32 %v4128_v28, 16  ;;  %v2100_v9 = vld [vmem:[#allocation2 + $0x38] sm:$0xf] }
  0x72   : > { %3228 = vmatpush3.bf16.msra.mxu1 %v3518_v56  ;;  %v2124_v56 = vshll.u32 %v2092_v33, 16  ;;  %v2180_v37 = vshll.u32 %v2100_v9, 16  ;;  %v4175_v30 = vld [vmem:[#allocation2 + $0x24] sm:$0x1]  ;;  %v4177_v42 = vld [vmem:[#allocation2 + $0x2c] sm:$0x1] }
  0x73   : > { %3229 = vmatprep.subr.bf16.mxu1 %v3520_v51  ;;  %v2132_v13 = vrot.slane %v2130_v48, 5  ;;  %v3552_v61 = vld [vmem:[%s4322_s2 + $0xf8] sm:$0xff]   ;;  %v2102_v60 = vld [vmem:[#allocation2 + $0x40] sm:$0xf]  ;;  %v2144_v6 = vshll.u32 %v4175_v30, 16 }
  0x74   : > { %v2126_v32 = vrot.slane %v2124_v56, 5  ;;  %v3547_v56 = vld [vmem:[%s4322_s2 + $0x1e8] sm:$0xff]  }
  0x75   : > { %3314 = vmatmul.mubr.bf16.vlgmr.msra.gmra.mrb[0].mxu0 %v2912_v62  ;;  %3222 = vmatmul.mubr.bf16.gmra.mrb[4].mxu1 %v2786_v16  ;;  %v3536_v62 = vld [vmem:[%s4322_s2 + $0x1c0] sm:$0xff]  }
  0x76   : > { %3322 = vmatpush3.bf16.msra.mxu0 %v3990_v43  ;;  %3230 = vmatpush3.bf16.msra.mxu1 %v3520_v51  ;;  %v363_v43 = vsel %vm3675_vm2, 0, %v362_v47  ;;  %v4126_v51 = vld [vmem:[#allocation2 + $0x14] sm:$0x1]  ;;  %v2127_v34 = vor.u32 %v2126_v32, %v2123_v3  ;;  %v4189_v3 = vld [vmem:[#allocation2 + $0x3c] sm:$0x1] }
  0x77   : > { %3323 = vmatprep.subr.bf16.mxu0 %v3519_v52  ;;  %3231 = vmatprep.subr.bf16.mxu1 %v3522_v55  ;;  %364 = vst [vmem:[#allocation2 + $0x48] sm:$0x1] %v363_v43  ;;  %v3541_v47 = vld [vmem:[%s4322_s2 + $0x1d0] sm:$0xff]  }
  0x78   : > { %3317 = vmatprep.mubr.bf16.mxu0 %v2913_v12  ;;  %3241 = vmatprep.mubr.bf16.mxu1 %v2819_v31  ;;  %v1051_v31 = vld [vmem:[#allocation2 + $0x38] sm:$0xe]  ;;  %v2128_v45 = vrot.slane %v2127_v34, 4  ;;  %v2186_v34 = vshll.u32 %v4189_v3, 16 }
  0x79   : > { %v2802_v58 = vrot.slane %v1051_v31, 9 }
  0x7a   : > { %3324 = vmatpush3.bf16.msra.mxu0 %v3519_v52  ;;  %3232 = vmatpush3.bf16.msra.mxu1 %v3522_v55  ;;  %v2113_v52 = vor.u32 %v2112_v40, %v2109_v27  ;;  %v3554_v55 = vld [vmem:[#allocation2 + $0x8] ss:$8 sps:$4 sm:$0xff]   ;;  %v2158_v27 = vshll.u32 %v4177_v42, 16  ;;  %v4187_v40 = vld [vmem:[#allocation2 + $0x34] sm:$0x1] }
  0x7b   : > { %3325 = vmatprep.subr.bf16.mxu0 %v3521_v4  ;;  %3233 = vmatprep.subr.bf16.mxu1 %v3524_v63  ;;  %v1102_v20 = vsel %vm4008_vm12, %v2802_v58, %v1101_v18 }
  0x7c   : > { %v2822_v16 = vcombine.low %v1098_v46, %v1102_v20  ;;  %v2114_v12 = vrot.slane %v2113_v52, 4  ;;  %v2194_v46 = vshll.u32 %v2102_v60, 16 }
  0x7d   : > { %3318 = vmatmul.mubr.bf16.gmra.mrb[4].mxu0 %v2914_v1 }
  0x7e   : > { %3326 = vmatpush3.bf16.msra.mxu0 %v3521_v4  ;;  %3234 = vmatpush3.bf16.msra.mxu1 %v3524_v63  ;;  %v3544_v63 = vld [vmem:[%s4322_s2 + $0xe0] sm:$0xff]   ;;  %v2104_v35 = vld [vmem:[#allocation2 + $0x48] sm:$0xf] }
  0x7f   : > { %3327 = vmatprep.subr.bf16.mxu0 %v3523_v50  ;;  %3235 = vmatprep.subr.bf16.mxu1 %v3526_v59  ;;  %v3550_v43 = vld [vmem:[#allocation2 + $0x40] ss:$8 sps:$4 sm:$0xff]   ;;  %v2205_v20 = vshrl.u32 %v2104_v35, 16 }
  0x80   : > { %3337 = vmatprep.mubr.bf16.mxu0 %v3535_v29  ;;  %v2096_v29 = vld [vmem:[#allocation2 + $0x28] sm:$0xf] }
  0x81   : > { %v2149_v11 = vshrl.u32 %v2096_v29, 16  ;;  %v2152_v17 = vshll.u32 %v2096_v29, 16 }
  0x82   : > { %3328 = vmatpush3.bf16.msra.mxu0 %v3523_v50  ;;  %3236 = vmatpush3.bf16.msra.mxu1 %v3526_v59  ;;  %v2133_v50 = vsel %vm3776_vm9, %v2128_v45, %v2132_v13  ;;  %v2094_v59 = vld [vmem:[#allocation2 + $0x20] sm:$0xf]  ;;  %v4207_v45 = vld [vmem:[%s4322_s2 + $0x208] sm:$0xff]   ;;  %v4209_v13 = vld [vmem:[#allocation2 + $0x44] sm:$0x1] }
  0x83   : > { %3329 = vmatprep.subr.bf16.mxu0 %v3525_v15  ;;  %3237 = vmatprep.subr.bf16.mxu1 %v3529_v57  ;;  %v2135_v10 = vshrl.u32 %v2094_v59, 16  ;;  %v2151_v2 = vrot.slane %v2149_v11, 4  ;;  %v2154_v8 = vrot.slane %v2152_v17, 5  ;;  %v2414_v17 = vrot.slane %v4187_v40, 5 }
  0x85   : > { %v2137_v31 = vrot.slane %v2135_v10, 4  ;;  %v2155_v32 = vor.u32 %v2154_v8, %v2151_v2  ;;  %v4212_v10 = vld [vmem:[#allocation2 + $0x4c] sm:$0x1]  ;;  %v3560_v2 = vld [vmem:[%s4322_s2 + $0x210] sm:$0xff]  }
  0x86   : > { %3330 = vmatpush3.bf16.msra.mxu0 %v3525_v15  ;;  %3238 = vmatpush3.bf16.msra.mxu1 %v3529_v57  ;;  %v3543_v15 = vld [vmem:[%s4322_s2 + $0x1d8] sm:$0xff]   ;;  %v3546_v57 = vld [vmem:[%s4322_s2 + $0xe8] sm:$0xff]   ;;  %v2372_v8 = vld [vmem:[#allocation2 + $0x10] sm:$0xe] }
  0x87   : > { %3331 = vmatprep.subr.bf16.mxu0 %v3527_v14  ;;  %3239 = vmatprep.subr.bf16.mxu1 %v3532_v0 }
  0x8a   : > { %3332 = vmatpush3.bf16.msra.mxu0 %v3527_v14  ;;  %3240 = vmatpush3.bf16.msra.mxu1 %v3532_v0  ;;  %v2138_v14 = vshll.u32 %v2094_v59, 16  ;;  %v2098_v0 = vld [vmem:[#allocation2 + $0x30] sm:$0xf]  ;;  %v2377_v59 = vld [vmem:[#allocation2 + $0x38] sm:$0xe] }
  0x8b   : > { %3333 = vmatprep.subr.bf16.mxu0 %v3530_v21  ;;  %3249 = vmatprep.subr.bf16.mxu1 %v3534_v36  ;;  %v2163_v22 = vshrl.u32 %v2098_v0, 16  ;;  %v2166_v33 = vshll.u32 %v2098_v0, 16  ;;  %v3558_v0 = vld [vmem:[#allocation2 + $0x28] ss:$8 sps:$4 sm:$0xff]  }
  0x8c   : > { %v2140_v38 = vrot.slane %v2138_v14, 5 }
  0x8d   : > { %3242 = vmatmul.mubr.bf16.vlgmr.msra.gmra.mrb[0].mxu1 %v2820_v44  ;;  %v2116_v44 = vshll.u32 %v4126_v51, 16  ;;  %v2165_v58 = vrot.slane %v2163_v22, 4  ;;  %v2168_v18 = vrot.slane %v2166_v33, 5 }
  0x8e   : > { %3334 = vmatpush3.bf16.msra.mxu0 %v3530_v21  ;;  %3250 = vmatpush3.bf16.msra.mxu1 %v3534_v36  ;;  %v3549_v21 = vld [vmem:[%s4322_s2 + $0xf0] sm:$0xff]   ;;  %v2177_v36 = vshrl.u32 %v2100_v9, 16  ;;  %v2200_v9 = vshll.u32 %v4209_v13, 16 }
  0x8f   : > { %3335 = vmatprep.subr.bf16.mxu0 %v3533_v5  ;;  %3251 = vmatprep.subr.bf16.mxu1 %v3538_v26  ;;  %v2118_v4 = vrot.slane %v2116_v44, 5  ;;  %v4197_v44 = vld [vmem:[%s4322_s2 + $0x200] sm:$0xff]   ;;  %v2169_v48 = vor.u32 %v2168_v18, %v2165_v58 }
  0x90   : > { %3245 = vmatprep.mubr.bf16.mxu1 %v2821_v39  ;;  %v2141_v39 = vor.u32 %v2140_v38, %v2137_v31  ;;  %v2202_v58 = vrot.slane %v2200_v9, 5 }
  0x91   : > { %v2119_v1 = vsel %vm3776_vm9, %v2114_v12, %v2118_v4  ;;  %v3553_v12 = vld [vmem:[%s4322_s2 + $0x1f8] sm:$0xff]   ;;  %v2156_v4 = vrot.slane %v2155_v32, 4  ;;  %v2170_v29 = vrot.slane %v2169_v48, 4  ;;  %v2402_v32 = vrot.slane %v4128_v28, 5  ;;  %v3563_v48 = vld [vmem:[%s4322_s2 + $0x228] sm:$0xff]  }
  0x92   : > { %3336 = vmatpush3.bf16.msra.mxu0 %v3533_v5  ;;  %3252 = vmatpush3.bf16.msra.mxu1 %v3538_v26  ;;  %v2967_v7 = vcombine.low %v2119_v1, %v2133_v50  ;;  %v2179_v5 = vrot.slane %v2177_v36, 4  ;;  %v2182_v26 = vrot.slane %v2180_v37, 5  ;;  %v2376_v50 = vld [vmem:[#allocation2 + $0x30] sm:$0xe]  ;;  %v2214_v37 = vshll.u32 %v4212_v10, 16 }
  0x93   : > { %3345 = vmatprep.subr.bf16.mxu0 %v3536_v62  ;;  %3253 = vmatprep.subr.bf16.mxu1 %v3540_v25  ;;  %v2983_v11 = vrot.slane %v2376_v50, 9  ;;  %v2410_v50 = vrot.slane %v4177_v42, 5 }
  0x94   : > { %v2183_v52 = vor.u32 %v2182_v26, %v2179_v5 }
  0x95   : > { %3338 = vmatmul.mubr.bf16.vlgmr.msra.gmra.mrb[0].mxu0 %v3537_v19  ;;  %3246 = vmatmul.mubr.bf16.gmra.mrb[4].mxu1 %v2822_v16  ;;  %v2208_v19 = vshll.u32 %v2104_v35, 16  ;;  %v2172_v16 = vshll.u32 %v4187_v40, 16  ;;  %v2415_v18 = vsel %vm4008_vm12, %v2983_v11, %v2414_v17  ;;  %v2398_v40 = vrot.slane %v4126_v51, 5 }
  0x96   : > { %3346 = vmatpush3.bf16.msra.mxu0 %v3536_v62  ;;  %3254 = vmatpush3.bf16.msra.mxu1 %v3540_v25  ;;  %v2191_v62 = vshrl.u32 %v2102_v60, 16  ;;  %v3551_v25 = vld [vmem:[%s4322_s2 + $0x1f0] sm:$0xff]   ;;  %v3559_v60 = vld [vmem:[#allocation2 + $0x38] ss:$8 sps:$4 sm:$0xff]  }
  0x97   : > { %3347 = vmatprep.subr.bf16.mxu0 %v3539_v49  ;;  %3255 = vmatprep.subr.bf16.mxu1 %v3542_v24  ;;  %v2210_v1 = vrot.slane %v2208_v19, 5 }
  0x98   : > { %3341 = vmatprep.mubr.bf16.mxu0 %v3548_v54  ;;  %3265 = vmatprep.mubr.bf16.mxu1 %v3554_v55  ;;  %v2146_v54 = vrot.slane %v2144_v6, 5  ;;  %v2160_v55 = vrot.slane %v2158_v27, 5  ;;  %v2216_v6 = vrot.slane %v2214_v37, 5  ;;  %v2979_v27 = vrot.slane %v2372_v8, 9  ;;  %v3015_v8 = vld [vmem:[%s4326_s6] ss:$0 sm:$0xff] }
  0x9a   : > { %3348 = vmatpush3.bf16.msra.mxu0 %v3539_v49  ;;  %3256 = vmatpush3.bf16.msra.mxu1 %v3542_v24  ;;  %v3555_v49 = vld [vmem:[#allocation2 + $0x18] ss:$8 sps:$4 sm:$0xff]   ;;  %v2142_v24 = vrot.slane %v2141_v39, 4  ;;  %v2161_v22 = vsel %vm3776_vm9, %v2156_v4, %v2160_v55  ;;  %v2399_v51 = vsel %vm4008_vm12, %v2979_v27, %v2398_v40 }
  0x9b   : > { %3349 = vmatprep.subr.bf16.mxu0 %v3541_v47  ;;  %3257 = vmatprep.subr.bf16.mxu1 %v3544_v63  ;;  %v2374_v4 = vld [vmem:[#allocation2 + $0x20] sm:$0xe]  ;;  %v3017_v27 = vld [vmem:[%s4325_s5] ss:$0 sm:$0xff] }
  0x9c   : > { %v2147_v14 = vsel %vm3776_vm9, %v2142_v24, %v2146_v54  ;;  %v2426_v24 = vrot.slane %v4212_v10, 5 }
  0x9d   : > { %3342 = vmatmul.mubr.bf16.gmra.mrb[4].mxu0 %v3550_v43  ;;  %v2207_v43 = vrot.slane %v2205_v20, 4 }
  0x9e   : > { %3350 = vmatpush3.bf16.msra.mxu0 %v3541_v47  ;;  %3258 = vmatpush3.bf16.msra.mxu1 %v3544_v63  ;;  %v2193_v47 = vrot.slane %v2191_v62, 4  ;;  %v2196_v63 = vrot.slane %v2194_v46, 5  ;;  %v3561_v62 = vld [vmem:[%s4322_s2 + $0x218] sm:$0xff]  }
  0x9f   : > { %3351 = vmatprep.subr.bf16.mxu0 %v3543_v15  ;;  %3259 = vmatprep.subr.bf16.mxu1 %v3546_v57  ;;  %v2211_v36 = vor.u32 %v2210_v1, %v2207_v43  ;;  %v2406_v43 = vrot.slane %v4175_v30, 5 }
  0xa0   : > { %3361 = vmatprep.mubr.bf16.mxu0 %v2967_v7  ;;  %v2188_v7 = vrot.slane %v2186_v34, 5  ;;  %v2197_v33 = vor.u32 %v2196_v63, %v2193_v47  ;;  %v2379_v34 = vld [vmem:[#allocation2 + $0x48] sm:$0xe]  ;;  %v2981_v63 = vrot.slane %v2374_v4, 9 }
  0xa1   : > { %v2212_v39 = vrot.slane %v2211_v36, 4  ;;  %v2986_v55 = vrot.slane %v2379_v34, 9 }
  0xa2   : > { %3352 = vmatpush3.bf16.msra.mxu0 %v3543_v15  ;;  %3260 = vmatpush3.bf16.msra.mxu1 %v3546_v57  ;;  %v2174_v15 = vrot.slane %v2172_v16, 5  ;;  %v2184_v57 = vrot.slane %v2183_v52, 4  ;;  %v2198_v35 = vrot.slane %v2197_v33, 4  ;;  %v3564_v16 = vld [vmem:[%s4322_s2 + $0x230] sm:$0xff]   ;;  %v2378_v52 = vld [vmem:[#allocation2 + $0x40] sm:$0xe] }
  0xa3   : > { %3353 = vmatprep.subr.bf16.mxu0 %v3545_v23  ;;  %3261 = vmatprep.subr.bf16.mxu1 %v3549_v21  ;;  %v2217_v19 = vsel %vm3776_vm9, %v2212_v39, %v2216_v6  ;;  %v2985_v54 = vrot.slane %v2378_v52, 9 }
  0xa4   : > { %v2175_v31 = vsel %vm3776_vm9, %v2170_v29, %v2174_v15  ;;  %v2189_v38 = vsel %vm3776_vm9, %v2184_v57, %v2188_v7  ;;  %v2203_v20 = vsel %vm3776_vm9, %v2198_v35, %v2202_v58  ;;  %v2407_v29 = vsel %vm4008_vm12, %v2981_v63, %v2406_v43  ;;  %v3066_v58 = vld [vmem:[%s320_s30 + $0x8] sm:$0xff]  }
  0xa5   : > { %v2969_v26 = vcombine.low %v2175_v31, %v2189_v38  ;;  %v3068_v31 = vld [vmem:[%s320_s30 + $0x18] sm:$0xff]   ;;  %v3067_v38 = vld [vmem:[%s320_s30 + $0x10] sm:$0xff]   ;;  %v3053_v6 = vunpack.c.l.bf16 %v3066_v58 }
  0xa6   : > { %3354 = vmatpush3.bf16.msra.mxu0 %v3545_v23  ;;  %3262 = vmatpush3.bf16.msra.mxu1 %v3549_v21  ;;  %v2984_v23 = vrot.slane %v2377_v59, 9  ;;  %v2418_v21 = vrot.slane %v4189_v3, 5 }
  0xa7   : > { %3355 = vmatprep.subr.bf16.mxu0 %v3547_v56  ;;  %3263 = vmatprep.subr.bf16.mxu1 %v3552_v61  ;;  %v2607_v34 = vmul.f32 %v3053_v6, %v3015_v8 }
  0xa8   : > { %v2419_v5 = vsel %vm4008_vm12, %v2984_v23, %v2418_v21 }
  0xa9   : > { %v3005_v46 = vcombine.low %v2415_v18, %v2419_v5  ;;  %v3016_v5 = vld [vmem:[%s4327_s7] ss:$0 sm:$0xff] }
  0xaa   : > { %3356 = vmatpush3.bf16.msra.mxu0 %v3547_v56  ;;  %3264 = vmatpush3.bf16.msra.mxu1 %v3552_v61  ;;  %v2373_v56 = vld [vmem:[#allocation2 + $0x18] sm:$0xe]  ;;  %v2968_v61 = vcombine.low %v2147_v14, %v2161_v22 }
  0xab   : > { %3357 = vmatprep.subr.bf16.mxu0 %v3551_v25  ;;  %3393 = vmatprep.subr.bf16.mxu1 %v4197_v44  ;;  %v2980_v3 = vrot.slane %v2373_v56, 9  ;;  %v3057_v56 = vunpack.c.l.bf16 %v3067_v38 }
  0xad   : > { %3266 = vmatmul.mubr.bf16.vlgmr.msra.gmra.mrb[0].mxu1 %v3555_v49  ;;  %v2403_v28 = vsel %vm4008_vm12, %v2980_v3, %v2402_v32  ;;  %v2422_v49 = vrot.slane %v4209_v13, 5  ;;  %v2427_v13 = vsel %vm4008_vm12, %v2986_v55, %v2426_v24  ;;  %v2609_v35 = vmul.f32 %v3057_v56, %v3015_v8 }
  0xae   : > { %3358 = vmatpush3.bf16.msra.mxu0 %v3551_v25  ;;  %3401 = vmatpush3.bf16.msra.mxu1 %v4197_v44  ;;  %v3562_v25 = vld [vmem:[%s4322_s2 + $0x220] sm:$0xff]   ;;  %v3003_v53 = vcombine.low %v2399_v51, %v2403_v28  ;;  %v3054_v28 = vunpack.c.h.bf16 %v3066_v58 }
  0xaf   : > { %3359 = vmatprep.subr.bf16.mxu0 %v3553_v12  ;;  %3394 = vmatprep.subr.bf16.mxu1 %v4207_v45  ;;  %v2423_v47 = vsel %vm4008_vm12, %v2985_v54, %v2422_v49  ;;  %v2624_v51 = vadd.f32 %v3016_v5, %v2609_v35 }
  0xb0   : > { %3269 = vmatprep.mubr.bf16.mxu1 %v3558_v0  ;;  %v3006_v59 = vcombine.low %v2423_v47, %v2427_v13  ;;  %v2608_v47 = vmul.f32 %v3054_v28, %v3015_v8 }
  0xb2   : > { %3360 = vmatpush3.bf16.msra.mxu0 %v3553_v12  ;;  %3402 = vmatpush3.bf16.msra.mxu1 %v4207_v45  ;;  %v3565_v12 = vld [vmem:[%s4322_s2 + $0x238] sm:$0xff]  }
  0xb3   : > { %3369 = vmatprep.subr.bf16.mxu0 %v4197_v44  ;;  %3395 = vmatprep.subr.bf16.mxu1 %v3560_v2 }
  0xb5   : > { %3362 = vmatmul.mubr.bf16.vlgmr.msra.gmra.mrb[0].mxu0 %v2968_v61  ;;  %3270 = vmatmul.mubr.bf16.gmra.mrb[4].mxu1 %v3559_v60  ;;  %v3062_v61 = vunpack.c.h.bf16 %v3068_v31  ;;  %v3058_v60 = vunpack.c.h.bf16 %v3067_v38 }
  0xb6   : > { %3370 = vmatpush3.bf16.msra.mxu0 %v4197_v44  ;;  %3365 = vmatprep.mubr.bf16.mxu0 %v2969_v26  ;;  %v2970_v44 = vcombine.low %v2203_v20, %v2217_v19  ;;  %v3048_v26 = vld [vmem:[%s320_s30] sm:$0xff]  }
  0xb7   : > { %3371 = vmatprep.subr.bf16.mxu0 %v4207_v45  ;;  %3403 = vmatpush3.bf16.msra.mxu1 %v3560_v2  ;;  %v2612_v39 = vmul.f32 %v3062_v61, %v3015_v8  ;;  %v2610_v3 = vmul.f32 %v3058_v60, %v3015_v8 }
  0xb8   : > { %3396 = vmatprep.subr.bf16.mxu1 %v3561_v62  ;;  %3389 = vmatprep.mubr.bf16.mxu1 %v3005_v46  ;;  %v3049_v46 = vunpack.c.l.bf16 %v3048_v26 }
  0xb9   : > { %v2625_v54 = vadd.f32 %v3016_v5, %v2610_v3 }
  0xba   : > { %3372 = vmatpush3.bf16.msra.mxu0 %v4207_v45  ;;  %v2375_v45 = vld [vmem:[#allocation2 + $0x28] sm:$0xe] }
  0xbb   : > { %3373 = vmatprep.subr.bf16.mxu0 %v3560_v2  ;;  %3404 = vmatpush3.bf16.msra.mxu1 %v3561_v62  ;;  %v2982_v1 = vrot.slane %v2375_v45, 9 }
  0xbc   : > { %3397 = vmatprep.subr.bf16.mxu1 %v3562_v25 }
  0xbd   : > { %3366 = vmatmul.mubr.bf16.gmra.mrb[4].mxu0 %v2970_v44  ;;  %v2411_v15 = vsel %vm4008_vm12, %v2982_v1, %v2410_v50 }
  0xbe   : > { %3374 = vmatpush3.bf16.msra.mxu0 %v3560_v2  ;;  %3385 = vmatprep.mubr.bf16.mxu0 %v3003_v53  ;;  %v3004_v57 = vcombine.low %v2407_v29, %v2411_v15  ;;  %v3061_v2 = vunpack.c.l.bf16 %v3068_v31  ;;  %v2622_v29 = vadd.f32 %v3016_v5, %v2607_v34 }
  0xbf   : > { %3375 = vmatprep.subr.bf16.mxu0 %v3561_v62  ;;  %3405 = vmatpush3.bf16.msra.mxu1 %v3562_v25 }
  0xc0   : > { %3398 = vmatprep.subr.bf16.mxu1 %v3563_v48  ;;  %v2611_v18 = vmul.f32 %v3061_v2, %v3015_v8 }
  0xc2   : > { %3376 = vmatpush3.bf16.msra.mxu0 %v3561_v62  ;;  %v2626_v62 = vadd.f32 %v3016_v5, %v2611_v18 }
  0xc3   : > { %3377 = vmatprep.subr.bf16.mxu0 %v3562_v25  ;;  %3406 = vmatpush3.bf16.msra.mxu1 %v3563_v48 }
  0xc4   : > { %3399 = vmatprep.subr.bf16.mxu1 %v3564_v16 }
  0xc6   : > { %3378 = vmatpush3.bf16.msra.mxu0 %v3562_v25 }
  0xc7   : > { %3379 = vmatprep.subr.bf16.mxu0 %v3563_v48  ;;  %3407 = vmatpush3.bf16.msra.mxu1 %v3564_v16 }
  0xc8   : > { %3400 = vmatprep.subr.bf16.mxu1 %v3565_v12 }
  0xca   : > { %3380 = vmatpush3.bf16.msra.mxu0 %v3563_v48  ;;  %v2627_v48 = vadd.f32 %v3016_v5, %v2612_v39 }
  0xcb   : > { %3381 = vmatprep.subr.bf16.mxu0 %v3564_v16  ;;  %3408 = vmatpush3.bf16.msra.mxu1 %v3565_v12 }
  0xce   : > { %3382 = vmatpush3.bf16.msra.mxu0 %v3564_v16  ;;  %3390 = vmatmul.mubr.bf16.vlgmr.msra.gmra.mrb[8].mxu1 %v3006_v59  ;;  %v3050_v16 = vunpack.c.h.bf16 %v3048_v26 }
  0xcf   : > { %3383 = vmatprep.subr.bf16.mxu0 %v3565_v12 }
  0xd0   : > { %v2606_v50 = vmul.f32 %v3050_v16, %v3015_v8 }
  0xd2   : > { %3384 = vmatpush3.bf16.msra.mxu0 %v3565_v12  ;;  %v2605_v12 = vmul.f32 %v3049_v46, %v3015_v8 }
  0xd5   : > { %3386 = vmatmul.mubr.bf16.vlgmr.msra.gmra.mrb[0].mxu0 %v3004_v57 }
 0x180   : > { %v4277_v7 = vpop.f32.mrb[0].mxu1 }
 0x181   : > { %v4279_v30 = vpop.f32.mrb[1].mxu1 }
 0x182   : > { %v4281_v42 = vpop.f32.mrb[2].mxu1 }
 0x183   : > { %v4283_v10 = vpop.f32.mrb[3].mxu1 }
 0x188   : > { %v3271_v14 = vpop.f32.mrb[4].mxu1 }
 0x189   : > { %v1404_v0 = vpop.f32.mrb[5].mxu1 }
 0x18a   : > { %v3272_v9 = vpop.f32.mrb[6].mxu1 }
 0x18b   : > { %v1407_v11 = vpop.f32.mrb[7].mxu1 }
 0x190   : > { %v3367_v41 = vpop.f32.mrb[4].mxu0 }
 0x191   : > { %v3413_v17 = vadd.f32 %v3367_v41, %v3271_v14  ;;  %v2349_v23 = vpop.f32.mrb[5].mxu0 }
 0x192   : > { %v3415_v21 = vadd.f32 %v2349_v23, %v1404_v0  ;;  %v3368_v22 = vpop.f32.mrb[6].mxu0 }
 0x193   : > { %v3417_v33 = vadd.f32 %v3368_v22, %v3272_v9  ;;  %v2352_v36 = vpop.f32.mrb[7].mxu0  ;;  %v2620_v9 = vadd.f32 %v3016_v5, %v2605_v12 }
 0x194   : > { %v3419_v37 = vadd.f32 %v2352_v36, %v1407_v11 }
 0x1a1   : > { %v3391_v40 = vpop.f32.mrb[8].mxu1 }
 0x1a2   : > { %v3414_v32 = vadd.f32 %v3413_v17, %v3391_v40  ;;  %v2559_v20 = vpop.f32.mrb[9].mxu1 }
 0x1a3   : > { %v3416_v19 = vadd.f32 %v3415_v21, %v2559_v20  ;;  %v3392_v25 = vpop.f32.mrb[10].mxu1  ;;  %v2623_v21 = vadd.f32 %v3016_v5, %v2608_v47 }
 0x1a4   : > { %v2641_v44 = vadd.f32 %v3414_v32, %v3017_v27  ;;  %v3418_v53 = vadd.f32 %v3417_v33, %v3392_v25  ;;  %v2562_v52 = vpop.f32.mrb[11].mxu1 }
 0x1a5   : > { %v2639_v49 = vadd.f32 %v3416_v19, %v3017_v27  ;;  %v3420_v24 = vadd.f32 %v3419_v37, %v2562_v52 }
 0x1a6   : > { %v2649_v55 = vadd.f32 %v2641_v44, %v2626_v62  ;;  %v2642_v4 = vadd.f32 %v3418_v53, %v3017_v27 }
 0x1a7   : > { %v2647_v45 = vadd.f32 %v2639_v49, %v2624_v51  ;;  %v2640_v13 = vadd.f32 %v3420_v24, %v3017_v27 }
 0x1a8   : > { %v3387_v63 = vpop.f32.mrb[0].mxu0  ;;  %v2657_v43 = vmax.f32 %v2649_v55, 0.0  ;;  %v2650_v1 = vadd.f32 %v2642_v4, %v2627_v48 }
 0x1a9   : > { %v3409_v59 = vadd.f32 %v3387_v63, %v4277_v7  ;;  %v2543_v15 = vpop.f32.mrb[1].mxu0  ;;  %v2655_v57 = vmax.f32 %v2647_v45, 0.0  ;;  %v2648_v14 = vadd.f32 %v2640_v13, %v2625_v54 }
 0x1aa   : > { %2665 = vst [vmem:[%s4303_s17 + $0x30] sm:$0xff] %v2657_v43  ;;  %v3410_v0 = vadd.f32 %v2543_v15, %v4279_v30  ;;  %v3388_v11 = vpop.f32.mrb[2].mxu0  ;;  %v2658_v41 = vmax.f32 %v2650_v1, 0.0  ;;  %v2621_v30 = vadd.f32 %v3016_v5, %v2606_v50 }
 0x1ab   : > { %v2637_v17 = vadd.f32 %v3409_v59, %v3017_v27  ;;  %2663 = vst [vmem:[%s4303_s17 + $0x20] sm:$0xff] %v2655_v57  ;;  %v3411_v23 = vadd.f32 %v3388_v11, %v4281_v42  ;;  %v2546_v22 = vpop.f32.mrb[3].mxu0  ;;  %v2656_v7 = vmax.f32 %v2648_v14, 0.0 }
 0x1ac   : > { %v2635_v33 = vadd.f32 %v3410_v0, %v3017_v27  ;;  %2666 = vst [vmem:[%s4303_s17 + $0x38] sm:$0xff] %v2658_v41  ;;  %v3412_v36 = vadd.f32 %v2546_v22, %v4283_v10 }
 0x1ad   : > { %v2645_v37 = vadd.f32 %v2637_v17, %v2622_v29  ;;  %v2638_v31 = vadd.f32 %v3411_v23, %v3017_v27  ;;  %2664 = vst [vmem:[%s4303_s17 + $0x28] sm:$0xff] %v2656_v7 }
 0x1ae   : > { %v2643_v38 = vadd.f32 %v2635_v33, %v2620_v9  ;;  %v2636_v2 = vadd.f32 %v3412_v36, %v3017_v27 }
 0x1af   : > { %v2653_v8 = vmax.f32 %v2645_v37, 0.0  ;;  %v2646_v56 = vadd.f32 %v2638_v31, %v2623_v21 }
 0x1b0   : > { %v2651_v42 = vmax.f32 %v2643_v38, 0.0  ;;  %v2644_v61 = vadd.f32 %v2636_v2, %v2621_v30 }
 0x1b1   : > { %2661 = vst [vmem:[%s4303_s17 + $0x10] sm:$0xff] %v2653_v8  ;;  %v2654_v60 = vmax.f32 %v2646_v56, 0.0 }
 0x1b2   : > { %2659 = vst [vmem:[%s4303_s17] sm:$0xff] %v2651_v42  ;;  %v2652_v58 = vmax.f32 %v2644_v61, 0.0 }
 0x1b3   : > { %2662 = vst [vmem:[%s4303_s17 + $0x18] sm:$0xff] %v2654_v60 }
 0x1b4   : > { %2660 = vst [vmem:[%s4303_s17 + $0x8] sm:$0xff] %v2652_v58 }
 0x1b5 PF: > { %s18_s27 = sadd.s32 1, %s3572_s27  }
 0x1b6   : > { %p15_p4 = scmp.ge.s32.totalorder %s18_s27, 4  }
 0x1b8   :  { %17 = sbr.rel (!%p15_p4) target bundleno = 1 (0x1), region = 96 }

</bundles_post_ra>
